<compile_context>
chip_gen: v5e
topology: v5e:2x2
jax: 0.10.0
libtpu: 0.0.40
codegen_flags: <defaults>
</compile_context>

<pallas_src>
import functools

import jax
import jax.numpy as jnp
from jax.experimental import pallas as pl
from jax.experimental.pallas import tpu as pltpu


D_IN = 784
D_H1, D_H2, D_H3 = 1024, 512, 256
D_OUT_PAD = 128          # pad the 1-wide head to a full lane for unmasked stores


def _default_act_dtype():
    """bf16 epilogue on chips whose VPU has a packed-bf16 path (v6e/v7x);
    f32 elsewhere (v5e and older would unpack and regress)."""
    try:
        kind = jax.devices()[0].device_kind.lower()
    except Exception:
        return jnp.float32
    if any(tag in kind for tag in ("v2", "v3", "v4", "v5")):
        return jnp.float32
    return jnp.bfloat16


def prepare_params(params, *, compute_dtype=jnp.bfloat16):
    """ONE-TIME layout / dtype prep.  Call once at param-load time, not per
    forward: this is where the bf16 casts and the 1->128 head padding live."""
    return {
        "w1": params["w1"].astype(compute_dtype),                               # (784, 1024)
        "w2": params["w2"].astype(compute_dtype),                               # (1024, 512)
        "w3": params["w3"].astype(compute_dtype),                               # (512, 256)
        "w4": jnp.pad(params["w4"], ((0, 0), (0, D_OUT_PAD - 1))).astype(compute_dtype),
        "b1": params["b1"].astype(jnp.float32),
        "b2": params["b2"].astype(jnp.float32),
        "b3": params["b3"].astype(jnp.float32),
        "b4": jnp.pad(params["b4"], ((0, 0), (0, D_OUT_PAD - 1))).astype(jnp.float32),
    }


def discriminator_kernel(x_ref,
                         w1_ref, b1_ref,
                         w2_ref, b2_ref,
                         w3_ref, b3_ref,
                         w4_ref, b4_ref,
                         o_ref,
                         *, compute_dtype, act_dtype):
    # bf16 cast of the f32 input tile happens here (no host-side pad/cast pass).
    x = x_ref[...].astype(compute_dtype)

    def hidden(h_acc_f32, b_ref):
        # Bias + LeakyReLU(0.2) in act_dtype (bf16 on v6e/v7x, f32 on v5e).
        # Dropout(0.3) is identity in eval mode.
        h = h_acc_f32.astype(act_dtype) + b_ref[...].astype(act_dtype)
        h = jnp.where(h > 0, h, 0.2 * h)
        return h.astype(compute_dtype)

    # Layer 1: Linear(784 -> 1024) + LeakyReLU
    h = hidden(jnp.dot(x, w1_ref[...], preferred_element_type=jnp.float32), b1_ref)
    # Layer 2: Linear(1024 -> 512) + LeakyReLU
    h = hidden(jnp.dot(h, w2_ref[...], preferred_element_type=jnp.float32), b2_ref)
    # Layer 3: Linear(512 -> 256) + LeakyReLU
    h = hidden(jnp.dot(h, w3_ref[...], preferred_element_type=jnp.float32), b3_ref)
    # Layer 4: Linear(256 -> 1), head padded to 128 lanes (column 0 is real).
    z = jnp.dot(h, w4_ref[...], preferred_element_type=jnp.float32) + b4_ref[...]
    # Sigmoid: exp + approx reciprocal both ride the EUP slot.
    o_ref[...] = pl.reciprocal(1.0 + jnp.exp(-z), approx=True).astype(o_ref.dtype)


def _pick_tile_b(B, max_tile=512):
    """MXU-friendly batch tile: multiple of 16, >=4 grid steps when possible
    (megacore + DMA pipelining), capped at max_tile rows."""
    if B <= 32:
        return B                          # full-dim block: always legal
    target = pl.cdiv(B, 4)                # aim for at least 4 grid steps
    tile = min(max_tile, max(64, target))
    tile = min(tile, B)
    return max(16, (tile // 16) * 16)


def discriminator_forward(x, prepared, *, tile_b=None,
                          compute_dtype=jnp.bfloat16, act_dtype=None):
    """x: [B, 784] float32.  prepared: output of prepare_params()."""
    B, d_in = x.shape
    assert d_in == D_IN

    if act_dtype is None:
        act_dtype = _default_act_dtype()
    if tile_b is None:
        tile_b = _pick_tile_b(B)
    else:
        tile_b = int(min(tile_b, B))
        if tile_b < B:
            tile_b = max(16, (tile_b // 16) * 16)
    grid_b = pl.cdiv(B, tile_b)

    def const_spec(shape):
        # Whole-array block, constant block index, single-buffered: DMA'd once,
        # stays resident in VMEM for every batch tile at minimum footprint.
        return pl.BlockSpec(shape, lambda i: (0, 0), pipeline_mode=pl.Buffered(1))

    kernel = functools.partial(discriminator_kernel,
                               compute_dtype=compute_dtype, act_dtype=act_dtype)

    p = prepared
    out_pad = pl.pallas_call(
        kernel,
        out_shape=jax.ShapeDtypeStruct((B, D_OUT_PAD), jnp.bfloat16),
        grid_spec=pltpu.PrefetchScalarGridSpec(
            num_scalar_prefetch=0,
            grid=(grid_b,),
            in_specs=[
                # x tile: (tile_b, 784) f32 — 784 equals the full last dim.
                pl.BlockSpec((tile_b, D_IN), lambda i: (i, 0)),
                const_spec(p["w1"].shape), const_spec(p["b1"].shape),
                const_spec(p["w2"].shape), const_spec(p["b2"].shape),
                const_spec(p["w3"].shape), const_spec(p["b3"].shape),
                const_spec(p["w4"].shape), const_spec(p["b4"].shape),
            ],
            out_specs=pl.BlockSpec((tile_b, D_OUT_PAD), lambda i: (i, 0)),
        ),
        compiler_params=pltpu.CompilerParams(
            dimension_semantics=("parallel",),   # batch tiles shard across cores
            vmem_limit_bytes=32 << 20,           # explicit: v5e default is 16 MiB
        ),
    )(x, p["w1"], p["b1"], p["w2"], p["b2"], p["w3"], p["b3"], p["w4"], p["b4"])

    # Only column 0 of the padded head is real.
    return out_pad[:, :1].astype(jnp.float32)


def init_params(key):
    """nn.Linear-style init (uniform +/- 1/sqrt(fan_in)); weights stored
    transposed as [in_features, out_features]."""
    dims = [(D_IN, D_H1), (D_H1, D_H2), (D_H2, D_H3), (D_H3, 1)]
    params = {}
    keys = jax.random.split(key, 2 * len(dims))
    for idx, (fan_in, fan_out) in enumerate(dims):
        bound = 1.0 / (fan_in ** 0.5)
        params[f"w{idx + 1}"] = jax.random.uniform(
            keys[2 * idx], (fan_in, fan_out),
            minval=-bound, maxval=bound, dtype=jnp.float32)
        params[f"b{idx + 1}"] = jax.random.uniform(
            keys[2 * idx + 1], (1, fan_out),
            minval=-bound, maxval=bound, dtype=jnp.float32)
    return params


def reference_forward(x, params):
    h = x
    for i in range(1, 5):
        h = h @ params[f"w{i}"] + params[f"b{i}"]
        if i < 4:
            h = jnp.where(h > 0, h, 0.2 * h)
    return jax.nn.sigmoid(h)


def _check(x, params, prepared, atol=2.5e-2):
    out = jax.block_until_ready(discriminator_forward(x, prepared))
    ref = reference_forward(x, params)
    assert out.shape == (x.shape[0], 1), out.shape
    err = float(jnp.max(jnp.abs(out - ref)))
    assert err < atol, f"max abs err {err}"
    return err


if __name__ == "__main__":
    key = jax.random.PRNGKey(0)
    k_x, k_p = jax.random.split(key)
    params = init_params(k_p)
    prepared = prepare_params(params)   # one-time prep, outside the forward path

    # Small batch: single-tile (full-dim block) path.
    x_small = jax.random.normal(k_x, (16, D_IN), dtype=jnp.float32)
    _check(x_small, params, prepared)

    # Ragged multi-tile batch: exercises the grid, resident weights across
    # steps, and the masked final tile.
    x_rag = jax.random.normal(k_x, (200, D_IN), dtype=jnp.float32)
    _check(x_rag, params, prepared)

    print("KERNEL_OK")
</pallas_src>

<mosaic_0001>
module attributes {stable_mosaic.version = 11 : i64} {
  func.func @discriminator_kernel(%arg0: i32, %arg1: memref<16x784xf32, #tpu.memory_space<vmem>>, %arg2: memref<784x1024xbf16, #tpu.memory_space<vmem>>, %arg3: memref<1x1024xf32, #tpu.memory_space<vmem>>, %arg4: memref<1024x512xbf16, #tpu.memory_space<vmem>>, %arg5: memref<1x512xf32, #tpu.memory_space<vmem>>, %arg6: memref<512x256xbf16, #tpu.memory_space<vmem>>, %arg7: memref<1x256xf32, #tpu.memory_space<vmem>>, %arg8: memref<256x128xbf16, #tpu.memory_space<vmem>>, %arg9: memref<1x128xf32, #tpu.memory_space<vmem>>, %arg10: memref<16x128xbf16, #tpu.memory_space<vmem>>) attributes {dimension_semantics = [#tpu.dimension_semantics<parallel>], iteration_bounds = array<i64: 1>, scalar_prefetch = 0 : i64, scratch_operands = 0 : i64, tpu.core_type = #tpu.core_type<tc>, window_params = [{transform_indices = @transform_0, window_bounds = array<i64: 16, 784>}, {pipeline_mode = #tpu.pipeline_mode<synchronous>, transform_indices = @transform_1, window_bounds = array<i64: 784, 1024>}, {pipeline_mode = #tpu.pipeline_mode<synchronous>, transform_indices = @transform_2, window_bounds = array<i64: 1, 1024>}, {pipeline_mode = #tpu.pipeline_mode<synchronous>, transform_indices = @transform_3, window_bounds = array<i64: 1024, 512>}, {pipeline_mode = #tpu.pipeline_mode<synchronous>, transform_indices = @transform_4, window_bounds = array<i64: 1, 512>}, {pipeline_mode = #tpu.pipeline_mode<synchronous>, transform_indices = @transform_5, window_bounds = array<i64: 512, 256>}, {pipeline_mode = #tpu.pipeline_mode<synchronous>, transform_indices = @transform_6, window_bounds = array<i64: 1, 256>}, {pipeline_mode = #tpu.pipeline_mode<synchronous>, transform_indices = @transform_7, window_bounds = array<i64: 256, 128>}, {pipeline_mode = #tpu.pipeline_mode<synchronous>, transform_indices = @transform_8, window_bounds = array<i64: 1, 128>}, {transform_indices = @transform_9, window_bounds = array<i64: 16, 128>}]} {
    %c0 = arith.constant 0 : index
    %c0_0 = arith.constant 0 : index
    %0 = vector.load %arg1[%c0, %c0_0] : memref<16x784xf32, #tpu.memory_space<vmem>>, vector<16x784xf32>
    %1 = arith.truncf %0 : vector<16x784xf32> to vector<16x784xbf16>
    %c0_1 = arith.constant 0 : index
    %c0_2 = arith.constant 0 : index
    %2 = vector.load %arg2[%c0_1, %c0_2] : memref<784x1024xbf16, #tpu.memory_space<vmem>>, vector<784x1024xbf16>
    %cst = arith.constant dense<0.000000e+00> : vector<16x1024xf32>
    %3 = tpu.matmul %1, %2, %cst {dimension_numbers = #tpu.dot_dimension_numbers<[1], [0], [0], [1], [0, 0, 1, 1], [], []>} : vector<16x784xbf16>, vector<784x1024xbf16>, vector<16x1024xf32> -> vector<16x1024xf32>
    %4 = arith.truncf %3 : vector<16x1024xf32> to vector<16x1024xbf16>
    %c0_3 = arith.constant 0 : index
    %c0_4 = arith.constant 0 : index
    %5 = vector.load %arg3[%c0_3, %c0_4] : memref<1x1024xf32, #tpu.memory_space<vmem>>, vector<1x1024xf32>
    %6 = arith.truncf %5 : vector<1x1024xf32> to vector<1x1024xbf16>
    %7 = vector.broadcast %6 : vector<1x1024xbf16> to vector<16x1024xbf16>
    %8 = arith.addf %4, %7 : vector<16x1024xbf16>
    %cst_5 = arith.constant 0.000000e+00 : bf16
    %9 = vector.broadcast %cst_5 : bf16 to vector<16x1024xbf16>
    %10 = arith.cmpf ogt, %8, %9 : vector<16x1024xbf16>
    %cst_6 = arith.constant 2.001950e-01 : bf16
    %11 = vector.broadcast %cst_6 : bf16 to vector<16x1024xbf16>
    %12 = arith.mulf %11, %8 : vector<16x1024xbf16>
    %13 = arith.select %10, %8, %12 : vector<16x1024xi1>, vector<16x1024xbf16>
    %c0_7 = arith.constant 0 : index
    %c0_8 = arith.constant 0 : index
    %14 = vector.load %arg4[%c0_7, %c0_8] : memref<1024x512xbf16, #tpu.memory_space<vmem>>, vector<1024x512xbf16>
    %cst_9 = arith.constant dense<0.000000e+00> : vector<16x512xf32>
    %15 = tpu.matmul %13, %14, %cst_9 {dimension_numbers = #tpu.dot_dimension_numbers<[1], [0], [0], [1], [0, 0, 1, 1], [], []>} : vector<16x1024xbf16>, vector<1024x512xbf16>, vector<16x512xf32> -> vector<16x512xf32>
    %16 = arith.truncf %15 : vector<16x512xf32> to vector<16x512xbf16>
    %c0_10 = arith.constant 0 : index
    %c0_11 = arith.constant 0 : index
    %17 = vector.load %arg5[%c0_10, %c0_11] : memref<1x512xf32, #tpu.memory_space<vmem>>, vector<1x512xf32>
    %18 = arith.truncf %17 : vector<1x512xf32> to vector<1x512xbf16>
    %19 = vector.broadcast %18 : vector<1x512xbf16> to vector<16x512xbf16>
    %20 = arith.addf %16, %19 : vector<16x512xbf16>
    %cst_12 = arith.constant 0.000000e+00 : bf16
    %21 = vector.broadcast %cst_12 : bf16 to vector<16x512xbf16>
    %22 = arith.cmpf ogt, %20, %21 : vector<16x512xbf16>
    %cst_13 = arith.constant 2.001950e-01 : bf16
    %23 = vector.broadcast %cst_13 : bf16 to vector<16x512xbf16>
    %24 = arith.mulf %23, %20 : vector<16x512xbf16>
    %25 = arith.select %22, %20, %24 : vector<16x512xi1>, vector<16x512xbf16>
    %c0_14 = arith.constant 0 : index
    %c0_15 = arith.constant 0 : index
    %26 = vector.load %arg6[%c0_14, %c0_15] : memref<512x256xbf16, #tpu.memory_space<vmem>>, vector<512x256xbf16>
    %cst_16 = arith.constant dense<0.000000e+00> : vector<16x256xf32>
    %27 = tpu.matmul %25, %26, %cst_16 {dimension_numbers = #tpu.dot_dimension_numbers<[1], [0], [0], [1], [0, 0, 1, 1], [], []>} : vector<16x512xbf16>, vector<512x256xbf16>, vector<16x256xf32> -> vector<16x256xf32>
    %28 = arith.truncf %27 : vector<16x256xf32> to vector<16x256xbf16>
    %c0_17 = arith.constant 0 : index
    %c0_18 = arith.constant 0 : index
    %29 = vector.load %arg7[%c0_17, %c0_18] : memref<1x256xf32, #tpu.memory_space<vmem>>, vector<1x256xf32>
    %30 = arith.truncf %29 : vector<1x256xf32> to vector<1x256xbf16>
    %31 = vector.broadcast %30 : vector<1x256xbf16> to vector<16x256xbf16>
    %32 = arith.addf %28, %31 : vector<16x256xbf16>
    %cst_19 = arith.constant 0.000000e+00 : bf16
    %33 = vector.broadcast %cst_19 : bf16 to vector<16x256xbf16>
    %34 = arith.cmpf ogt, %32, %33 : vector<16x256xbf16>
    %cst_20 = arith.constant 2.001950e-01 : bf16
    %35 = vector.broadcast %cst_20 : bf16 to vector<16x256xbf16>
    %36 = arith.mulf %35, %32 : vector<16x256xbf16>
    %37 = arith.select %34, %32, %36 : vector<16x256xi1>, vector<16x256xbf16>
    %c0_21 = arith.constant 0 : index
    %c0_22 = arith.constant 0 : index
    %38 = vector.load %arg8[%c0_21, %c0_22] : memref<256x128xbf16, #tpu.memory_space<vmem>>, vector<256x128xbf16>
    %cst_23 = arith.constant dense<0.000000e+00> : vector<16x128xf32>
    %39 = tpu.matmul %37, %38, %cst_23 {dimension_numbers = #tpu.dot_dimension_numbers<[1], [0], [0], [1], [0, 0, 1, 1], [], []>} : vector<16x256xbf16>, vector<256x128xbf16>, vector<16x128xf32> -> vector<16x128xf32>
    %c0_24 = arith.constant 0 : index
    %c0_25 = arith.constant 0 : index
    %40 = vector.load %arg9[%c0_24, %c0_25] : memref<1x128xf32, #tpu.memory_space<vmem>>, vector<1x128xf32>
    %41 = vector.broadcast %40 : vector<1x128xf32> to vector<16x128xf32>
    %42 = arith.addf %39, %41 : vector<16x128xf32>
    %cst_26 = arith.constant 0.000000e+00 : f32
    %43 = vector.broadcast %cst_26 : f32 to vector<16x128xf32>
    %44 = arith.subf %43, %42 : vector<16x128xf32>
    %45 = math.exp %44 : vector<16x128xf32>
    %cst_27 = arith.constant 1.000000e+00 : f32
    %46 = vector.broadcast %cst_27 : f32 to vector<16x128xf32>
    %47 = arith.addf %46, %45 : vector<16x128xf32>
    %48 = tpu.reciprocal %47 {approx = true} : vector<16x128xf32> -> vector<16x128xf32>
    %49 = arith.truncf %48 : vector<16x128xf32> to vector<16x128xbf16>
    %c0_28 = arith.constant 0 : index
    %c0_29 = arith.constant 0 : index
    %50 = vector.load %arg10[%c0_28, %c0_29] : memref<16x128xbf16, #tpu.memory_space<vmem>>, vector<16x128xbf16>
    tpu.vector_store %arg10[%c0_28, %c0_29], %49 {strides = array<i32>} : memref<16x128xbf16, #tpu.memory_space<vmem>>, vector<16x128xbf16>,
    return
  }
  func.func @transform_0(%arg0: i32) -> (i32, i32) {
    %c0_i32 = arith.constant 0 : i32
    %c0_i32_0 = arith.constant 0 : i32
    return %arg0, %c0_i32 : i32, i32
  }
  func.func @transform_1(%arg0: i32) -> (i32, i32) {
    %c0_i32 = arith.constant 0 : i32
    %c0_i32_0 = arith.constant 0 : i32
    %c0_i32_1 = arith.constant 0 : i32
    return %c0_i32, %c0_i32_0 : i32, i32
  }
  func.func @transform_2(%arg0: i32) -> (i32, i32) {
    %c0_i32 = arith.constant 0 : i32
    %c0_i32_0 = arith.constant 0 : i32
    %c0_i32_1 = arith.constant 0 : i32
    return %c0_i32, %c0_i32_0 : i32, i32
  }
  func.func @transform_3(%arg0: i32) -> (i32, i32) {
    %c0_i32 = arith.constant 0 : i32
    %c0_i32_0 = arith.constant 0 : i32
    %c0_i32_1 = arith.constant 0 : i32
    return %c0_i32, %c0_i32_0 : i32, i32
  }
  func.func @transform_4(%arg0: i32) -> (i32, i32) {
    %c0_i32 = arith.constant 0 : i32
    %c0_i32_0 = arith.constant 0 : i32
    %c0_i32_1 = arith.constant 0 : i32
    return %c0_i32, %c0_i32_0 : i32, i32
  }
  func.func @transform_5(%arg0: i32) -> (i32, i32) {
    %c0_i32 = arith.constant 0 : i32
    %c0_i32_0 = arith.constant 0 : i32
    %c0_i32_1 = arith.constant 0 : i32
    return %c0_i32, %c0_i32_0 : i32, i32
  }
  func.func @transform_6(%arg0: i32) -> (i32, i32) {
    %c0_i32 = arith.constant 0 : i32
    %c0_i32_0 = arith.constant 0 : i32
    %c0_i32_1 = arith.constant 0 : i32
    return %c0_i32, %c0_i32_0 : i32, i32
  }
  func.func @transform_7(%arg0: i32) -> (i32, i32) {
    %c0_i32 = arith.constant 0 : i32
    %c0_i32_0 = arith.constant 0 : i32
    %c0_i32_1 = arith.constant 0 : i32
    return %c0_i32, %c0_i32_0 : i32, i32
  }
  func.func @transform_8(%arg0: i32) -> (i32, i32) {
    %c0_i32 = arith.constant 0 : i32
    %c0_i32_0 = arith.constant 0 : i32
    %c0_i32_1 = arith.constant 0 : i32
    return %c0_i32, %c0_i32_0 : i32, i32
  }
  func.func @transform_9(%arg0: i32) -> (i32, i32) {
    %c0_i32 = arith.constant 0 : i32
    %c0_i32_0 = arith.constant 0 : i32
    return %arg0, %c0_i32 : i32, i32
  }
}

</mosaic_0001>

<bundles_post_ra>
// kernel: tpu_custom_call.1
= control target key start
LH: loop header
LB: loop body
LE: loop exit
PB: predicated region body
PF: predicated region fallthrough
CT: control target
= control target key end

     0   :  { %14 = vsyncpa [#allocation3], 0  ;;  %s11109_s0 = inlined_call_operand.hbm [shape: f32[16,784], index: 0, kind: input, shape index: {}]   ;;  %s11110_s1 = inlined_call_operand.hbm [shape: bf16[784,1024], index: 1, kind: input, shape index: {}]   ;;  %s11111_s2 = inlined_call_operand.hbm [shape: f32[1,1024], index: 2, kind: input, shape index: {}]   ;;  %s11112_s3 = inlined_call_operand.hbm [shape: bf16[1024,512], index: 3, kind: input, shape index: {}]   ;;  %s11113_s4 = inlined_call_operand.hbm [shape: f32[1,512], index: 4, kind: input, shape index: {}]   ;;  %s11114_s5 = inlined_call_operand.hbm [shape: bf16[512,256], index: 5, kind: input, shape index: {}]   ;;  %s11115_s6 = inlined_call_operand.hbm [shape: f32[1,256], index: 6, kind: input, shape index: {}]   ;;  %s11116_s7 = inlined_call_operand.hbm [shape: bf16[256,128], index: 7, kind: input, shape index: {}]   ;;  %s11117_s8 = inlined_call_operand.hbm [shape: f32[1,128], index: 8, kind: input, shape index: {}]   ;;  %s11118_s9 = inlined_call_operand.hbm [shape: bf16[16,128], index: 9, kind: output, shape index: {}]  }
   0x1   :  { %15 = vsyncpa [#allocation6], 0 }
   0x2   :  { %16 = vsyncpa [#allocation9], 0 }
   0x3   :  { %17 = vsyncpa [#allocation12], 0 }
   0x4   :  { %18 = vsyncpa [#allocation15], 0  ;;  %s37_s11 = sshll.u32 %s11110_s1, 4  ;;  %s38_s11 = int_to_ptr.hbm [resolvable:$true] %s37_s11 }
   0x5   :  { %19 = vsyncpa [#allocation4], 0  ;;  %s10365_s12 = smov [#allocation5]   ;;  %s61_s16 = sshll.u32 %s11112_s3, 4  ;;  %s62_s16 = int_to_ptr.hbm [resolvable:$true] %s61_s16 }
   0x6   :  { %s39_s13 = sshll.u32 %s10365_s12, 4  ;;  %s10366_s17 = smov 512   ;;  %s40_s13 = int_to_ptr.vmem [resolvable:$true] %s39_s13 }
   0x7   :  { %s10367_s18 = smov 32   ;;  %s10368_s19 = smov [#allocation8]  }
   0x8   :  { %45 = dma.hbm_to_vmem [thread:$0]  %s38_s11, 50176, %s40_s13, [#allocation6], %s10366_s17, %s10366_s17, %s10367_s18  }
   0x9   :  { %s63_s20 = sshll.u32 %s10368_s19, 4  ;;  %s10369_s21 = smov 256   ;;  %s64_s20 = int_to_ptr.vmem [resolvable:$true] %s63_s20 }
   0xa   :  { %s10370_s22 = smov 16   ;;  %s85_s24 = sshll.u32 %s11114_s5, 4  ;;  %s86_s24 = int_to_ptr.hbm [resolvable:$true] %s85_s24 }
   0xb   :  { %69 = dma.hbm_to_vmem [thread:$0]  %s62_s16, 32768, %s64_s20, [#allocation9], %s10369_s21, %s10369_s21, %s10370_s22  }
   0xc   :  { %s10371_s25 = smov [#allocation11]   ;;  %s109_s28 = sshll.u32 %s11116_s7, 4  ;;  %s110_s28 = int_to_ptr.hbm [resolvable:$true] %s109_s28 }
   0xd   :  { %s87_s26 = sshll.u32 %s10371_s25, 4  ;;  %s10372_s29 = smov 128   ;;  %s88_s26 = int_to_ptr.vmem [resolvable:$true] %s87_s26 }
   0xe   :  { %s10373_s30 = smov 8   ;;  %s10374_s10 = smov [#allocation14]  }
   0xf   :  { %93 = dma.hbm_to_vmem [thread:$0]  %s86_s24, 8192, %s88_s26, [#allocation12], %s10372_s29, %s10372_s29, %s10373_s30  }
  0x10   :  { %s111_s11 = sshll.u32 %s10374_s10, 4  ;;  %s10375_s12 = smov 64   ;;  %s112_s11 = int_to_ptr.vmem [resolvable:$true] %s111_s11 }
  0x11   :  { %s10376_s13 = smov 4   ;;  %s24_s15 = sshll.u32 %s11109_s0, 4  ;;  %s25_s15 = int_to_ptr.hbm [resolvable:$true] %s24_s15 }
  0x12   :  { %117 = dma.hbm_to_vmem [thread:$0]  %s110_s28, 2048, %s112_s11, [#allocation15], %s10375_s12, %s10375_s12, %s10376_s13  }
  0x13   :  { %s10377_s16 = smov [#allocation2]   ;;  %s51_s19 = sshll.u32 %s11111_s2, 4  ;;  %s52_s19 = int_to_ptr.hbm [resolvable:$true] %s51_s19 }
  0x14   :  { %s26_s7 = sshll.u32 %s10377_s16, 4  ;;  %s10378_s20 = smov 896   ;;  %s27_s7 = int_to_ptr.vmem [resolvable:$true] %s26_s7 }
  0x15   :  { %s10379_s21 = smov 56   ;;  %s10380_s22 = smov [#allocation7]  }
  0x16   :  { %32 = dma.hbm_to_vmem [thread:$0]  %s25_s15, 1792, %s27_s7, [#allocation3], %s10378_s20, %s10378_s20, %s10379_s21  }
  0x17   :  { %s53_s1 = sshll.u32 %s10380_s22, 4  ;;  %s75_s25 = sshll.u32 %s11113_s4, 4  ;;  %s54_s1 = int_to_ptr.vmem [resolvable:$true] %s53_s1  ;;  %s76_s25 = int_to_ptr.hbm [resolvable:$true] %s75_s25 }
  0x18   :  { %56 = dma.hbm_to_vmem [thread:$0]  %s52_s19, 128, %s54_s1, [#allocation6]  }
  0x19   :  { %s99_s27 = sshll.u32 %s11115_s6, 4  ;;  %s10381_s3 = smov [#allocation10]   ;;  %s100_s27 = int_to_ptr.hbm [resolvable:$true] %s99_s27 }
  0x1a   :  { %s77_s28 = sshll.u32 %s10381_s3, 4  ;;  %s10382_s2 = smov [#allocation13]   ;;  %s78_s28 = int_to_ptr.vmem [resolvable:$true] %s77_s28 }
  0x1b   :  { %80 = dma.hbm_to_vmem [thread:$0]  %s76_s25, 64, %s78_s28, [#allocation9]  }
  0x1c   :  { %s101_s29 = sshll.u32 %s10382_s2, 4  ;;  %s123_s11 = sshll.u32 %s11117_s8, 4  ;;  %s102_s29 = int_to_ptr.vmem [resolvable:$true] %s101_s29  ;;  %s124_s11 = int_to_ptr.hbm [resolvable:$true] %s123_s11 }
  0x1d   :  { %104 = dma.hbm_to_vmem [thread:$0]  %s100_s27, 32, %s102_s29, [#allocation12]  }
  0x1e   :  { %s10383_s4 = smov [#allocation16]  }
  0x1f   :  { %s125_s5 = sshll.u32 %s10383_s4, 4  ;;  %s126_s5 = int_to_ptr.vmem [resolvable:$true] %s125_s5 }
  0x20   :  { %128 = dma.hbm_to_vmem [thread:$0]  %s124_s11, 16, %s126_s5, [#allocation15]  }
  0x21   :  { %10353 = dma.done.wait [#allocation3], 1792  }
  0x22   :  { %10354 = vsyncadd [#allocation3], 4294965504 }
  0x23   :  { %10355 = dma.done.wait [#allocation6], 50304  }
  0x24   :  { %10356 = vsyncadd [#allocation6], 4294916992 }
  0x25   :  { %10357 = dma.done.wait [#allocation9], 32832  }
  0x26   :  { %10358 = vsyncadd [#allocation9], 4294934464 }
  0x27   :  { %10359 = dma.done.wait [#allocation12], 8224  }
  0x28   :  { %10360 = vsyncadd [#allocation12], 4294959072 }
  0x29   :  { %10361 = dma.done.wait [#allocation15], 2064  }
  0x2a   :  { %10362 = vsyncadd [#allocation15], 4294965232  ;;  %v6656_v0 = vld [vmem:[#allocation5 + $0x1c0] sm:$0xf]  ;;  %vm2539_vm0 = vcmask 130048   ;;  %s10384_s6 = smov [#allocation17]  }
  0x2b   :  { %v9410_v1 = vld [vmem:[#allocation5 + $0x1dc] sm:$0xf0]  ;;  %s6411_s8 = sshll.u32 %s10384_s6, 4  ;;  %s6413_s16 = sshll.u32 %s11118_s9, 4  ;;  %s6412_s8 = int_to_ptr.vmem [resolvable:$true] %s6411_s8  ;;  %s6414_s16 = int_to_ptr.hbm [resolvable:$true] %s6413_s16 }
  0x2c   :  { %v6912_v2 = vld [vmem:[#allocation5 + $0x3c0] sm:$0xf]  ;;  %v6657_v3 = vor.u32 %v9410_v1, %v6656_v0 }
  0x2d   :  { %v9474_v4 = vld [vmem:[#allocation5 + $0x3dc] sm:$0xf0] }
  0x2e   :  { %v7168_v5 = vld [vmem:[#allocation5 + $0x5c0] sm:$0xf]  ;;  %v6913_v7 = vor.u32 %v9474_v4, %v6912_v2  ;;  %2543 = vmatpush.bf16.msra.mxu0 %v6657_v3 }
  0x2f   :  { %v9538_v6 = vld [vmem:[#allocation5 + $0x5dc] sm:$0xf0] }
  0x30   :  { %v7169_v8 = vor.u32 %v9538_v6, %v7168_v5  ;;  %v7424_v9 = vld [vmem:[#allocation5 + $0x7c0] sm:$0xf]  ;;  %2557 = vmatpush.bf16.msra.mxu1 %v6913_v7 }
  0x31   :  { %v9602_v10 = vld [vmem:[#allocation5 + $0x7dc] sm:$0xf0] }
  0x32   :  { %v6624_v11 = vld [vmem:[#allocation5 + $0x180] sm:$0xf]  ;;  %v7425_v12 = vor.u32 %v9602_v10, %v7424_v9  ;;  %2571 = vmatpush.bf16.msra.mxu2 %v7169_v8 }
  0x33   :  { %v9402_v13 = vld [vmem:[#allocation5 + $0x19c] sm:$0xf0] }
  0x34   :  { %v6880_v14 = vld [vmem:[#allocation5 + $0x380] sm:$0xf]  ;;  %v6625_v16 = vor.u32 %v9402_v13, %v6624_v11  ;;  %2585 = vmatpush.bf16.msra.mxu3 %v7425_v12 }
  0x35   :  { %v9466_v15 = vld [vmem:[#allocation5 + $0x39c] sm:$0xf0] }
  0x36   :  { %v6881_v17 = vor.u32 %v9466_v15, %v6880_v14  ;;  %v7136_v18 = vld [vmem:[#allocation5 + $0x580] sm:$0xf]  ;;  %2544 = vmatpush.bf16.msra.mxu0 %v6625_v16 }
  0x37   :  { %v9530_v19 = vld [vmem:[#allocation5 + $0x59c] sm:$0xf0] }
  0x38   :  { %v7392_v20 = vld [vmem:[#allocation5 + $0x780] sm:$0xf]  ;;  %v7137_v21 = vor.u32 %v9530_v19, %v7136_v18  ;;  %2558 = vmatpush.bf16.msra.mxu1 %v6881_v17 }
  0x39   :  { %v9594_v22 = vld [vmem:[#allocation5 + $0x79c] sm:$0xf0] }
  0x3a   :  { %v6592_v23 = vld [vmem:[#allocation5 + $0x140] sm:$0xf]  ;;  %v7393_v25 = vor.u32 %v9594_v22, %v7392_v20  ;;  %2572 = vmatpush.bf16.msra.mxu2 %v7137_v21 }
  0x3b   :  { %v9394_v24 = vld [vmem:[#allocation5 + $0x15c] sm:$0xf0] }
  0x3c   :  { %v6848_v26 = vld [vmem:[#allocation5 + $0x340] sm:$0xf]  ;;  %v6593_v29 = vor.u32 %v9394_v24, %v6592_v23  ;;  %2586 = vmatpush.bf16.msra.mxu3 %v7393_v25 }
  0x3d   :  { %v9458_v27 = vld [vmem:[#allocation5 + $0x35c] sm:$0xf0] }
  0x3e   :  { %v7104_v28 = vld [vmem:[#allocation5 + $0x540] sm:$0xf]  ;;  %v6849_v33 = vor.u32 %v9458_v27, %v6848_v26  ;;  %2545 = vmatpush.bf16.msra.mxu0 %v6593_v29 }
  0x3f   :  { %v9522_v30 = vld [vmem:[#allocation5 + $0x55c] sm:$0xf0] }
  0x40   :  { %v7360_v31 = vld [vmem:[#allocation5 + $0x740] sm:$0xf]  ;;  %v7105_v34 = vor.u32 %v9522_v30, %v7104_v28  ;;  %2559 = vmatpush.bf16.msra.mxu1 %v6849_v33  ;;  %v6658_v33 = vld [vmem:[#allocation5 + $0x1e0] sm:$0xf0] }
  0x41   :  { %v9586_v32 = vld [vmem:[#allocation5 + $0x75c] sm:$0xf0] }
  0x42   :  { %v6560_v35 = vld [vmem:[#allocation5 + $0x100] sm:$0xf]  ;;  %v7361_v38 = vor.u32 %v9586_v32, %v7360_v31  ;;  %2573 = vmatpush.bf16.msra.mxu2 %v7105_v34  ;;  %v9406_v32 = vld [vmem:[#allocation5 + $0x1c4] sm:$0xf] }
  0x43   :  { %v9386_v36 = vld [vmem:[#allocation5 + $0x11c] sm:$0xf0] }
  0x44   :  { %v6816_v37 = vld [vmem:[#allocation5 + $0x300] sm:$0xf]  ;;  %v6561_v44 = vor.u32 %v9386_v36, %v6560_v35  ;;  %2587 = vmatpush.bf16.msra.mxu3 %v7361_v38  ;;  %v175_v36 = vld [vmem:[#allocation2 + $0x48] sm:$0xff] }
  0x45   :  { %v9450_v39 = vld [vmem:[#allocation5 + $0x31c] sm:$0xf0] }
  0x46   :  { %v7072_v40 = vld [vmem:[#allocation5 + $0x500] sm:$0xf]  ;;  %v6817_v45 = vor.u32 %v9450_v39, %v6816_v37  ;;  %2546 = vmatpush.bf16.msra.mxu0 %v6561_v44 }
  0x47   :  { %v9514_v41 = vld [vmem:[#allocation5 + $0x51c] sm:$0xf0] }
  0x48   :  { %v7328_v42 = vld [vmem:[#allocation5 + $0x700] sm:$0xf]  ;;  %v7073_v46 = vor.u32 %v9514_v41, %v7072_v40  ;;  %2560 = vmatpush.bf16.msra.mxu1 %v6817_v45  ;;  %v9470_v41 = vld [vmem:[#allocation5 + $0x3c4] sm:$0xf] }
  0x49   :  { %v9578_v43 = vld [vmem:[#allocation5 + $0x71c] sm:$0xf0] }
  0x4a   :  { %v6528_v47 = vld [vmem:[#allocation5 + $0xc0] sm:$0xf]  ;;  %v7329_v50 = vor.u32 %v9578_v43, %v7328_v42  ;;  %2574 = vmatpush.bf16.msra.mxu2 %v7073_v46  ;;  %v166_v42 = vld [vmem:[#allocation2] sm:$0xff]  ;;  %v173_v43 = vld [vmem:[#allocation2 + $0x38] sm:$0xff] }
  0x4b   :  { %v9378_v48 = vld [vmem:[#allocation5 + $0xdc] sm:$0xf0]  ;;  %v6914_v46 = vld [vmem:[#allocation5 + $0x3e0] sm:$0xf0] }
  0x4c   :  { %v6784_v49 = vld [vmem:[#allocation5 + $0x2c0] sm:$0xf]  ;;  %v6529_v56 = vor.u32 %v9378_v48, %v6528_v47  ;;  %2588 = vmatpush.bf16.msra.mxu3 %v7329_v50  ;;  %v169_v47 = vld [vmem:[#allocation2 + $0x18] sm:$0xff]  ;;  %v6661_v50 = vor.u32 %v9406_v32, %v6658_v33 }
  0x4d   :  { %v9442_v51 = vld [vmem:[#allocation5 + $0x2dc] sm:$0xf0] }
  0x4e   :  { %v7040_v52 = vld [vmem:[#allocation5 + $0x4c0] sm:$0xf]  ;;  %v6785_v57 = vor.u32 %v9442_v51, %v6784_v49  ;;  %2547 = vmatpush.bf16.msra.mxu0 %v6529_v56  ;;  %v9398_v56 = vld [vmem:[#allocation5 + $0x184] sm:$0xf] }
  0x4f   :  { %v9506_v53 = vld [vmem:[#allocation5 + $0x4dc] sm:$0xf0] }
  0x50   :  { %v7296_v54 = vld [vmem:[#allocation5 + $0x6c0] sm:$0xf]  ;;  %v7041_v58 = vor.u32 %v9506_v53, %v7040_v52  ;;  %2561 = vmatpush.bf16.msra.mxu1 %v6785_v57  ;;  %v6626_v57 = vld [vmem:[#allocation5 + $0x1a0] sm:$0xf0] }
  0x51   :  { %v9570_v55 = vld [vmem:[#allocation5 + $0x6dc] sm:$0xf0] }
  0x52   :  { %v6496_v59 = vld [vmem:[#allocation5 + $0x80] sm:$0xf]  ;;  %v7297_v62 = vor.u32 %v9570_v55, %v7296_v54  ;;  %2575 = vmatpush.bf16.msra.mxu2 %v7041_v58  ;;  %v10467_v58 = vpack.c.bf16 %v173_v43, %v166_v42 }
  0x53   :  { %v9370_v60 = vld [vmem:[#allocation5 + $0x9c] sm:$0xf0] }
  0x54   :  { %v6752_v61 = vld [vmem:[#allocation5 + $0x280] sm:$0xf]  ;;  %v6497_v4 = vor.u32 %v9370_v60, %v6496_v59  ;;  %2589 = vmatpush.bf16.msra.mxu3 %v7297_v62  ;;  %v174_v62 = vld [vmem:[#allocation2 + $0x40] sm:$0xff] }
  0x55   :  { %v9434_v63 = vld [vmem:[#allocation5 + $0x29c] sm:$0xf0] }
  0x56   :  { %v7008_v0 = vld [vmem:[#allocation5 + $0x480] sm:$0xf]  ;;  %v6753_v6 = vor.u32 %v9434_v63, %v6752_v61  ;;  %2548 = vmatpush.bf16.msra.mxu0 %v6497_v4  ;;  %v167_v61 = vld [vmem:[#allocation2 + $0x8] sm:$0xff]  ;;  %v6917_v63 = vor.u32 %v9470_v41, %v6914_v46  ;;  %v6629_v4 = vor.u32 %v9398_v56, %v6626_v57  ;;  %v6786_v41 = vld [vmem:[#allocation5 + $0x2e0] sm:$0xf0] }
  0x57   :  { %v9498_v1 = vld [vmem:[#allocation5 + $0x49c] sm:$0xf0] }
  0x58   :  { %v7264_v2 = vld [vmem:[#allocation5 + $0x680] sm:$0xf]  ;;  %v7009_v7 = vor.u32 %v9498_v1, %v7008_v0  ;;  %2562 = vmatpush.bf16.msra.mxu1 %v6753_v6  ;;  %v9462_v1 = vld [vmem:[#allocation5 + $0x384] sm:$0xf] }
  0x59   :  { %v9562_v3 = vld [vmem:[#allocation5 + $0x69c] sm:$0xf0] }
  0x5a   :  { %v6464_v5 = vld [vmem:[#allocation5 + $0x40] sm:$0xf]  ;;  %v7265_v11 = vor.u32 %v9562_v3, %v7264_v2  ;;  %2576 = vmatpush.bf16.msra.mxu2 %v7009_v7  ;;  %v6882_v2 = vld [vmem:[#allocation5 + $0x3a0] sm:$0xf0] }
  0x5b   :  { %v9362_v8 = vld [vmem:[#allocation5 + $0x5c] sm:$0xf0] }
  0x5c   :  { %v6720_v9 = vld [vmem:[#allocation5 + $0x240] sm:$0xf]  ;;  %v6465_v18 = vor.u32 %v9362_v8, %v6464_v5  ;;  %2590 = vmatpush.bf16.msra.mxu3 %v7265_v11  ;;  %v10473_v8 = vpack.c.bf16 %v174_v62, %v167_v61  ;;  %v6594_v11 = vld [vmem:[#allocation5 + $0x160] sm:$0xf0] }
  0x5d   :  { %v9426_v10 = vld [vmem:[#allocation5 + $0x25c] sm:$0xf0] }
  0x5e   :  { %v6976_v12 = vld [vmem:[#allocation5 + $0x440] sm:$0xf]  ;;  %v6721_v23 = vor.u32 %v9426_v10, %v6720_v9  ;;  %2549 = vmatpush.bf16.msra.mxu0 %v6465_v18  ;;  %v9390_v10 = vld [vmem:[#allocation5 + $0x144] sm:$0xf] }
  0x5f   :  { %v9490_v13 = vld [vmem:[#allocation5 + $0x45c] sm:$0xf0] }
  0x60   :  { %v7232_v14 = vld [vmem:[#allocation5 + $0x640] sm:$0xf]  ;;  %v6977_v24 = vor.u32 %v9490_v13, %v6976_v12  ;;  %2563 = vmatpush.bf16.msra.mxu1 %v6721_v23  ;;  %v6885_v12 = vor.u32 %v9462_v1, %v6882_v2  ;;  %v6562_v23 = vld [vmem:[#allocation5 + $0x120] sm:$0xf0] }
  0x61   :  { %v9554_v15 = vld [vmem:[#allocation5 + $0x65c] sm:$0xf0]  ;;  %v6466_v1 = vld [vmem:[#allocation5 + $0x60] sm:$0xf0] }
  0x62   :  { %v6432_v16 = vld [vmem:[#allocation5] sm:$0xf]  ;;  %v7233_v28 = vor.u32 %v9554_v15, %v7232_v14  ;;  %2577 = vmatpush.bf16.msra.mxu2 %v6977_v24  ;;  %v9454_v14 = vld [vmem:[#allocation5 + $0x344] sm:$0xf] }
  0x63   :  { %v9354_v17 = vld [vmem:[#allocation5 + $0x1c] sm:$0xf0]  ;;  %v6850_v15 = vld [vmem:[#allocation5 + $0x360] sm:$0xf0] }
  0x64   :  { %v6688_v19 = vld [vmem:[#allocation5 + $0x200] sm:$0xf]  ;;  %v6433_v35 = vor.u32 %v9354_v17, %v6432_v16  ;;  %2591 = vmatpush.bf16.msra.mxu3 %v7233_v28  ;;  %v6597_v17 = vor.u32 %v9390_v10, %v6594_v11  ;;  %v6853_v24 = vor.u32 %v9454_v14, %v6850_v15  ;;  %v9422_v2 = vld [vmem:[#allocation5 + $0x244] sm:$0xf] }
  0x65   :  { %v9418_v20 = vld [vmem:[#allocation5 + $0x21c] sm:$0xf0]  ;;  %v6434_v14 = vld [vmem:[#allocation5 + $0x20] sm:$0xf0] }
  0x66   :  { %v6944_v21 = vld [vmem:[#allocation5 + $0x400] sm:$0xf]  ;;  %v6689_v39 = vor.u32 %v9418_v20, %v6688_v19  ;;  %2550 = vmatpush.bf16.msra.mxu0 %v6433_v35  ;;  %v6530_v35 = vld [vmem:[#allocation5 + $0xe0] sm:$0xf0] }
  0x67   :  { %v9482_v22 = vld [vmem:[#allocation5 + $0x41c] sm:$0xf0]  ;;  %v9534_v15 = vld [vmem:[#allocation5 + $0x5c4] sm:$0xf] }
  0x68   :  { %v7200_v25 = vld [vmem:[#allocation5 + $0x600] sm:$0xf]  ;;  %v6945_v40 = vor.u32 %v9482_v22, %v6944_v21  ;;  %2564 = vmatpush.bf16.msra.mxu1 %v6689_v39  ;;  %v9382_v22 = vld [vmem:[#allocation5 + $0x104] sm:$0xf] }
  0x69   :  { %v9546_v26 = vld [vmem:[#allocation5 + $0x61c] sm:$0xf0]  ;;  %2551 = vmatmul.bf16.vlgmr.msra.gmra.mxu0 %v10467_v58 }
  0x6a   :  { %v7680_v27 = vld [vmem:[#allocation5 + $0x9c0] sm:$0xf]  ;;  %v7201_v44 = vor.u32 %v9546_v26, %v7200_v25  ;;  %2578 = vmatpush.bf16.msra.mxu2 %v6945_v40  ;;  %v9446_v26 = vld [vmem:[#allocation5 + $0x304] sm:$0xf] }
  0x6b   :  { %v9666_v29 = vld [vmem:[#allocation5 + $0x9dc] sm:$0xf0]  ;;  %2565 = vmatmul.bf16.vlgmr.msra.gmra.mxu1 %v10473_v8  ;;  %v9438_v40 = vld [vmem:[#allocation5 + $0x2c4] sm:$0xf] }
  0x6c   :  { %v7936_v30 = vld [vmem:[#allocation5 + $0xbc0] sm:$0xf]  ;;  %v7681_v45 = vor.u32 %v9666_v29, %v7680_v27  ;;  %2592 = vmatpush.bf16.msra.mxu3 %v7201_v44  ;;  %v6818_v27 = vld [vmem:[#allocation5 + $0x320] sm:$0xf0]  ;;  %v6565_v29 = vor.u32 %v9382_v22, %v6562_v23  ;;  %v170_v23 = vld [vmem:[#allocation2 + $0x20] sm:$0xff] }
  0x6d   :  { %v9730_v31 = vld [vmem:[#allocation5 + $0xbdc] sm:$0xf0] }
  0x6e   :  { %v168_v34 = vld [vmem:[#allocation2 + $0x10] sm:$0xff]  ;;  %v7937_v49 = vor.u32 %v9730_v31, %v7936_v30  ;;  %2599 = vmatpush.bf16.msrb.mxu0 %v7681_v45 }
  0x6f   :  { %v7968_v37 = vld [vmem:[#allocation5 + $0xc00] sm:$0xf]  ;;  %v10465_v54 = vpack.c.bf16 %v175_v36, %v168_v34  ;;  %v9374_v34 = vld [vmem:[#allocation5 + $0xc4] sm:$0xf] }
  0x70   :  { %v9738_v38 = vld [vmem:[#allocation5 + $0xc1c] sm:$0xf0]  ;;  %2613 = vmatpush.bf16.msrb.mxu1 %v7937_v49  ;;  %2641 = vmatpush.bf16.msrb.mxu3 %v6661_v50  ;;  %v6533_v43 = vor.u32 %v9374_v34, %v6530_v35  ;;  %v6498_v49 = vld [vmem:[#allocation5 + $0xa0] sm:$0xf0] }
  0x71   :  { %v176_v48 = vld [vmem:[#allocation2 + $0x50] sm:$0xff]  ;;  %11122 = vst [vmem:[#allocation24_spill] sm:$0xff] %v10465_v54  ;;  %v7969_v59 = vor.u32 %v9738_v38, %v7968_v37  ;;  %2579 = vmatmul.bf16.vlgmr.msra.gmra.mxu2 %v10465_v54  ;;  %v179_v37 = vld [vmem:[#allocation2 + $0x68] sm:$0xff]  ;;  %v6821_v38 = vor.u32 %v9446_v26, %v6818_v27 }
  0x72   :  { %v7648_v51 = vld [vmem:[#allocation5 + $0x980] sm:$0xf]  ;;  %v10469_v60 = vpack.c.bf16 %v176_v48, %v169_v47  ;;  %v9366_v48 = vld [vmem:[#allocation5 + $0x84] sm:$0xf] }
  0x73   :  { %v9658_v52 = vld [vmem:[#allocation5 + $0x99c] sm:$0xf0]  ;;  %2634 = vmatpush.bf16.msrb.mxu2 %v7969_v59  ;;  %v6501_v57 = vor.u32 %v9366_v48, %v6498_v49  ;;  %v7938_v34 = vld [vmem:[#allocation5 + $0xbe0] sm:$0xf0] }
  0x74   :  { %v7904_v53 = vld [vmem:[#allocation5 + $0xb80] sm:$0xf]  ;;  %11123 = vst [vmem:[#allocation25_spill] sm:$0xff] %v10469_v60  ;;  %v7649_v0 = vor.u32 %v9658_v52, %v7648_v51  ;;  %2593 = vmatmul.bf16.vlgmr.msra.gmra.mxu3 %v10469_v60  ;;  %v6789_v51 = vor.u32 %v9438_v40, %v6786_v41  ;;  %v9526_v35 = vld [vmem:[#allocation5 + $0x584] sm:$0xf] }
  0x75   :  { %v9722_v55 = vld [vmem:[#allocation5 + $0xb9c] sm:$0xf0]  ;;  %2642 = vmatpush.bf16.msrb.mxu3 %v6629_v4  ;;  %v7394_v40 = vld [vmem:[#allocation5 + $0x7a0] sm:$0xf0] }
  0x76   :  { %v7905_v3 = vor.u32 %v9722_v55, %v7904_v53  ;;  %v7616_v5 = vld [vmem:[#allocation5 + $0x940] sm:$0xf]  ;;  %2600 = vmatpush.bf16.msrb.mxu0 %v7649_v0  ;;  %v9430_v53 = vld [vmem:[#allocation5 + $0x284] sm:$0xf] }
  0x77   :  { %v9650_v6 = vld [vmem:[#allocation5 + $0x95c] sm:$0xf0]  ;;  %2655 = vmatpush.bf16.msra.mxu2 %v6917_v63  ;;  %v6754_v55 = vld [vmem:[#allocation5 + $0x2a0] sm:$0xf0] }
  0x78   :  { %v7872_v7 = vld [vmem:[#allocation5 + $0xb40] sm:$0xf]  ;;  %v7617_v13 = vor.u32 %v9650_v6, %v7616_v5  ;;  %2614 = vmatpush.bf16.msrb.mxu1 %v7905_v3  ;;  %v9358_v0 = vld [vmem:[#allocation5 + $0x44] sm:$0xf]  ;;  %v6757_v4 = vor.u32 %v9430_v53, %v6754_v55 }
  0x79   :  { %v9714_v9 = vld [vmem:[#allocation5 + $0xb5c] sm:$0xf0]  ;;  %2643 = vmatpush.bf16.msrb.mxu3 %v6597_v17  ;;  %v6722_v3 = vld [vmem:[#allocation5 + $0x260] sm:$0xf0]  ;;  %v6469_v11 = vor.u32 %v9358_v0, %v6466_v1 }
  0x7a   :  { %v7873_v16 = vor.u32 %v9714_v9, %v7872_v7  ;;  %v7584_v18 = vld [vmem:[#allocation5 + $0x900] sm:$0xf]  ;;  %2601 = vmatpush.bf16.msrb.mxu0 %v7617_v13  ;;  %v9350_v13 = vld [vmem:[#allocation5 + $0x4] sm:$0xf] }
  0x7b   :  { %v9642_v19 = vld [vmem:[#allocation5 + $0x91c] sm:$0xf0]  ;;  %2656 = vmatpush.bf16.msra.mxu2 %v6885_v12  ;;  %v9598_v17 = vld [vmem:[#allocation5 + $0x7c4] sm:$0xf]  ;;  %v6437_v27 = vor.u32 %v9350_v13, %v6434_v14 }
  0x7c   :  { %v7840_v20 = vld [vmem:[#allocation5 + $0xb00] sm:$0xf]  ;;  %v7585_v25 = vor.u32 %v9642_v19, %v7584_v18  ;;  %2615 = vmatpush.bf16.msrb.mxu1 %v7873_v16  ;;  %v7170_v16 = vld [vmem:[#allocation5 + $0x5e0] sm:$0xf0] }
  0x7d   :  { %v9706_v21 = vld [vmem:[#allocation5 + $0xb1c] sm:$0xf0]  ;;  %2644 = vmatpush.bf16.msrb.mxu3 %v6565_v29  ;;  %v7426_v18 = vld [vmem:[#allocation5 + $0x7e0] sm:$0xf0]  ;;  %v171_v29 = vld [vmem:[#allocation2 + $0x28] sm:$0xff] }
  0x7e   :  { %v7841_v28 = vor.u32 %v9706_v21, %v7840_v20  ;;  %v7552_v30 = vld [vmem:[#allocation5 + $0x8c0] sm:$0xf]  ;;  %2602 = vmatpush.bf16.msrb.mxu0 %v7585_v25  ;;  %v9662_v19 = vld [vmem:[#allocation5 + $0x9c4] sm:$0xf]  ;;  %v6725_v21 = vor.u32 %v9422_v2, %v6722_v3 }
  0x7f   :  { %v9634_v31 = vld [vmem:[#allocation5 + $0x8dc] sm:$0xf0]  ;;  %2657 = vmatpush.bf16.msra.mxu2 %v6853_v24  ;;  %v7682_v20 = vld [vmem:[#allocation5 + $0x9e0] sm:$0xf0]  ;;  %v177_v24 = vld [vmem:[#allocation2 + $0x58] sm:$0xff] }
  0x80   :  { %v7808_v32 = vld [vmem:[#allocation5 + $0xac0] sm:$0xf]  ;;  %v7553_v39 = vor.u32 %v9634_v31, %v7552_v30  ;;  %2616 = vmatpush.bf16.msrb.mxu1 %v7841_v28  ;;  %v9414_v25 = vld [vmem:[#allocation5 + $0x204] sm:$0xf]  ;;  %v178_v30 = vld [vmem:[#allocation2 + $0x60] sm:$0xff]  ;;  %v7173_v31 = vor.u32 %v9534_v15, %v7170_v16 }
  0x81   :  { %v9698_v33 = vld [vmem:[#allocation5 + $0xadc] sm:$0xf0]  ;;  %2645 = vmatpush.bf16.msrb.mxu3 %v6533_v43  ;;  %v6690_v28 = vld [vmem:[#allocation5 + $0x220] sm:$0xf0] }
  0x82   :  { %v172_v36 = vld [vmem:[#allocation2 + $0x30] sm:$0xff]  ;;  %v7809_v42 = vor.u32 %v9698_v33, %v7808_v32  ;;  %2603 = vmatpush.bf16.msrb.mxu0 %v7553_v39  ;;  %v7429_v32 = vor.u32 %v9598_v17, %v7426_v18  ;;  %v6693_v41 = vor.u32 %v9414_v25, %v6690_v28 }
  0x83   :  { %v7520_v44 = vld [vmem:[#allocation5 + $0x880] sm:$0xf]  ;;  %v10477_v50 = vpack.c.bf16 %v179_v37, %v172_v36  ;;  %2658 = vmatpush.bf16.msra.mxu2 %v6821_v38  ;;  %v9726_v33 = vld [vmem:[#allocation5 + $0xbc4] sm:$0xf]  ;;  %v7685_v36 = vor.u32 %v9662_v19, %v7682_v20  ;;  %v10481_v37 = vpack.c.bf16 %v177_v24, %v170_v23 }
  0x84   :  { %v9626_v45 = vld [vmem:[#allocation5 + $0x89c] sm:$0xf0]  ;;  %2617 = vmatpush.bf16.msrb.mxu1 %v7809_v42  ;;  %v7138_v38 = vld [vmem:[#allocation5 + $0x5a0] sm:$0xf0]  ;;  %v10483_v42 = vpack.c.bf16 %v178_v30, %v171_v29 }
  0x85   :  { %v7776_v46 = vld [vmem:[#allocation5 + $0xa80] sm:$0xf]  ;;  %11124 = vst [vmem:[#allocation26_spill] sm:$0xff] %v10477_v50  ;;  %v7521_v52 = vor.u32 %v9626_v45, %v7520_v44  ;;  %7998 = vmatmul.msk.bf16.vlgmr.msrb.gmra.mxu2 %vm2539_vm0, %v10477_v50  ;;  %2646 = vmatpush.bf16.msrb.mxu3 %v6501_v57  ;;  %v9590_v39 = vld [vmem:[#allocation5 + $0x784] sm:$0xf]  ;;  %v7941_v45 = vor.u32 %v9726_v33, %v7938_v34 }
  0x86   :  { %v9690_v47 = vld [vmem:[#allocation5 + $0xa9c] sm:$0xf0]  ;;  %v9654_v43 = vld [vmem:[#allocation5 + $0x984] sm:$0xf] }
  0x87   :  { %v7777_v56 = vor.u32 %v9690_v47, %v7776_v46  ;;  %v7488_v59 = vld [vmem:[#allocation5 + $0x840] sm:$0xf]  ;;  %2659 = vmatpush.bf16.msra.mxu2 %v6789_v51  ;;  %2604 = vmatpush.bf16.msrb.mxu0 %v7521_v52  ;;  %v7650_v44 = vld [vmem:[#allocation5 + $0x9a0] sm:$0xf0]  ;;  %v7141_v46 = vor.u32 %v9526_v35, %v7138_v38  ;;  %v7397_v47 = vor.u32 %v9590_v39, %v7394_v40 }
  0x88   :  { %v9618_v61 = vld [vmem:[#allocation5 + $0x85c] sm:$0xf0]  ;;  %v9718_v48 = vld [vmem:[#allocation5 + $0xb84] sm:$0xf]  ;;  %v7653_v52 = vor.u32 %v9654_v43, %v7650_v44 }
  0x89   :  { %v7744_v62 = vld [vmem:[#allocation5 + $0xa40] sm:$0xf]  ;;  %v7489_v5 = vor.u32 %v9618_v61, %v7488_v59  ;;  %2618 = vmatpush.bf16.msrb.mxu1 %v7777_v56  ;;  %2647 = vmatpush.bf16.msrb.mxu3 %v6469_v11  ;;  %v7906_v49 = vld [vmem:[#allocation5 + $0xba0] sm:$0xf0] }
  0x8a   :  { %v9682_v63 = vld [vmem:[#allocation5 + $0xa5c] sm:$0xf0]  ;;  %v9518_v51 = vld [vmem:[#allocation5 + $0x544] sm:$0xf]  ;;  %v7909_v61 = vor.u32 %v9718_v48, %v7906_v49 }
  0x8b   :  { %v7456_v6 = vld [vmem:[#allocation5 + $0x800] sm:$0xf]  ;;  %v7745_v10 = vor.u32 %v9682_v63, %v7744_v62  ;;  %2660 = vmatpush.bf16.msra.mxu2 %v6757_v4  ;;  %2605 = vmatpush.bf16.msrb.mxu0 %v7489_v5  ;;  %v7106_v53 = vld [vmem:[#allocation5 + $0x560] sm:$0xf0] }
  0x8c   :  { %v9610_v7 = vld [vmem:[#allocation5 + $0x81c] sm:$0xf0]  ;;  %v9582_v55 = vld [vmem:[#allocation5 + $0x744] sm:$0xf]  ;;  %v7109_v62 = vor.u32 %v9518_v51, %v7106_v53 }
  0x8d   :  { %v7712_v9 = vld [vmem:[#allocation5 + $0xa00] sm:$0xf]  ;;  %v7457_v22 = vor.u32 %v9610_v7, %v7456_v6  ;;  %2619 = vmatpush.bf16.msrb.mxu1 %v7745_v10  ;;  %2648 = vmatpush.bf16.msrb.mxu3 %v6437_v27  ;;  %v7362_v56 = vld [vmem:[#allocation5 + $0x760] sm:$0xf0] }
  0x8e   :  { %v9674_v12 = vld [vmem:[#allocation5 + $0xa1c] sm:$0xf0]  ;;  %v9646_v57 = vld [vmem:[#allocation5 + $0x944] sm:$0xf]  ;;  %v7365_v63 = vor.u32 %v9582_v55, %v7362_v56 }
  0x8f   :  { %v7713_v26 = vor.u32 %v9674_v12, %v7712_v9  ;;  %2661 = vmatpush.bf16.msra.mxu2 %v6725_v21  ;;  %2606 = vmatpush.bf16.msrb.mxu0 %v7457_v22  ;;  %v7618_v59 = vld [vmem:[#allocation5 + $0x960] sm:$0xf0] }
  0x90   :  { %2649 = vmatmul.bf16.vlgmr.msrb.gmra.mxu3 %v10467_v58  ;;  %v9710_v0 = vld [vmem:[#allocation5 + $0xb44] sm:$0xf]  ;;  %v7621_v3 = vor.u32 %v9646_v57, %v7618_v59 }
  0x91   :  { %2620 = vmatpush.bf16.msrb.mxu1 %v7713_v26  ;;  %2697 = vmatpush.bf16.msra.mxu3 %v7685_v36  ;;  %v7874_v1 = vld [vmem:[#allocation5 + $0xb60] sm:$0xf0] }
  0x92   :  { %2607 = vmatmul.bf16.vlgmr.msrb.gmra.mxu0 %v10481_v37  ;;  %v9510_v2 = vld [vmem:[#allocation5 + $0x504] sm:$0xf]  ;;  %v7877_v10 = vor.u32 %v9710_v0, %v7874_v1  ;;  %v6664_v0 = vld [vmem:[#allocation5 + $0x1c8] sm:$0xf] }
  0x93   :  { %2669 = vmatpush.bf16.msra.mxu0 %v7173_v31  ;;  %2662 = vmatpush.bf16.msra.mxu2 %v6693_v41  ;;  %v7074_v4 = vld [vmem:[#allocation5 + $0x520] sm:$0xf0]  ;;  %v9411_v1 = vld [vmem:[#allocation5 + $0x1e4] sm:$0xf0] }
  0x94   :  { %2621 = vmatmul.bf16.vlgmr.msrb.gmra.mxu1 %v10483_v42  ;;  %v9574_v5 = vld [vmem:[#allocation5 + $0x704] sm:$0xf]  ;;  %v7077_v11 = vor.u32 %v9510_v2, %v7074_v4  ;;  %v6920_v2 = vld [vmem:[#allocation5 + $0x3c8] sm:$0xf] }
  0x95   :  { %2683 = vmatpush.bf16.msra.mxu1 %v7429_v32  ;;  %2698 = vmatpush.bf16.msra.mxu3 %v7653_v52  ;;  %v7330_v6 = vld [vmem:[#allocation5 + $0x720] sm:$0xf0]  ;;  %v9475_v4 = vld [vmem:[#allocation5 + $0x3e4] sm:$0xf0] }
  0x96   :  { %2663 = vmatmul.bf16.vlgmr.msra.gmra.mxu2 %v10473_v8  ;;  %v9638_v7 = vld [vmem:[#allocation5 + $0x904] sm:$0xf]  ;;  %v7333_v12 = vor.u32 %v9574_v5, %v7330_v6 }
  0x97   :  { %2711 = vmatpush.bf16.msrb.mxu2 %v7941_v45  ;;  %2670 = vmatpush.bf16.msra.mxu0 %v7141_v46  ;;  %v7586_v9 = vld [vmem:[#allocation5 + $0x920] sm:$0xf0] }
  0x98   :  { %v9702_v13 = vld [vmem:[#allocation5 + $0xb04] sm:$0xf]  ;;  %v7589_v16 = vor.u32 %v9638_v7, %v7586_v9 }
  0x99   :  { %2684 = vmatpush.bf16.msra.mxu1 %v7397_v47  ;;  %v7842_v14 = vld [vmem:[#allocation5 + $0xb20] sm:$0xf0]  ;;  %2699 = vmatpush.bf16.msra.mxu3 %v7621_v3 }
  0x9a   :  { %v9502_v15 = vld [vmem:[#allocation5 + $0x4c4] sm:$0xf]  ;;  %v7845_v22 = vor.u32 %v9702_v13, %v7842_v14  ;;  %v6665_v13 = vor.u32 %v9411_v1, %v6664_v0  ;;  %v7176_v14 = vld [vmem:[#allocation5 + $0x5c8] sm:$0xf] }
  0x9b   :  { %2712 = vmatpush.bf16.msrb.mxu2 %v7909_v61  ;;  %2671 = vmatpush.bf16.msra.mxu0 %v7109_v62  ;;  %v7042_v17 = vld [vmem:[#allocation5 + $0x4e0] sm:$0xf0]  ;;  %v9379_v0 = vld [vmem:[#allocation5 + $0xe4] sm:$0xf0] }
  0x9c   :  { %v9566_v18 = vld [vmem:[#allocation5 + $0x6c4] sm:$0xf]  ;;  %v7045_v23 = vor.u32 %v9502_v15, %v7042_v17  ;;  %v9539_v15 = vld [vmem:[#allocation5 + $0x5e4] sm:$0xf0]  ;;  %v6921_v17 = vor.u32 %v9475_v4, %v6920_v2 }
  0x9d   :  { %2685 = vmatpush.bf16.msra.mxu1 %v7365_v63  ;;  %v7298_v19 = vld [vmem:[#allocation5 + $0x6e0] sm:$0xf0]  ;;  %2700 = vmatpush.bf16.msra.mxu3 %v7589_v16  ;;  %v7432_v16 = vld [vmem:[#allocation5 + $0x7c8] sm:$0xf] }
  0x9e   :  { %v9630_v20 = vld [vmem:[#allocation5 + $0x8c4] sm:$0xf]  ;;  %v7301_v24 = vor.u32 %v9566_v18, %v7298_v19  ;;  %v9603_v19 = vld [vmem:[#allocation5 + $0x7e4] sm:$0xf0] }
  0x9f   :  { %v7554_v21 = vld [vmem:[#allocation5 + $0x8e0] sm:$0xf0]  ;;  %2713 = vmatpush.bf16.msrb.mxu2 %v7877_v10  ;;  %2672 = vmatpush.bf16.msra.mxu0 %v7077_v11  ;;  %v6792_v1 = vld [vmem:[#allocation5 + $0x2c8] sm:$0xf] }
  0xa0   :  { %v9694_v25 = vld [vmem:[#allocation5 + $0xac4] sm:$0xf]  ;;  %v7557_v28 = vor.u32 %v9630_v20, %v7554_v21  ;;  %v6632_v20 = vld [vmem:[#allocation5 + $0x188] sm:$0xf] }
  0xa1   :  { %2686 = vmatpush.bf16.msra.mxu1 %v7333_v12  ;;  %v7810_v26 = vld [vmem:[#allocation5 + $0xae0] sm:$0xf0]  ;;  %v9403_v21 = vld [vmem:[#allocation5 + $0x1a4] sm:$0xf0] }
  0xa2   :  { %v9494_v27 = vld [vmem:[#allocation5 + $0x484] sm:$0xf]  ;;  %v7813_v34 = vor.u32 %v9694_v25, %v7810_v26  ;;  %2701 = vmatpush.bf16.msra.mxu3 %v7557_v28  ;;  %v7177_v25 = vor.u32 %v9539_v15, %v7176_v14  ;;  %v7433_v26 = vor.u32 %v9603_v19, %v7432_v16  ;;  %v7144_v28 = vld [vmem:[#allocation5 + $0x588] sm:$0xf] }
  0xa3   :  { %v7010_v29 = vld [vmem:[#allocation5 + $0x4a0] sm:$0xf0]  ;;  %2714 = vmatpush.bf16.msrb.mxu2 %v7845_v22  ;;  %2673 = vmatpush.bf16.msra.mxu0 %v7045_v23  ;;  %v6888_v23 = vld [vmem:[#allocation5 + $0x388] sm:$0xf] }
  0xa4   :  { %v9558_v30 = vld [vmem:[#allocation5 + $0x684] sm:$0xf]  ;;  %v7013_v35 = vor.u32 %v9494_v27, %v7010_v29  ;;  %v6633_v27 = vor.u32 %v9403_v21, %v6632_v20  ;;  %v9531_v29 = vld [vmem:[#allocation5 + $0x5a4] sm:$0xf0] }
  0xa5   :  { %v7266_v31 = vld [vmem:[#allocation5 + $0x6a0] sm:$0xf0]  ;;  %2687 = vmatpush.bf16.msra.mxu1 %v7301_v24  ;;  %v9467_v24 = vld [vmem:[#allocation5 + $0x3a4] sm:$0xf0] }
  0xa6   :  { %v9622_v32 = vld [vmem:[#allocation5 + $0x884] sm:$0xf]  ;;  %v7269_v36 = vor.u32 %v9558_v30, %v7266_v31  ;;  %v7400_v30 = vld [vmem:[#allocation5 + $0x788] sm:$0xf]  ;;  %v6889_v31 = vor.u32 %v9467_v24, %v6888_v23 }
  0xa7   :  { %v7522_v33 = vld [vmem:[#allocation5 + $0x8a0] sm:$0xf0]  ;;  %2715 = vmatpush.bf16.msrb.mxu2 %v7813_v34  ;;  %2674 = vmatpush.bf16.msra.mxu0 %v7013_v35  ;;  %v9395_v34 = vld [vmem:[#allocation5 + $0x164] sm:$0xf0] }
  0xa8   :  { %v9686_v38 = vld [vmem:[#allocation5 + $0xa84] sm:$0xf]  ;;  %v7525_v41 = vor.u32 %v9622_v32, %v7522_v33  ;;  %v9595_v32 = vld [vmem:[#allocation5 + $0x7a4] sm:$0xf0] }
  0xa9   :  { %v7778_v39 = vld [vmem:[#allocation5 + $0xaa0] sm:$0xf0]  ;;  %2688 = vmatpush.bf16.msra.mxu1 %v7269_v36  ;;  %v6600_v33 = vld [vmem:[#allocation5 + $0x148] sm:$0xf] }
  0xaa   :  { %v9486_v40 = vld [vmem:[#allocation5 + $0x444] sm:$0xf]  ;;  %v7781_v48 = vor.u32 %v9686_v38, %v7778_v39  ;;  %2702 = vmatpush.bf16.msra.mxu3 %v7525_v41  ;;  %v6856_v35 = vld [vmem:[#allocation5 + $0x348] sm:$0xf]  ;;  %v7145_v38 = vor.u32 %v9531_v29, %v7144_v28  ;;  %v7401_v39 = vor.u32 %v9595_v32, %v7400_v30 }
  0xab   :  { %v6978_v43 = vld [vmem:[#allocation5 + $0x460] sm:$0xf0]  ;;  %v9459_v36 = vld [vmem:[#allocation5 + $0x364] sm:$0xf0] }
  0xac   :  { %v9550_v44 = vld [vmem:[#allocation5 + $0x644] sm:$0xf]  ;;  %v6981_v52 = vor.u32 %v9486_v40, %v6978_v43  ;;  %2716 = vmatpush.bf16.msrb.mxu2 %v7781_v48  ;;  %v6601_v40 = vor.u32 %v9395_v34, %v6600_v33  ;;  %v7112_v41 = vld [vmem:[#allocation5 + $0x548] sm:$0xf] }
  0xad   :  { %v7234_v45 = vld [vmem:[#allocation5 + $0x660] sm:$0xf0]  ;;  %v9523_v43 = vld [vmem:[#allocation5 + $0x564] sm:$0xf0] }
  0xae   :  { %v9614_v46 = vld [vmem:[#allocation5 + $0x844] sm:$0xf]  ;;  %v7237_v53 = vor.u32 %v9550_v44, %v7234_v45  ;;  %2675 = vmatpush.bf16.msra.mxu0 %v6981_v52  ;;  %v7368_v44 = vld [vmem:[#allocation5 + $0x748] sm:$0xf]  ;;  %v6857_v45 = vor.u32 %v9459_v36, %v6856_v35  ;;  %v7113_v52 = vor.u32 %v9523_v43, %v7112_v41 }
  0xaf   :  { %v7490_v47 = vld [vmem:[#allocation5 + $0x860] sm:$0xf0]  ;;  %v9387_v48 = vld [vmem:[#allocation5 + $0x124] sm:$0xf0] }
  0xb0   :  { %v9678_v49 = vld [vmem:[#allocation5 + $0xa44] sm:$0xf]  ;;  %v7493_v59 = vor.u32 %v9614_v46, %v7490_v47  ;;  %2689 = vmatpush.bf16.msra.mxu1 %v7237_v53  ;;  %v9587_v46 = vld [vmem:[#allocation5 + $0x764] sm:$0xf0] }
  0xb1   :  { %v7746_v51 = vld [vmem:[#allocation5 + $0xa60] sm:$0xf0]  ;;  %v6568_v47 = vld [vmem:[#allocation5 + $0x108] sm:$0xf] }
  0xb2   :  { %v9478_v55 = vld [vmem:[#allocation5 + $0x404] sm:$0xf]  ;;  %v7749_v3 = vor.u32 %v9678_v49, %v7746_v51  ;;  %2703 = vmatpush.bf16.msra.mxu3 %v7493_v59  ;;  %v6824_v49 = vld [vmem:[#allocation5 + $0x308] sm:$0xf] }
  0xb3   :  { %v6946_v56 = vld [vmem:[#allocation5 + $0x420] sm:$0xf0]  ;;  %v9451_v51 = vld [vmem:[#allocation5 + $0x324] sm:$0xf0] }
  0xb4   :  { %v9542_v57 = vld [vmem:[#allocation5 + $0x604] sm:$0xf]  ;;  %v6949_v7 = vor.u32 %v9478_v55, %v6946_v56  ;;  %2717 = vmatpush.bf16.msrb.mxu2 %v7749_v3  ;;  %v7080_v53 = vld [vmem:[#allocation5 + $0x508] sm:$0xf]  ;;  %v7369_v55 = vor.u32 %v9587_v46, %v7368_v44  ;;  %v6569_v56 = vor.u32 %v9387_v48, %v6568_v47 }
  0xb5   :  { %v7202_v61 = vld [vmem:[#allocation5 + $0x620] sm:$0xf0]  ;;  %v7336_v59 = vld [vmem:[#allocation5 + $0x708] sm:$0xf] }
  0xb6   :  { %v9606_v62 = vld [vmem:[#allocation5 + $0x804] sm:$0xf]  ;;  %v7205_v9 = vor.u32 %v9542_v57, %v7202_v61  ;;  %2676 = vmatpush.bf16.msra.mxu0 %v6949_v7  ;;  %v9515_v57 = vld [vmem:[#allocation5 + $0x524] sm:$0xf0]  ;;  %v6825_v61 = vor.u32 %v9451_v51, %v6824_v49 }
  0xb7   :  { %v7458_v63 = vld [vmem:[#allocation5 + $0x820] sm:$0xf0]  ;;  %v9443_v2 = vld [vmem:[#allocation5 + $0x2e4] sm:$0xf0]  ;;  %v7081_v3 = vor.u32 %v9515_v57, %v7080_v53  ;;  %v9407_v57 = vld [vmem:[#allocation5 + $0x1cc] sm:$0xf] }
  0xb8   :  { %v9734_v5 = vld [vmem:[#allocation5 + $0xc04] sm:$0xf]  ;;  %v7461_v12 = vor.u32 %v9606_v62, %v7458_v63  ;;  %2690 = vmatpush.bf16.msra.mxu1 %v7205_v9  ;;  %v9579_v62 = vld [vmem:[#allocation5 + $0x724] sm:$0xf0] }
  0xb9   :  { %v7970_v6 = vld [vmem:[#allocation5 + $0xc20] sm:$0xf0]  ;;  %2677 = vmatmul.bf16.vlgmr.msra.gmra.mxu0 %v10465_v54  ;;  %v6536_v63 = vld [vmem:[#allocation5 + $0xc8] sm:$0xf]  ;;  %v7337_v4 = vor.u32 %v9579_v62, %v7336_v59  ;;  %v6666_v59 = vld [vmem:[#allocation5 + $0x1e8] sm:$0xf0] }
  0xba   :  { %v9670_v10 = vld [vmem:[#allocation5 + $0xa04] sm:$0xf]  ;;  %v7973_v18 = vor.u32 %v9734_v5, %v7970_v6  ;;  %2704 = vmatpush.bf16.msra.mxu3 %v7461_v12  ;;  %v6537_v5 = vor.u32 %v9379_v0, %v6536_v63  ;;  %v7048_v6 = vld [vmem:[#allocation5 + $0x4c8] sm:$0xf] }
  0xbb   :  { %v7714_v11 = vld [vmem:[#allocation5 + $0xa20] sm:$0xf0]  ;;  %2691 = vmatmul.bf16.vlgmr.msra.gmra.mxu1 %v10469_v60  ;;  %v9507_v7 = vld [vmem:[#allocation5 + $0x4e4] sm:$0xf0] }
  0xbc   :  { %v7717_v22 = vor.u32 %v9670_v10, %v7714_v11  ;;  %2739 = vmatpush.bf16.msrb.mxu1 %v6665_v13  ;;  %2732 = vmatpush.bf16.msrb.mxu0 %v7973_v18  ;;  %v7304_v9 = vld [vmem:[#allocation5 + $0x6c8] sm:$0xf]  ;;  %v6793_v10 = vor.u32 %v9443_v2, %v6792_v1  ;;  %v7049_v16 = vor.u32 %v9507_v7, %v7048_v6 }
  0xbd   :  { %2705 = vmatmul.bf16.vlgmr.msra.gmra.mxu3 %v10481_v37  ;;  %v9571_v11 = vld [vmem:[#allocation5 + $0x6e4] sm:$0xf0]  ;;  %v6669_v6 = vor.u32 %v9407_v57, %v6666_v59 }
  0xbe   :  { %2753 = vmatpush.bf16.msrb.mxu3 %v6921_v17  ;;  %2718 = vmatpush.bf16.msrb.mxu2 %v7717_v22  ;;  %v6504_v12 = vld [vmem:[#allocation5 + $0x88] sm:$0xf]  ;;  %v7305_v17 = vor.u32 %v9571_v11, %v7304_v9  ;;  %v9471_v9 = vld [vmem:[#allocation5 + $0x3cc] sm:$0xf] }
  0xbf   :  { %v9371_v13 = vld [vmem:[#allocation5 + $0xa4] sm:$0xf0]  ;;  %v9399_v11 = vld [vmem:[#allocation5 + $0x18c] sm:$0xf] }
  0xc0   :  { %2767 = vmatpush.bf16.msra.mxu0 %v7177_v25  ;;  %2740 = vmatpush.bf16.msrb.mxu1 %v6633_v27  ;;  %v6760_v14 = vld [vmem:[#allocation5 + $0x288] sm:$0xf]  ;;  %v6505_v18 = vor.u32 %v9371_v13, %v6504_v12 }
  0xc1   :  { %2719 = vmatmul.bf16.vlgmr.msrb.gmra.mxu2 %v10483_v42  ;;  %v9435_v15 = vld [vmem:[#allocation5 + $0x2a4] sm:$0xf0] }
  0xc2   :  { %2781 = vmatpush.bf16.msra.mxu2 %v7433_v26  ;;  %2754 = vmatpush.bf16.msrb.mxu3 %v6889_v31  ;;  %v7016_v19 = vld [vmem:[#allocation5 + $0x488] sm:$0xf]  ;;  %v6761_v22 = vor.u32 %v9435_v15, %v6760_v14  ;;  %v6634_v14 = vld [vmem:[#allocation5 + $0x1a8] sm:$0xf0] }
  0xc3   :  { %v9499_v20 = vld [vmem:[#allocation5 + $0x4a4] sm:$0xf0] }
  0xc4   :  { %2768 = vmatpush.bf16.msra.mxu0 %v7145_v38  ;;  %2741 = vmatpush.bf16.msrb.mxu1 %v6601_v40  ;;  %v7272_v21 = vld [vmem:[#allocation5 + $0x688] sm:$0xf]  ;;  %v7017_v28 = vor.u32 %v9499_v20, %v7016_v19  ;;  %v6637_v20 = vor.u32 %v9399_v11, %v6634_v14  ;;  %v9431_v11 = vld [vmem:[#allocation5 + $0x28c] sm:$0xf] }
  0xc5   :  { %v9563_v23 = vld [vmem:[#allocation5 + $0x6a4] sm:$0xf0]  ;;  %v6762_v14 = vld [vmem:[#allocation5 + $0x2a8] sm:$0xf0] }
  0xc6   :  { %2782 = vmatpush.bf16.msra.mxu2 %v7401_v39  ;;  %2755 = vmatpush.bf16.msrb.mxu3 %v6857_v45  ;;  %v6472_v24 = vld [vmem:[#allocation5 + $0x48] sm:$0xf]  ;;  %v7273_v30 = vor.u32 %v9563_v23, %v7272_v21  ;;  %v6890_v23 = vld [vmem:[#allocation5 + $0x3a8] sm:$0xf0] }
  0xc7   :  { %v9363_v25 = vld [vmem:[#allocation5 + $0x64] sm:$0xf0] }
  0xc8   :  { %2769 = vmatpush.bf16.msra.mxu0 %v7113_v52  ;;  %2742 = vmatpush.bf16.msrb.mxu1 %v6569_v56  ;;  %v6728_v26 = vld [vmem:[#allocation5 + $0x248] sm:$0xf]  ;;  %v6473_v31 = vor.u32 %v9363_v25, %v6472_v24  ;;  %v9391_v24 = vld [vmem:[#allocation5 + $0x14c] sm:$0xf] }
  0xc9   :  { %7999 = vmatmul.msk.bf16.vlgmr.msrb.gmra.mxu0 %vm2539_vm0, %v10477_v50  ;;  %v9427_v27 = vld [vmem:[#allocation5 + $0x264] sm:$0xf0] }
  0xca   :  { %2783 = vmatpush.bf16.msra.mxu2 %v7369_v55  ;;  %2756 = vmatpush.bf16.msrb.mxu3 %v6825_v61  ;;  %v6984_v29 = vld [vmem:[#allocation5 + $0x448] sm:$0xf]  ;;  %v6729_v35 = vor.u32 %v9427_v27, %v6728_v26  ;;  %v6602_v26 = vld [vmem:[#allocation5 + $0x168] sm:$0xf0] }
  0xcb   :  { %v9491_v32 = vld [vmem:[#allocation5 + $0x464] sm:$0xf0] }
  0xcc   :  { %2770 = vmatpush.bf16.msra.mxu0 %v7081_v3  ;;  %2743 = vmatpush.bf16.msrb.mxu1 %v6537_v5  ;;  %v7240_v33 = vld [vmem:[#allocation5 + $0x648] sm:$0xf]  ;;  %v6985_v44 = vor.u32 %v9491_v32, %v6984_v29  ;;  %v6605_v32 = vor.u32 %v9391_v24, %v6602_v26  ;;  %v6765_v24 = vor.u32 %v9431_v11, %v6762_v14  ;;  %v7434_v26 = vld [vmem:[#allocation5 + $0x7e8] sm:$0xf0] }
  0xcd   :  { %v9555_v34 = vld [vmem:[#allocation5 + $0x664] sm:$0xf0]  ;;  %v9575_v11 = vld [vmem:[#allocation5 + $0x70c] sm:$0xf] }
  0xce   :  { %2784 = vmatpush.bf16.msra.mxu2 %v7337_v4  ;;  %2757 = vmatpush.bf16.msrb.mxu3 %v6793_v10  ;;  %v6440_v36 = vld [vmem:[#allocation5 + $0x8] sm:$0xf]  ;;  %v7241_v47 = vor.u32 %v9555_v34, %v7240_v33  ;;  %v6922_v10 = vld [vmem:[#allocation5 + $0x3e8] sm:$0xf0] }
  0xcf   :  { %v9355_v38 = vld [vmem:[#allocation5 + $0x24] sm:$0xf0]  ;;  %v6925_v19 = vor.u32 %v9471_v9, %v6922_v10  ;;  %v9455_v34 = vld [vmem:[#allocation5 + $0x34c] sm:$0xf] }
  0xd0   :  { %2771 = vmatpush.bf16.msra.mxu0 %v7049_v16  ;;  %2744 = vmatpush.bf16.msrb.mxu1 %v6505_v18  ;;  %v6696_v39 = vld [vmem:[#allocation5 + $0x208] sm:$0xf]  ;;  %v6441_v48 = vor.u32 %v9355_v38, %v6440_v36  ;;  %v9383_v36 = vld [vmem:[#allocation5 + $0x10c] sm:$0xf] }
  0xd1   :  { %v9419_v40 = vld [vmem:[#allocation5 + $0x224] sm:$0xf0] }
  0xd2   :  { %2785 = vmatpush.bf16.msra.mxu2 %v7305_v17  ;;  %2758 = vmatpush.bf16.msrb.mxu3 %v6761_v22  ;;  %v7688_v41 = vld [vmem:[#allocation5 + $0x9c8] sm:$0xf]  ;;  %v6697_v53 = vor.u32 %v9419_v40, %v6696_v39  ;;  %v9463_v22 = vld [vmem:[#allocation5 + $0x38c] sm:$0xf] }
  0xd3   :  { %v9667_v43 = vld [vmem:[#allocation5 + $0x9e4] sm:$0xf0]  ;;  %v6570_v39 = vld [vmem:[#allocation5 + $0x128] sm:$0xf0] }
  0xd4   :  { %2772 = vmatpush.bf16.msra.mxu0 %v7017_v28  ;;  %v7944_v45 = vld [vmem:[#allocation5 + $0xbc8] sm:$0xf]  ;;  %2745 = vmatpush.bf16.msrb.mxu1 %v6473_v31  ;;  %v7689_v55 = vor.u32 %v9667_v43, %v7688_v41  ;;  %v6893_v31 = vor.u32 %v9463_v22, %v6890_v23  ;;  %v9535_v22 = vld [vmem:[#allocation5 + $0x5cc] sm:$0xf] }
  0xd5   :  { %v9731_v46 = vld [vmem:[#allocation5 + $0xbe4] sm:$0xf0]  ;;  %v7178_v23 = vld [vmem:[#allocation5 + $0x5e8] sm:$0xf0] }
  0xd6   :  { %2786 = vmatpush.bf16.msra.mxu2 %v7273_v30  ;;  %v6952_v49 = vld [vmem:[#allocation5 + $0x408] sm:$0xf]  ;;  %2759 = vmatpush.bf16.msrb.mxu3 %v6729_v35  ;;  %v7945_v61 = vor.u32 %v9731_v46, %v7944_v45  ;;  %v6858_v35 = vld [vmem:[#allocation5 + $0x368] sm:$0xf0]  ;;  %v6573_v46 = vor.u32 %v9383_v36, %v6570_v39 }
  0xd7   :  { %v9483_v51 = vld [vmem:[#allocation5 + $0x424] sm:$0xf0]  ;;  %v6861_v45 = vor.u32 %v9455_v34, %v6858_v35  ;;  %v6442_v34 = vld [vmem:[#allocation5 + $0x28] sm:$0xf0] }
  0xd8   :  { %v7208_v52 = vld [vmem:[#allocation5 + $0x608] sm:$0xf]  ;;  %2773 = vmatpush.bf16.msra.mxu0 %v6985_v44  ;;  %v6953_v1 = vor.u32 %v9483_v51, %v6952_v49  ;;  %2746 = vmatpush.bf16.msrb.mxu1 %v6441_v48  ;;  %v9447_v48 = vld [vmem:[#allocation5 + $0x30c] sm:$0xf] }
  0xd9   :  { %v9547_v56 = vld [vmem:[#allocation5 + $0x624] sm:$0xf0]  ;;  %v6826_v49 = vld [vmem:[#allocation5 + $0x328] sm:$0xf0] }
  0xda   :  { %v7656_v62 = vld [vmem:[#allocation5 + $0x988] sm:$0xf]  ;;  %2787 = vmatpush.bf16.msra.mxu2 %v7241_v47  ;;  %v7209_v5 = vor.u32 %v9547_v56, %v7208_v52  ;;  %2760 = vmatpush.bf16.msrb.mxu3 %v6697_v53  ;;  %v9375_v51 = vld [vmem:[#allocation5 + $0xcc] sm:$0xf] }
  0xdb   :  { %v9659_v63 = vld [vmem:[#allocation5 + $0x9a4] sm:$0xf0]  ;;  %2747 = vmatmul.bf16.vlgmr.msrb.gmra.mxu1 %v10467_v58  ;;  %v6538_v53 = vld [vmem:[#allocation5 + $0xe8] sm:$0xf0] }
  0xdc   :  { %v7912_v0 = vld [vmem:[#allocation5 + $0xb88] sm:$0xf]  ;;  %2795 = vmatpush.bf16.msra.mxu1 %v7689_v55  ;;  %v7657_v7 = vor.u32 %v9659_v63, %v7656_v62  ;;  %2774 = vmatpush.bf16.msra.mxu0 %v6953_v1  ;;  %v6541_v62 = vor.u32 %v9375_v51, %v6538_v53  ;;  %v6794_v1 = vld [vmem:[#allocation5 + $0x2e8] sm:$0xf0] }
  0xdd   :  { %v9723_v2 = vld [vmem:[#allocation5 + $0xba4] sm:$0xf0]  ;;  %2761 = vmatmul.bf16.vlgmr.msrb.gmra.mxu3 %v10473_v8  ;;  %v9663_v35 = vld [vmem:[#allocation5 + $0x9cc] sm:$0xf] }
  0xde   :  { %v7976_v3 = vld [vmem:[#allocation5 + $0xc08] sm:$0xf]  ;;  %2809 = vmatpush.bf16.msra.mxu3 %v7945_v61  ;;  %v7913_v12 = vor.u32 %v9723_v2, %v7912_v0  ;;  %2788 = vmatpush.bf16.msra.mxu2 %v7209_v5  ;;  %v6829_v61 = vor.u32 %v9447_v48, %v6826_v49  ;;  %v9439_v0 = vld [vmem:[#allocation5 + $0x2cc] sm:$0xf] }
  0xdf   :  { %v9739_v4 = vld [vmem:[#allocation5 + $0xc24] sm:$0xf0]  ;;  %2775 = vmatmul.bf16.vlgmr.msra.gmra.mxu0 %v10465_v54  ;;  %v9367_v2 = vld [vmem:[#allocation5 + $0x8c] sm:$0xf]  ;;  %v6797_v10 = vor.u32 %v9439_v0, %v6794_v1 }
  0xe0   :  { %v7977_v13 = vor.u32 %v9739_v4, %v7976_v3  ;;  %v7624_v15 = vld [vmem:[#allocation5 + $0x948] sm:$0xf]  ;;  %2796 = vmatpush.bf16.msra.mxu1 %v7657_v7  ;;  %v6506_v4 = vld [vmem:[#allocation5 + $0xa8] sm:$0xf0] }
  0xe1   :  { %v9651_v16 = vld [vmem:[#allocation5 + $0x964] sm:$0xf0]  ;;  %2789 = vmatmul.bf16.vlgmr.msra.gmra.mxu2 %v10469_v60  ;;  %v9527_v39 = vld [vmem:[#allocation5 + $0x58c] sm:$0xf] }
  0xe2   :  { %v7880_v17 = vld [vmem:[#allocation5 + $0xb48] sm:$0xf]  ;;  %2837 = vmatpush.bf16.msrb.mxu2 %v6669_v6  ;;  %v7625_v21 = vor.u32 %v9651_v16, %v7624_v15  ;;  %2810 = vmatpush.bf16.msra.mxu3 %v7913_v12  ;;  %v6509_v12 = vor.u32 %v9367_v2, %v6506_v4  ;;  %v9359_v15 = vld [vmem:[#allocation5 + $0x4c] sm:$0xf] }
  0xe3   :  { %v9715_v18 = vld [vmem:[#allocation5 + $0xb64] sm:$0xf0]  ;;  %2830 = vmatpush.bf16.msrb.mxu0 %v7977_v13  ;;  %v6474_v16 = vld [vmem:[#allocation5 + $0x68] sm:$0xf0] }
  0xe4   :  { %v7881_v25 = vor.u32 %v9715_v18, %v7880_v17  ;;  %v7592_v27 = vld [vmem:[#allocation5 + $0x908] sm:$0xf]  ;;  %2797 = vmatpush.bf16.msra.mxu1 %v7625_v21  ;;  %v9727_v51 = vld [vmem:[#allocation5 + $0xbcc] sm:$0xf] }
  0xe5   :  { %v9643_v28 = vld [vmem:[#allocation5 + $0x924] sm:$0xf0]  ;;  %v9655_v53 = vld [vmem:[#allocation5 + $0x98c] sm:$0xf] }
  0xe6   :  { %v7848_v29 = vld [vmem:[#allocation5 + $0xb08] sm:$0xf]  ;;  %2838 = vmatpush.bf16.msrb.mxu2 %v6637_v20  ;;  %v7593_v33 = vor.u32 %v9643_v28, %v7592_v27  ;;  %2811 = vmatpush.bf16.msra.mxu3 %v7881_v25  ;;  %v9599_v25 = vld [vmem:[#allocation5 + $0x7cc] sm:$0xf]  ;;  %v6477_v27 = vor.u32 %v9359_v15, %v6474_v16 }
  0xe7   :  { %v9707_v30 = vld [vmem:[#allocation5 + $0xb24] sm:$0xf0]  ;;  %2851 = vmatpush.bf16.msra.mxu0 %v6925_v19  ;;  %v7437_v36 = vor.u32 %v9599_v25, %v7434_v26  ;;  %v7914_v4 = vld [vmem:[#allocation5 + $0xba8] sm:$0xf0]  ;;  %v2552_v26 = vpop.f32.mrf.mxu0 }
  0xe8   :  { %v7849_v38 = vor.u32 %v9707_v30, %v7848_v29  ;;  %v7560_v40 = vld [vmem:[#allocation5 + $0x8c8] sm:$0xf]  ;;  %2798 = vmatpush.bf16.msra.mxu1 %v7593_v33  ;;  %v9423_v29 = vld [vmem:[#allocation5 + $0x24c] sm:$0xf] }
  0xe9   :  { %v9635_v41 = vld [vmem:[#allocation5 + $0x8e4] sm:$0xf0]  ;;  %v6730_v30 = vld [vmem:[#allocation5 + $0x268] sm:$0xf0] }
  0xea   :  { %v7816_v43 = vld [vmem:[#allocation5 + $0xac8] sm:$0xf]  ;;  %2839 = vmatpush.bf16.msrb.mxu2 %v6605_v32  ;;  %v7561_v47 = vor.u32 %v9635_v41, %v7560_v40  ;;  %2812 = vmatpush.bf16.msra.mxu3 %v7849_v38  ;;  %v7181_v32 = vor.u32 %v9535_v22, %v7178_v23  ;;  %v9351_v33 = vld [vmem:[#allocation5 + $0xc] sm:$0xf]  ;;  %v6733_v41 = vor.u32 %v9423_v29, %v6730_v30 }
  0xeb   :  { %v9699_v44 = vld [vmem:[#allocation5 + $0xae4] sm:$0xf0]  ;;  %2852 = vmatpush.bf16.msra.mxu0 %v6893_v31  ;;  %v7690_v38 = vld [vmem:[#allocation5 + $0x9e8] sm:$0xf0] }
  0xec   :  { %v7817_v52 = vor.u32 %v9699_v44, %v7816_v43  ;;  %v7528_v55 = vld [vmem:[#allocation5 + $0x888] sm:$0xf]  ;;  %2799 = vmatpush.bf16.msra.mxu1 %v7561_v47  ;;  %v7146_v40 = vld [vmem:[#allocation5 + $0x5a8] sm:$0xf0]  ;;  %v7693_v48 = vor.u32 %v9663_v35, %v7690_v38 }
  0xed   :  { %v9627_v56 = vld [vmem:[#allocation5 + $0x8a4] sm:$0xf0]  ;;  %v9591_v43 = vld [vmem:[#allocation5 + $0x78c] sm:$0xf]  ;;  %v7149_v49 = vor.u32 %v9527_v39, %v7146_v40 }
  0xee   :  { %v7784_v57 = vld [vmem:[#allocation5 + $0xa88] sm:$0xf]  ;;  %2840 = vmatpush.bf16.msrb.mxu2 %v6573_v46  ;;  %v7529_v63 = vor.u32 %v9627_v56, %v7528_v55  ;;  %2813 = vmatpush.bf16.msra.mxu3 %v7817_v52  ;;  %v7402_v44 = vld [vmem:[#allocation5 + $0x7a8] sm:$0xf0] }
  0xef   :  { %v9691_v59 = vld [vmem:[#allocation5 + $0xaa4] sm:$0xf0]  ;;  %2853 = vmatpush.bf16.msra.mxu0 %v6861_v45  ;;  %v6445_v45 = vor.u32 %v9351_v33, %v6442_v34  ;;  %v9415_v46 = vld [vmem:[#allocation5 + $0x20c] sm:$0xf]  ;;  %v7405_v55 = vor.u32 %v9591_v43, %v7402_v44 }
  0xf0   :  { %v7785_v3 = vor.u32 %v9691_v59, %v7784_v57  ;;  %v7496_v5 = vld [vmem:[#allocation5 + $0x848] sm:$0xf]  ;;  %2800 = vmatpush.bf16.msra.mxu1 %v7529_v63  ;;  %8000 = vmatmul.msk.bf16.vlgmr.msrb.gmra.mxu0 %vm2539_vm0, %v10477_v50  ;;  %v6698_v47 = vld [vmem:[#allocation5 + $0x228] sm:$0xf0] }
  0xf1   :  { %v9619_v6 = vld [vmem:[#allocation5 + $0x864] sm:$0xf0]  ;;  %v7946_v52 = vld [vmem:[#allocation5 + $0xbe8] sm:$0xf0] }
  0xf2   :  { %v7752_v7 = vld [vmem:[#allocation5 + $0xa48] sm:$0xf]  ;;  %2841 = vmatpush.bf16.msrb.mxu2 %v6541_v62  ;;  %v7497_v13 = vor.u32 %v9619_v6, %v7496_v5  ;;  %2814 = vmatpush.bf16.msra.mxu3 %v7785_v3  ;;  %v7658_v56 = vld [vmem:[#allocation5 + $0x9a8] sm:$0xf0]  ;;  %v7949_v0 = vor.u32 %v9727_v51, %v7946_v52 }
  0xf3   :  { %v9683_v9 = vld [vmem:[#allocation5 + $0xa64] sm:$0xf0]  ;;  %2854 = vmatpush.bf16.msra.mxu0 %v6829_v61  ;;  %v9519_v57 = vld [vmem:[#allocation5 + $0x54c] sm:$0xf]  ;;  %v6701_v61 = vor.u32 %v9415_v46, %v6698_v47  ;;  %v7661_v1 = vor.u32 %v9655_v53, %v7658_v56 }
  0xf4   :  { %v7753_v17 = vor.u32 %v9683_v9, %v7752_v7  ;;  %v7464_v18 = vld [vmem:[#allocation5 + $0x808] sm:$0xf]  ;;  %2801 = vmatpush.bf16.msra.mxu1 %v7497_v13  ;;  %v7114_v59 = vld [vmem:[#allocation5 + $0x568] sm:$0xf0]  ;;  %v2580_v43 = vpop.f32.mrf.mxu2 }
  0xf5   :  { %v9611_v19 = vld [vmem:[#allocation5 + $0x824] sm:$0xf0]  ;;  %v9583_v62 = vld [vmem:[#allocation5 + $0x74c] sm:$0xf]  ;;  %v7117_v2 = vor.u32 %v9519_v57, %v7114_v59 }
  0xf6   :  { %v7720_v20 = vld [vmem:[#allocation5 + $0xa08] sm:$0xf]  ;;  %2842 = vmatpush.bf16.msrb.mxu2 %v6509_v12  ;;  %v7465_v28 = vor.u32 %v9611_v19, %v7464_v18  ;;  %2815 = vmatpush.bf16.msra.mxu3 %v7753_v17  ;;  %v7370_v63 = vld [vmem:[#allocation5 + $0x768] sm:$0xf0] }
  0xf7   :  { %v9675_v21 = vld [vmem:[#allocation5 + $0xa24] sm:$0xf0]  ;;  %2855 = vmatpush.bf16.msra.mxu0 %v6797_v10  ;;  %v9719_v3 = vld [vmem:[#allocation5 + $0xb8c] sm:$0xf]  ;;  %v7373_v6 = vor.u32 %v9583_v62, %v7370_v63  ;;  %v2594_v51 = vpop.f32.mrf.mxu3 }
  0xf8   :  { %v7721_v31 = vor.u32 %v9675_v21, %v7720_v20  ;;  %2802 = vmatpush.bf16.msra.mxu1 %v7465_v28  ;;  %v9647_v5 = vld [vmem:[#allocation5 + $0x94c] sm:$0xf]  ;;  %v7917_v13 = vor.u32 %v9719_v3, %v7914_v4 }
  0xf9   :  { %v7626_v7 = vld [vmem:[#allocation5 + $0x968] sm:$0xf0] }
  0xfa   :  { %2843 = vmatpush.bf16.msrb.mxu2 %v6477_v27  ;;  %2816 = vmatpush.bf16.msra.mxu3 %v7721_v31  ;;  %v9511_v9 = vld [vmem:[#allocation5 + $0x50c] sm:$0xf]  ;;  %v7629_v14 = vor.u32 %v9647_v5, %v7626_v7 }
  0xfb   :  { %2856 = vmatpush.bf16.msra.mxu0 %v6765_v24  ;;  %2803 = vmatmul.bf16.vlgmr.msra.gmra.mxu1 %v10481_v37  ;;  %v7082_v10 = vld [vmem:[#allocation5 + $0x528] sm:$0xf0] }
  0xfc   :  { %2865 = vmatpush.bf16.msrb.mxu1 %v7181_v32  ;;  %v7338_v12 = vld [vmem:[#allocation5 + $0x728] sm:$0xf0]  ;;  %v7085_v15 = vor.u32 %v9511_v9, %v7082_v10 }
  0xfd   :  { %2817 = vmatmul.bf16.vlgmr.msra.gmra.mxu3 %v10483_v42  ;;  %v9711_v16 = vld [vmem:[#allocation5 + $0xb4c] sm:$0xf]  ;;  %v7341_v19 = vor.u32 %v9575_v11, %v7338_v12  ;;  %v6928_v11 = vld [vmem:[#allocation5 + $0x3d0] sm:$0xf] }
  0xfe   :  { %2879 = vmatpush.bf16.msrb.mxu3 %v7437_v36  ;;  %2844 = vmatpush.bf16.msrb.mxu2 %v6445_v45  ;;  %v7882_v17 = vld [vmem:[#allocation5 + $0xb68] sm:$0xf0]  ;;  %v2566_v36 = vpop.f32.mrf.mxu1  ;;  %v9476_v12 = vld [vmem:[#allocation5 + $0x3ec] sm:$0xf0] }
  0xff   :  { %2857 = vmatpush.bf16.msra.mxu0 %v6733_v41  ;;  %v9639_v18 = vld [vmem:[#allocation5 + $0x90c] sm:$0xf]  ;;  %v7885_v25 = vor.u32 %v9711_v16, %v7882_v17  ;;  %v2567_v40 = vadd.f32 %v2566_v36, %v2552_v26  ;;  %v10507_v16 = vpop.f32.mrf.mxu2  ;;  %v7184_v36 = vld [vmem:[#allocation5 + $0x5d0] sm:$0xf] }
 0x100   :  { %2866 = vmatpush.bf16.msrb.mxu1 %v7149_v49  ;;  %v7594_v20 = vld [vmem:[#allocation5 + $0x928] sm:$0xf0] }
 0x101   :  { %2845 = vmatmul.bf16.vlgmr.msrb.gmra.mxu2 %v10467_v58  ;;  %v9503_v21 = vld [vmem:[#allocation5 + $0x4cc] sm:$0xf]  ;;  %v7597_v27 = vor.u32 %v9639_v18, %v7594_v20  ;;  %v2581_v49 = vadd.f32 %v2580_v43, %v2567_v40  ;;  %v9540_v40 = vld [vmem:[#allocation5 + $0x5ec] sm:$0xf0] }
 0x102   :  { %2893 = vmatpush.bf16.msra.mxu2 %v7693_v48  ;;  %2880 = vmatpush.bf16.msrb.mxu3 %v7405_v55  ;;  %v7050_v22 = vld [vmem:[#allocation5 + $0x4e8] sm:$0xf0]  ;;  %v9604_v43 = vld [vmem:[#allocation5 + $0x7ec] sm:$0xf0] }
 0x103   :  { %2858 = vmatpush.bf16.msra.mxu0 %v6701_v61  ;;  %v9567_v23 = vld [vmem:[#allocation5 + $0x6cc] sm:$0xf]  ;;  %v7053_v28 = vor.u32 %v9503_v21, %v7050_v22  ;;  %v10505_v61 = vadd.f32 %v2594_v51, %v2581_v49  ;;  %v6929_v22 = vor.u32 %v9476_v12, %v6928_v11  ;;  %v6608_v49 = vld [vmem:[#allocation5 + $0x150] sm:$0xf] }
 0x104   :  { %2867 = vmatpush.bf16.msrb.mxu1 %v7117_v2  ;;  %v7306_v24 = vld [vmem:[#allocation5 + $0x6e8] sm:$0xf0]  ;;  %v9396_v51 = vld [vmem:[#allocation5 + $0x16c] sm:$0xf0] }
 0x105   :  { %v9703_v29 = vld [vmem:[#allocation5 + $0xb0c] sm:$0xf]  ;;  %v7309_v32 = vor.u32 %v9567_v23, %v7306_v24  ;;  %v9524_v11 = vld [vmem:[#allocation5 + $0x56c] sm:$0xf0] }
 0x106   :  { %2894 = vmatpush.bf16.msra.mxu2 %v7661_v1  ;;  %2881 = vmatpush.bf16.msrb.mxu3 %v7373_v6  ;;  %v7850_v30 = vld [vmem:[#allocation5 + $0xb28] sm:$0xf0]  ;;  %v7376_v12 = vld [vmem:[#allocation5 + $0x750] sm:$0xf] }
 0x107   :  { %2907 = vmatpush.bf16.msrb.mxu0 %v7949_v0  ;;  %v9631_v31 = vld [vmem:[#allocation5 + $0x8cc] sm:$0xf]  ;;  %v7853_v41 = vor.u32 %v9703_v29, %v7850_v30 }
 0x108   :  { %2859 = vmatmul.bf16.vlgmr.msra.gmra.mxu0 %v10473_v8  ;;  %2868 = vmatpush.bf16.msrb.mxu1 %v7085_v15  ;;  %v7562_v33 = vld [vmem:[#allocation5 + $0x8e8] sm:$0xf0]  ;;  %v9412_v15 = vld [vmem:[#allocation5 + $0x1ec] sm:$0xf0] }
 0x109   :  { %v9495_v34 = vld [vmem:[#allocation5 + $0x48c] sm:$0xf]  ;;  %v7565_v44 = vor.u32 %v9631_v31, %v7562_v33  ;;  %v6640_v31 = vld [vmem:[#allocation5 + $0x190] sm:$0xf] }
 0x10a   :  { %2895 = vmatpush.bf16.msra.mxu2 %v7629_v14  ;;  %2882 = vmatpush.bf16.msrb.mxu3 %v7341_v19  ;;  %v7018_v35 = vld [vmem:[#allocation5 + $0x4a8] sm:$0xf0]  ;;  %v6672_v14 = vld [vmem:[#allocation5 + $0x1d0] sm:$0xf] }
 0x10b   :  { %2908 = vmatpush.bf16.msrb.mxu0 %v7917_v13  ;;  %v9559_v38 = vld [vmem:[#allocation5 + $0x68c] sm:$0xf]  ;;  %v7021_v45 = vor.u32 %v9495_v34, %v7018_v35  ;;  %v6673_v26 = vor.u32 %v9412_v15, %v6672_v14  ;;  %v6800_v15 = vld [vmem:[#allocation5 + $0x2d0] sm:$0xf] }
 0x10c   :  { %v7274_v39 = vld [vmem:[#allocation5 + $0x6a8] sm:$0xf0]  ;;  %2869 = vmatpush.bf16.msrb.mxu1 %v7053_v28 }
 0x10d   :  { %v9695_v46 = vld [vmem:[#allocation5 + $0xacc] sm:$0xf]  ;;  %v7277_v52 = vor.u32 %v9559_v38, %v7274_v39 }
 0x10e   :  { %2896 = vmatpush.bf16.msra.mxu2 %v7597_v27  ;;  %v7818_v47 = vld [vmem:[#allocation5 + $0xae8] sm:$0xf0]  ;;  %2883 = vmatpush.bf16.msrb.mxu3 %v7309_v32  ;;  %v9468_v27 = vld [vmem:[#allocation5 + $0x3ac] sm:$0xf0] }
 0x10f   :  { %2909 = vmatpush.bf16.msrb.mxu0 %v7885_v25  ;;  %v9623_v48 = vld [vmem:[#allocation5 + $0x88c] sm:$0xf]  ;;  %v7821_v62 = vor.u32 %v9695_v46, %v7818_v47  ;;  %v6896_v25 = vld [vmem:[#allocation5 + $0x390] sm:$0xf]  ;;  %v10509_v47 = vpop.f32.mrf.mxu0 }
 0x110   :  { %v7530_v53 = vld [vmem:[#allocation5 + $0x8a8] sm:$0xf0]  ;;  %2870 = vmatpush.bf16.msrb.mxu1 %v7021_v45  ;;  %v9404_v32 = vld [vmem:[#allocation5 + $0x1ac] sm:$0xf0]  ;;  %v6897_v38 = vor.u32 %v9468_v27, %v6896_v25 }
 0x111   :  { %v9487_v55 = vld [vmem:[#allocation5 + $0x44c] sm:$0xf]  ;;  %v7533_v0 = vor.u32 %v9623_v48, %v7530_v53  ;;  %v6864_v45 = vld [vmem:[#allocation5 + $0x350] sm:$0xf]  ;;  %v7185_v53 = vor.u32 %v9540_v40, %v7184_v36 }
 0x112   :  { %v6986_v56 = vld [vmem:[#allocation5 + $0x468] sm:$0xf0]  ;;  %2897 = vmatpush.bf16.msra.mxu2 %v7565_v44  ;;  %2884 = vmatpush.bf16.msrb.mxu3 %v7277_v52  ;;  %v6641_v44 = vor.u32 %v9404_v32, %v6640_v31  ;;  %v9460_v46 = vld [vmem:[#allocation5 + $0x36c] sm:$0xf0]  ;;  %v10512_v52 = vpop.f32.mrf.mxu1 }
 0x113   :  { %v9551_v57 = vld [vmem:[#allocation5 + $0x64c] sm:$0xf]  ;;  %2910 = vmatpush.bf16.msrb.mxu0 %v7853_v41  ;;  %v6989_v1 = vor.u32 %v9487_v55, %v6986_v56  ;;  %v7440_v41 = vld [vmem:[#allocation5 + $0x7d0] sm:$0xf]  ;;  %v2636_v56 = vpop.f32.mrf.mxu2 }
 0x114   :  { %v7242_v59 = vld [vmem:[#allocation5 + $0x668] sm:$0xf0]  ;;  %v7441_v55 = vor.u32 %v9604_v43, %v7440_v41  ;;  %v7088_v25 = vld [vmem:[#allocation5 + $0x510] sm:$0xf] }
 0x115   :  { %v9687_v63 = vld [vmem:[#allocation5 + $0xa8c] sm:$0xf]  ;;  %v7245_v5 = vor.u32 %v9551_v57, %v7242_v59  ;;  %2871 = vmatpush.bf16.msrb.mxu1 %v6989_v1  ;;  %v7152_v57 = vld [vmem:[#allocation5 + $0x590] sm:$0xf]  ;;  %v6865_v59 = vor.u32 %v9460_v46, %v6864_v45  ;;  %v6609_v1 = vor.u32 %v9396_v51, %v6608_v49 }
 0x116   :  { %v7786_v2 = vld [vmem:[#allocation5 + $0xaa8] sm:$0xf0]  ;;  %2898 = vmatpush.bf16.msra.mxu2 %v7533_v0  ;;  %v9596_v0 = vld [vmem:[#allocation5 + $0x7ac] sm:$0xf0] }
 0x117   :  { %v9615_v3 = vld [vmem:[#allocation5 + $0x84c] sm:$0xf]  ;;  %2911 = vmatpush.bf16.msrb.mxu0 %v7821_v62  ;;  %v7789_v13 = vor.u32 %v9687_v63, %v7786_v2  ;;  %2885 = vmatpush.bf16.msrb.mxu3 %v7245_v5  ;;  %v9532_v62 = vld [vmem:[#allocation5 + $0x5ac] sm:$0xf0] }
 0x118   :  { %v7498_v4 = vld [vmem:[#allocation5 + $0x868] sm:$0xf0]  ;;  %v7408_v63 = vld [vmem:[#allocation5 + $0x790] sm:$0xf] }
 0x119   :  { %v9479_v6 = vld [vmem:[#allocation5 + $0x40c] sm:$0xf]  ;;  %v7501_v17 = vor.u32 %v9615_v3, %v7498_v4  ;;  %v6832_v2 = vld [vmem:[#allocation5 + $0x310] sm:$0xf] }
 0x11a   :  { %v6954_v7 = vld [vmem:[#allocation5 + $0x428] sm:$0xf0]  ;;  %v9452_v3 = vld [vmem:[#allocation5 + $0x32c] sm:$0xf0] }
 0x11b   :  { %v9543_v9 = vld [vmem:[#allocation5 + $0x60c] sm:$0xf]  ;;  %v6957_v18 = vor.u32 %v9479_v6, %v6954_v7  ;;  %2912 = vmatpush.bf16.msrb.mxu0 %v7789_v13  ;;  %2899 = vmatpush.bf16.msra.mxu2 %v7501_v17  ;;  %v6576_v4 = vld [vmem:[#allocation5 + $0x110] sm:$0xf]  ;;  %v7153_v6 = vor.u32 %v9532_v62, %v7152_v57  ;;  %v7409_v7 = vor.u32 %v9596_v0, %v7408_v63 }
 0x11c   :  { %v7210_v10 = vld [vmem:[#allocation5 + $0x628] sm:$0xf0]  ;;  %v9388_v5 = vld [vmem:[#allocation5 + $0x12c] sm:$0xf0] }
 0x11d   :  { %v9679_v19 = vld [vmem:[#allocation5 + $0xa4c] sm:$0xf]  ;;  %v7213_v21 = vor.u32 %v9543_v9, %v7210_v10  ;;  %2872 = vmatpush.bf16.msrb.mxu1 %v6957_v18  ;;  %v7120_v9 = vld [vmem:[#allocation5 + $0x550] sm:$0xf]  ;;  %v6833_v10 = vor.u32 %v9452_v3, %v6832_v2  ;;  %v6577_v14 = vor.u32 %v9388_v5, %v6576_v4  ;;  %v2608_v18 = vpop.f32.mrf.mxu0 }
 0x11e   :  { %v7754_v20 = vld [vmem:[#allocation5 + $0xa68] sm:$0xf0]  ;;  %v9588_v13 = vld [vmem:[#allocation5 + $0x76c] sm:$0xf0] }
 0x11f   :  { %v9607_v23 = vld [vmem:[#allocation5 + $0x80c] sm:$0xf]  ;;  %v7757_v30 = vor.u32 %v9679_v19, %v7754_v20  ;;  %2886 = vmatpush.bf16.msrb.mxu3 %v7213_v21  ;;  %v9444_v17 = vld [vmem:[#allocation5 + $0x2ec] sm:$0xf0]  ;;  %v2609_v21 = vadd.f32 %v2608_v18, %v10505_v61 }
 0x120   :  { %v7466_v24 = vld [vmem:[#allocation5 + $0x828] sm:$0xf0]  ;;  %2873 = vmatmul.bf16.vlgmr.msrb.gmra.mxu1 %v10465_v54  ;;  %v6544_v19 = vld [vmem:[#allocation5 + $0xd0] sm:$0xf]  ;;  %v6801_v27 = vor.u32 %v9444_v17, %v6800_v15 }
 0x121   :  { %v9735_v28 = vld [vmem:[#allocation5 + $0xc0c] sm:$0xf]  ;;  %v7469_v33 = vor.u32 %v9607_v23, %v7466_v24  ;;  %2949 = vmatpush.bf16.msra.mxu1 %v6929_v22  ;;  %2913 = vmatpush.bf16.msrb.mxu0 %v7757_v30  ;;  %v9380_v20 = vld [vmem:[#allocation5 + $0xec] sm:$0xf0]  ;;  %v2622_v22 = vpop.f32.mrf.mxu1  ;;  %v7121_v23 = vor.u32 %v9524_v11, %v7120_v9  ;;  %v7377_v24 = vor.u32 %v9588_v13, %v7376_v12 }
 0x122   :  { %v7978_v29 = vld [vmem:[#allocation5 + $0xc28] sm:$0xf0]  ;;  %2887 = vmatmul.bf16.vlgmr.msrb.gmra.mxu3 %v10469_v60  ;;  %v7344_v30 = vld [vmem:[#allocation5 + $0x710] sm:$0xf]  ;;  %v2623_v32 = vadd.f32 %v2622_v22, %v2609_v21 }
 0x123   :  { %v9671_v34 = vld [vmem:[#allocation5 + $0xa0c] sm:$0xf]  ;;  %v7981_v39 = vor.u32 %v9735_v28, %v7978_v29  ;;  %2935 = vmatpush.bf16.msra.mxu3 %v6673_v26  ;;  %2900 = vmatpush.bf16.msra.mxu2 %v7469_v33  ;;  %v10518_v26 = vpop.f32.mrf.mxu3  ;;  %v10520_v28 = vpop.f32.mrf.mxu2  ;;  %v9516_v29 = vld [vmem:[#allocation5 + $0x52c] sm:$0xf0]  ;;  %v6545_v33 = vor.u32 %v9380_v20, %v6544_v19 }
 0x124   :  { %v7722_v35 = vld [vmem:[#allocation5 + $0xa28] sm:$0xf0]  ;;  %v9580_v31 = vld [vmem:[#allocation5 + $0x72c] sm:$0xf0] }
 0x125   :  { %v7725_v48 = vor.u32 %v9671_v34, %v7722_v35  ;;  %2950 = vmatpush.bf16.msra.mxu1 %v6897_v38  ;;  %v6768_v34 = vld [vmem:[#allocation5 + $0x290] sm:$0xf]  ;;  %v10522_v38 = vadd.f32 %v2636_v56, %v2623_v32  ;;  %v7345_v40 = vor.u32 %v9580_v31, %v7344_v30 }
 0x126   :  { %2901 = vmatmul.bf16.vlgmr.msra.gmra.mxu2 %v10481_v37  ;;  %v9436_v35 = vld [vmem:[#allocation5 + $0x2ac] sm:$0xf0] }
 0x127   :  { %2928 = vmatpush.bf16.msrb.mxu2 %v7981_v39  ;;  %2936 = vmatpush.bf16.msra.mxu3 %v6641_v44  ;;  %v6512_v36 = vld [vmem:[#allocation5 + $0x90] sm:$0xf]  ;;  %v7089_v39 = vor.u32 %v9516_v29, %v7088_v25  ;;  %v6769_v43 = vor.u32 %v9436_v35, %v6768_v34 }
 0x128   :  { %2914 = vmatpush.bf16.msrb.mxu0 %v7725_v48  ;;  %v9372_v61 = vld [vmem:[#allocation5 + $0xac] sm:$0xf0] }
 0x129   :  { %2951 = vmatpush.bf16.msra.mxu1 %v6865_v59  ;;  %v7056_v41 = vld [vmem:[#allocation5 + $0x4d0] sm:$0xf]  ;;  %v6513_v48 = vor.u32 %v9372_v61, %v6512_v36 }
 0x12a   :  { %v9508_v44 = vld [vmem:[#allocation5 + $0x4ec] sm:$0xf0] }
 0x12b   :  { %2963 = vmatpush.bf16.msra.mxu2 %v7185_v53  ;;  %2937 = vmatpush.bf16.msra.mxu3 %v6609_v1  ;;  %v7312_v45 = vld [vmem:[#allocation5 + $0x6d0] sm:$0xf]  ;;  %v7057_v56 = vor.u32 %v9508_v44, %v7056_v41  ;;  %v2650_v2 = vpop.f32.mrf.mxu3  ;;  %v2664_v3 = vpop.f32.mrf.mxu2  ;;  %v6674_v41 = vld [vmem:[#allocation5 + $0x1f0] sm:$0xf0] }
 0x12c   :  { %2977 = vmatpush.bf16.msra.mxu0 %v7441_v55  ;;  %v9572_v46 = vld [vmem:[#allocation5 + $0x6ec] sm:$0xf0]  ;;  %v10524_v9 = vadd.f32 %v2664_v3, %v2650_v2  ;;  %v6642_v2 = vld [vmem:[#allocation5 + $0x1b0] sm:$0xf0] }
 0x12d   :  { %2915 = vmatmul.bf16.vlgmr.msrb.gmra.mxu0 %v10483_v42  ;;  %2952 = vmatpush.bf16.msra.mxu1 %v6833_v10  ;;  %v6736_v49 = vld [vmem:[#allocation5 + $0x250] sm:$0xf]  ;;  %v7313_v57 = vor.u32 %v9572_v46, %v7312_v45 }
 0x12e   :  { %v9428_v51 = vld [vmem:[#allocation5 + $0x26c] sm:$0xf0] }
 0x12f   :  { %2964 = vmatpush.bf16.msra.mxu2 %v7153_v6  ;;  %2938 = vmatpush.bf16.msra.mxu3 %v6577_v14  ;;  %v6480_v53 = vld [vmem:[#allocation5 + $0x50] sm:$0xf]  ;;  %v6737_v62 = vor.u32 %v9428_v51, %v6736_v49 }
 0x130   :  { %2978 = vmatpush.bf16.msra.mxu0 %v7409_v7  ;;  %v9364_v55 = vld [vmem:[#allocation5 + $0x6c] sm:$0xf0] }
 0x131   :  { %2953 = vmatpush.bf16.msra.mxu1 %v6801_v27  ;;  %v7024_v59 = vld [vmem:[#allocation5 + $0x490] sm:$0xf]  ;;  %v6481_v4 = vor.u32 %v9364_v55, %v6480_v53 }
 0x132   :  { %v9500_v63 = vld [vmem:[#allocation5 + $0x4ac] sm:$0xf0] }
 0x133   :  { %2965 = vmatpush.bf16.msra.mxu2 %v7121_v23  ;;  %2939 = vmatpush.bf16.msra.mxu3 %v6545_v33  ;;  %v7280_v0 = vld [vmem:[#allocation5 + $0x690] sm:$0xf]  ;;  %v7025_v13 = vor.u32 %v9500_v63, %v7024_v59  ;;  %v6930_v63 = vld [vmem:[#allocation5 + $0x3f0] sm:$0xf0] }
 0x134   :  { %2979 = vmatpush.bf16.msra.mxu0 %v7377_v24  ;;  %v9564_v1 = vld [vmem:[#allocation5 + $0x6ac] sm:$0xf0] }
 0x135   :  { %2954 = vmatpush.bf16.msra.mxu1 %v6769_v43  ;;  %v6448_v5 = vld [vmem:[#allocation5 + $0x10] sm:$0xf]  ;;  %v7281_v14 = vor.u32 %v9564_v1, %v7280_v0  ;;  %v9400_v1 = vld [vmem:[#allocation5 + $0x194] sm:$0xf] }
 0x136   :  { %v6704_v6 = vld [vmem:[#allocation5 + $0x210] sm:$0xf]  ;;  %8001 = vmatmul.msk.bf16.vlgmr.msrb.gmra.mxu2 %vm2539_vm0, %v10477_v50 }
 0x137   :  { %2966 = vmatpush.bf16.msra.mxu2 %v7089_v39  ;;  %2940 = vmatpush.bf16.msra.mxu3 %v6513_v48  ;;  %v9420_v7 = vld [vmem:[#allocation5 + $0x22c] sm:$0xf0]  ;;  %v9408_v39 = vld [vmem:[#allocation5 + $0x1d4] sm:$0xf] }
 0x138   :  { %2980 = vmatpush.bf16.msra.mxu0 %v7345_v40  ;;  %v9356_v10 = vld [vmem:[#allocation5 + $0x2c] sm:$0xf0]  ;;  %v6705_v19 = vor.u32 %v9420_v7, %v6704_v6  ;;  %v10532_v6 = vpop.f32.mrf.mxu1 }
 0x139   :  { %v7952_v11 = vld [vmem:[#allocation5 + $0xbd0] sm:$0xf]  ;;  %2955 = vmatpush.bf16.msra.mxu1 %v6737_v62  ;;  %v6449_v23 = vor.u32 %v9356_v10, %v6448_v5  ;;  %v9472_v62 = vld [vmem:[#allocation5 + $0x3d4] sm:$0xf] }
 0x13a   :  { %v9732_v12 = vld [vmem:[#allocation5 + $0xbec] sm:$0xf0]  ;;  %v6933_v7 = vor.u32 %v9472_v62, %v6930_v63 }
 0x13b   :  { %2967 = vmatpush.bf16.msra.mxu2 %v7057_v56  ;;  %v7696_v15 = vld [vmem:[#allocation5 + $0x9d0] sm:$0xf]  ;;  %2941 = vmatpush.bf16.msra.mxu3 %v6481_v4  ;;  %v7953_v24 = vor.u32 %v9732_v12, %v7952_v11  ;;  %v10528_v56 = vpop.f32.mrf.mxu0  ;;  %v6645_v12 = vor.u32 %v9400_v1, %v6642_v2 }
 0x13c   :  { %2981 = vmatpush.bf16.msra.mxu0 %v7313_v57  ;;  %v9668_v17 = vld [vmem:[#allocation5 + $0x9ec] sm:$0xf0]  ;;  %v6677_v57 = vor.u32 %v9408_v39, %v6674_v41 }
 0x13d   :  { %v6992_v18 = vld [vmem:[#allocation5 + $0x450] sm:$0xf]  ;;  %v7697_v25 = vor.u32 %v9668_v17, %v7696_v15  ;;  %2956 = vmatpush.bf16.msra.mxu1 %v6705_v19  ;;  %v10534_v15 = vpop.f32.mrf.mxu3  ;;  %v6610_v19 = vld [vmem:[#allocation5 + $0x170] sm:$0xf0] }
 0x13e   :  { %v9492_v20 = vld [vmem:[#allocation5 + $0x46c] sm:$0xf0] }
 0x13f   :  { %v7248_v21 = vld [vmem:[#allocation5 + $0x650] sm:$0xf]  ;;  %2968 = vmatpush.bf16.msra.mxu2 %v7025_v13  ;;  %v6993_v31 = vor.u32 %v9492_v20, %v6992_v18  ;;  %2942 = vmatpush.bf16.msra.mxu3 %v6449_v23  ;;  %v9464_v13 = vld [vmem:[#allocation5 + $0x394] sm:$0xf] }
 0x140   :  { %v9556_v22 = vld [vmem:[#allocation5 + $0x66c] sm:$0xf0]  ;;  %2982 = vmatpush.bf16.msra.mxu0 %v7281_v14  ;;  %2957 = vmatmul.bf16.vlgmr.msra.gmra.mxu1 %v10473_v8  ;;  %v6898_v14 = vld [vmem:[#allocation5 + $0x3b0] sm:$0xf0]  ;;  %v2692_v41 = vpop.f32.mrf.mxu1 }
 0x141   :  { %v7664_v27 = vld [vmem:[#allocation5 + $0x990] sm:$0xf]  ;;  %v7249_v32 = vor.u32 %v9556_v22, %v7248_v21  ;;  %3005 = vmatpush.bf16.msrb.mxu1 %v7953_v24  ;;  %v9392_v18 = vld [vmem:[#allocation5 + $0x154] sm:$0xf]  ;;  %v6901_v23 = vor.u32 %v9464_v13, %v6898_v14 }
 0x142   :  { %v7920_v29 = vld [vmem:[#allocation5 + $0xb90] sm:$0xf]  ;;  %2943 = vmatmul.bf16.vlgmr.msra.gmra.mxu3 %v10467_v58  ;;  %v6514_v13 = vld [vmem:[#allocation5 + $0xb0] sm:$0xf0] }
 0x143   :  { %v9724_v30 = vld [vmem:[#allocation5 + $0xbac] sm:$0xf0]  ;;  %2991 = vmatpush.bf16.msrb.mxu3 %v7697_v25  ;;  %2969 = vmatpush.bf16.msra.mxu2 %v6993_v31  ;;  %v9456_v31 = vld [vmem:[#allocation5 + $0x354] sm:$0xf] }
 0x144   :  { %v9660_v33 = vld [vmem:[#allocation5 + $0x9ac] sm:$0xf0]  ;;  %v7921_v40 = vor.u32 %v9724_v30, %v7920_v29  ;;  %2983 = vmatpush.bf16.msra.mxu0 %v7249_v32  ;;  %v10538_v29 = vpop.f32.mrf.mxu2  ;;  %v6613_v30 = vor.u32 %v9392_v18, %v6610_v19  ;;  %v6866_v32 = vld [vmem:[#allocation5 + $0x370] sm:$0xf0] }
 0x145   :  { %v6960_v34 = vld [vmem:[#allocation5 + $0x410] sm:$0xf]  ;;  %v7665_v45 = vor.u32 %v9660_v33, %v7664_v27  ;;  %v2678_v27 = vpop.f32.mrf.mxu0  ;;  %v2706_v63 = vpop.f32.mrf.mxu3 }
 0x146   :  { %v9484_v35 = vld [vmem:[#allocation5 + $0x42c] sm:$0xf0]  ;;  %3006 = vmatpush.bf16.msrb.mxu1 %v7921_v40  ;;  %v2679_v33 = vadd.f32 %v2678_v27, %v10524_v9  ;;  %v7442_v27 = vld [vmem:[#allocation5 + $0x7f0] sm:$0xf0] }
 0x147   :  { %v7216_v36 = vld [vmem:[#allocation5 + $0x610] sm:$0xf]  ;;  %v6961_v49 = vor.u32 %v9484_v35, %v6960_v34  ;;  %2992 = vmatpush.bf16.msrb.mxu3 %v7665_v45  ;;  %v9384_v35 = vld [vmem:[#allocation5 + $0x114] sm:$0xf] }
 0x148   :  { %v9548_v61 = vld [vmem:[#allocation5 + $0x62c] sm:$0xf0] }
 0x149   :  { %v7984_v43 = vld [vmem:[#allocation5 + $0xc10] sm:$0xf]  ;;  %v7217_v51 = vor.u32 %v9548_v61, %v7216_v36  ;;  %2970 = vmatpush.bf16.msra.mxu2 %v6961_v49  ;;  %v6578_v36 = vld [vmem:[#allocation5 + $0x130] sm:$0xf0] }
 0x14a   :  { %v9740_v44 = vld [vmem:[#allocation5 + $0xc2c] sm:$0xf0]  ;;  %v9448_v49 = vld [vmem:[#allocation5 + $0x314] sm:$0xf] }
 0x14b   :  { %v7888_v46 = vld [vmem:[#allocation5 + $0xb50] sm:$0xf]  ;;  %v7985_v59 = vor.u32 %v9740_v44, %v7984_v43  ;;  %2984 = vmatpush.bf16.msra.mxu0 %v7217_v51  ;;  %v6869_v43 = vor.u32 %v9456_v31, %v6866_v32  ;;  %v6834_v51 = vld [vmem:[#allocation5 + $0x330] sm:$0xf0] }
 0x14c   :  { %v9716_v48 = vld [vmem:[#allocation5 + $0xb6c] sm:$0xf0]  ;;  %2971 = vmatmul.bf16.vlgmr.msra.gmra.mxu2 %v10465_v54  ;;  %v6770_v31 = vld [vmem:[#allocation5 + $0x2b0] sm:$0xf0] }
 0x14d   :  { %v7632_v53 = vld [vmem:[#allocation5 + $0x950] sm:$0xf]  ;;  %v7889_v0 = vor.u32 %v9716_v48, %v7888_v46  ;;  %3026 = vmatpush.bf16.msrb.mxu2 %v7985_v59  ;;  %v2693_v46 = vadd.f32 %v2692_v41, %v2679_v33  ;;  %v6581_v48 = vor.u32 %v9384_v35, %v6578_v36  ;;  %v9536_v32 = vld [vmem:[#allocation5 + $0x5d4] sm:$0xf] }
 0x14e   :  { %v9652_v55 = vld [vmem:[#allocation5 + $0x96c] sm:$0xf0]  ;;  %2985 = vmatmul.bf16.vlgmr.msra.gmra.mxu0 %v10469_v60  ;;  %v7186_v33 = vld [vmem:[#allocation5 + $0x5f0] sm:$0xf0] }
 0x14f   :  { %v7633_v3 = vor.u32 %v9652_v55, %v7632_v53  ;;  %v7856_v4 = vld [vmem:[#allocation5 + $0xb10] sm:$0xf]  ;;  %3033 = vmatpush.bf16.msrb.mxu0 %v6677_v57  ;;  %3007 = vmatpush.bf16.msrb.mxu1 %v7889_v0  ;;  %v9376_v53 = vld [vmem:[#allocation5 + $0xd4] sm:$0xf]  ;;  %v6837_v0 = vor.u32 %v9448_v49, %v6834_v51  ;;  %v7189_v41 = vor.u32 %v9536_v32, %v7186_v33 }
 0x150   :  { %v9708_v5 = vld [vmem:[#allocation5 + $0xb2c] sm:$0xf0]  ;;  %v6546_v55 = vld [vmem:[#allocation5 + $0xf0] sm:$0xf0] }
 0x151   :  { %v7600_v10 = vld [vmem:[#allocation5 + $0x910] sm:$0xf]  ;;  %v7857_v17 = vor.u32 %v9708_v5, %v7856_v4  ;;  %2993 = vmatpush.bf16.msrb.mxu3 %v7633_v3  ;;  %3047 = vmatpush.bf16.msra.mxu2 %v6933_v7  ;;  %v2707_v3 = vadd.f32 %v2706_v63, %v2693_v46  ;;  %v10541_v4 = vpop.f32.mrf.mxu0  ;;  %v6549_v5 = vor.u32 %v9376_v53, %v6546_v55  ;;  %v9440_v7 = vld [vmem:[#allocation5 + $0x2d4] sm:$0xf] }
 0x152   :  { %v9644_v11 = vld [vmem:[#allocation5 + $0x92c] sm:$0xf0]  ;;  %v9360_v35 = vld [vmem:[#allocation5 + $0x54] sm:$0xf] }
 0x153   :  { %v7601_v20 = vor.u32 %v9644_v11, %v7600_v10  ;;  %v7824_v21 = vld [vmem:[#allocation5 + $0xad0] sm:$0xf]  ;;  %3034 = vmatpush.bf16.msrb.mxu0 %v6645_v12  ;;  %3008 = vmatpush.bf16.msrb.mxu1 %v7857_v17  ;;  %v6802_v10 = vld [vmem:[#allocation5 + $0x2f0] sm:$0xf0]  ;;  %v2720_v17 = vpop.f32.mrf.mxu2 }
 0x154   :  { %v9700_v22 = vld [vmem:[#allocation5 + $0xaec] sm:$0xf0]  ;;  %v9368_v12 = vld [vmem:[#allocation5 + $0x94] sm:$0xf] }
 0x155   :  { %v7568_v24 = vld [vmem:[#allocation5 + $0x8d0] sm:$0xf]  ;;  %v7825_v34 = vor.u32 %v9700_v22, %v7824_v21  ;;  %2994 = vmatpush.bf16.msrb.mxu3 %v7601_v20  ;;  %3048 = vmatpush.bf16.msra.mxu2 %v6901_v23  ;;  %v2721_v22 = vadd.f32 %v2720_v17, %v2707_v3  ;;  %v6805_v23 = vor.u32 %v9440_v7, %v6802_v10  ;;  %v6482_v36 = vld [vmem:[#allocation5 + $0x70] sm:$0xf0] }
 0x156   :  { %v9636_v25 = vld [vmem:[#allocation5 + $0x8ec] sm:$0xf0]  ;;  %v6738_v49 = vld [vmem:[#allocation5 + $0x270] sm:$0xf0] }
 0x157   :  { %v7569_v61 = vor.u32 %v9636_v25, %v7568_v24  ;;  %v7792_v39 = vld [vmem:[#allocation5 + $0xa90] sm:$0xf]  ;;  %3035 = vmatpush.bf16.msrb.mxu0 %v6613_v30  ;;  %3009 = vmatpush.bf16.msrb.mxu1 %v7825_v34  ;;  %v9432_v24 = vld [vmem:[#allocation5 + $0x294] sm:$0xf]  ;;  %v6517_v30 = vor.u32 %v9368_v12, %v6514_v13 }
 0x158   :  { %v9692_v40 = vld [vmem:[#allocation5 + $0xaac] sm:$0xf0]  ;;  %v9600_v25 = vld [vmem:[#allocation5 + $0x7d4] sm:$0xf] }
 0x159   :  { %v7536_v44 = vld [vmem:[#allocation5 + $0x890] sm:$0xf]  ;;  %v7793_v9 = vor.u32 %v9692_v40, %v7792_v39  ;;  %2995 = vmatpush.bf16.msrb.mxu3 %v7569_v61  ;;  %3049 = vmatpush.bf16.msra.mxu2 %v6869_v43  ;;  %v7445_v39 = vor.u32 %v9600_v25, %v7442_v27  ;;  %v6773_v40 = vor.u32 %v9432_v24, %v6770_v31  ;;  %v9424_v43 = vld [vmem:[#allocation5 + $0x254] sm:$0xf]  ;;  %v2734_v46 = vpop.f32.mrf.mxu0 }
 0x15a   :  { %v9628_v45 = vld [vmem:[#allocation5 + $0x8ac] sm:$0xf0]  ;;  %v9528_v51 = vld [vmem:[#allocation5 + $0x594] sm:$0xf]  ;;  %v2735_v53 = vadd.f32 %v2734_v46, %v2721_v22 }
 0x15b   :  { %v7537_v57 = vor.u32 %v9628_v45, %v7536_v44  ;;  %v7760_v59 = vld [vmem:[#allocation5 + $0xa50] sm:$0xf]  ;;  %3036 = vmatpush.bf16.msrb.mxu0 %v6581_v48  ;;  %3010 = vmatpush.bf16.msrb.mxu1 %v7793_v9  ;;  %v9592_v44 = vld [vmem:[#allocation5 + $0x794] sm:$0xf]  ;;  %v6485_v48 = vor.u32 %v9360_v35, %v6482_v36 }
 0x15c   :  { %v9684_v62 = vld [vmem:[#allocation5 + $0xa6c] sm:$0xf0]  ;;  %8002 = vmatmul.msk.bf16.vlgmr.msrb.gmra.mxu2 %vm2539_vm0, %v10477_v50  ;;  %v7410_v45 = vld [vmem:[#allocation5 + $0x7b0] sm:$0xf0] }
 0x15d   :  { %v7504_v1 = vld [vmem:[#allocation5 + $0x850] sm:$0xf]  ;;  %v7761_v11 = vor.u32 %v9684_v62, %v7760_v59  ;;  %2996 = vmatpush.bf16.msrb.mxu3 %v7537_v57  ;;  %3050 = vmatpush.bf16.msra.mxu2 %v6837_v0  ;;  %v7154_v9 = vld [vmem:[#allocation5 + $0x5b0] sm:$0xf0]  ;;  %v7413_v59 = vor.u32 %v9592_v44, %v7410_v45  ;;  %v10546_v0 = vpack.c.bf16 %v2735_v53, %v10522_v38 }
 0x15e   :  { %v9620_v2 = vld [vmem:[#allocation5 + $0x86c] sm:$0xf0]  ;;  %v9352_v55 = vld [vmem:[#allocation5 + $0x14] sm:$0xf] }
 0x15f   :  { %v7472_v14 = vld [vmem:[#allocation5 + $0x810] sm:$0xf]  ;;  %v7505_v18 = vor.u32 %v9620_v2, %v7504_v1  ;;  %3037 = vmatpush.bf16.msrb.mxu0 %v6549_v5  ;;  %3011 = vmatpush.bf16.msrb.mxu1 %v7761_v11  ;;  %v6450_v57 = vld [vmem:[#allocation5 + $0x30] sm:$0xf0]  ;;  %v6741_v1 = vor.u32 %v9424_v43, %v6738_v49  ;;  %v7157_v2 = vor.u32 %v9528_v51, %v7154_v9 }
 0x160   :  { %v9612_v19 = vld [vmem:[#allocation5 + $0x82c] sm:$0xf0]  ;;  %v9664_v62 = vld [vmem:[#allocation5 + $0x9d4] sm:$0xf]  ;;  %v6453_v10 = vor.u32 %v9352_v55, %v6450_v57 }
 0x161   :  { %v7728_v20 = vld [vmem:[#allocation5 + $0xa10] sm:$0xf]  ;;  %2997 = vmatpush.bf16.msrb.mxu3 %v7505_v18  ;;  %v7473_v61 = vor.u32 %v9612_v19, %v7472_v14  ;;  %3051 = vmatpush.bf16.msra.mxu2 %v6805_v23  ;;  %v7698_v63 = vld [vmem:[#allocation5 + $0x9f0] sm:$0xf0] }
 0x162   :  { %v9676_v21 = vld [vmem:[#allocation5 + $0xa2c] sm:$0xf0]  ;;  %v9416_v3 = vld [vmem:[#allocation5 + $0x214] sm:$0xf]  ;;  %v7701_v14 = vor.u32 %v9664_v62, %v7698_v63 }
 0x163   :  { %v7729_v34 = vor.u32 %v9676_v21, %v7728_v20  ;;  %3038 = vmatpush.bf16.msrb.mxu0 %v6517_v30  ;;  %v9584_v5 = vld [vmem:[#allocation5 + $0x754] sm:$0xf] }
 0x164   :  { %v7378_v7 = vld [vmem:[#allocation5 + $0x770] sm:$0xf0] }
 0x165   :  { %3012 = vmatpush.bf16.msrb.mxu1 %v7729_v34  ;;  %2998 = vmatpush.bf16.msrb.mxu3 %v7473_v61  ;;  %v6706_v11 = vld [vmem:[#allocation5 + $0x230] sm:$0xf0]  ;;  %v7381_v18 = vor.u32 %v9584_v5, %v7378_v7 }
 0x166   :  { %3052 = vmatpush.bf16.msra.mxu2 %v6773_v40  ;;  %v9520_v12 = vld [vmem:[#allocation5 + $0x554] sm:$0xf]  ;;  %v6709_v21 = vor.u32 %v9416_v3, %v6706_v11 }
 0x167   :  { %3039 = vmatpush.bf16.msrb.mxu0 %v6485_v48  ;;  %v7122_v13 = vld [vmem:[#allocation5 + $0x570] sm:$0xf0] }
 0x168   :  { %3013 = vmatmul.bf16.vlgmr.msrb.gmra.mxu1 %v10483_v42  ;;  %2999 = vmatmul.bf16.vlgmr.msrb.gmra.mxu3 %v10481_v37  ;;  %v9728_v17 = vld [vmem:[#allocation5 + $0xbd4] sm:$0xf]  ;;  %v7125_v22 = vor.u32 %v9520_v12, %v7122_v13 }
 0x169   :  { %3075 = vmatpush.bf16.msra.mxu1 %v7445_v39  ;;  %3061 = vmatpush.bf16.msra.mxu3 %v7189_v41  ;;  %v7954_v38 = vld [vmem:[#allocation5 + $0xbf0] sm:$0xf0] }
 0x16a   :  { %v9656_v19 = vld [vmem:[#allocation5 + $0x994] sm:$0xf]  ;;  %3053 = vmatpush.bf16.msra.mxu2 %v6741_v1  ;;  %v7957_v25 = vor.u32 %v9728_v17, %v7954_v38 }
 0x16b   :  { %v7666_v20 = vld [vmem:[#allocation5 + $0x9b0] sm:$0xf0]  ;;  %3040 = vmatpush.bf16.msrb.mxu0 %v6453_v10 }
 0x16c   :  { %v9576_v23 = vld [vmem:[#allocation5 + $0x714] sm:$0xf]  ;;  %v7669_v31 = vor.u32 %v9656_v19, %v7666_v20 }
 0x16d   :  { %3076 = vmatpush.bf16.msra.mxu1 %v7413_v59  ;;  %3062 = vmatpush.bf16.msra.mxu3 %v7157_v2  ;;  %v7346_v24 = vld [vmem:[#allocation5 + $0x730] sm:$0xf0] }
 0x16e   :  { %v9512_v27 = vld [vmem:[#allocation5 + $0x514] sm:$0xf]  ;;  %v7349_v34 = vor.u32 %v9576_v23, %v7346_v24  ;;  %3054 = vmatpush.bf16.msra.mxu2 %v6709_v21  ;;  %3041 = vmatmul.bf16.vlgmr.msrb.gmra.mxu0 %v10467_v58 }
 0x16f   :  { %v7090_v30 = vld [vmem:[#allocation5 + $0x530] sm:$0xf0]  ;;  %3089 = vmatpush.bf16.msra.mxu0 %v7701_v14 }
 0x170   :  { %v9720_v32 = vld [vmem:[#allocation5 + $0xb94] sm:$0xf]  ;;  %v7093_v61 = vor.u32 %v9512_v27, %v7090_v30 }
 0x171   :  { %v7922_v33 = vld [vmem:[#allocation5 + $0xbb0] sm:$0xf0]  ;;  %3077 = vmatpush.bf16.msra.mxu1 %v7381_v18  ;;  %3063 = vmatpush.bf16.msra.mxu3 %v7125_v22 }
 0x172   :  { %v9648_v35 = vld [vmem:[#allocation5 + $0x954] sm:$0xf]  ;;  %3103 = vmatpush.bf16.msrb.mxu2 %v7957_v25  ;;  %v7925_v41 = vor.u32 %v9720_v32, %v7922_v33 }
 0x173   :  { %v7634_v36 = vld [vmem:[#allocation5 + $0x970] sm:$0xf0]  ;;  %3090 = vmatpush.bf16.msra.mxu0 %v7669_v31  ;;  %3055 = vmatmul.bf16.vlgmr.msra.gmra.mxu2 %v10473_v8 }
 0x174   :  { %v9568_v39 = vld [vmem:[#allocation5 + $0x6d4] sm:$0xf]  ;;  %v7637_v45 = vor.u32 %v9648_v35, %v7634_v36  ;;  %v9413_v35 = vld [vmem:[#allocation5 + $0x1f4] sm:$0xf0] }
 0x175   :  { %v7314_v40 = vld [vmem:[#allocation5 + $0x6f0] sm:$0xf0]  ;;  %3078 = vmatpush.bf16.msra.mxu1 %v7349_v34  ;;  %3064 = vmatpush.bf16.msra.mxu3 %v7093_v61  ;;  %v6680_v34 = vld [vmem:[#allocation5 + $0x1d8] sm:$0xf] }
 0x176   :  { %v9504_v43 = vld [vmem:[#allocation5 + $0x4d4] sm:$0xf]  ;;  %v7317_v49 = vor.u32 %v9568_v39, %v7314_v40  ;;  %3104 = vmatpush.bf16.msrb.mxu2 %v7925_v41 }
 0x177   :  { %v7058_v44 = vld [vmem:[#allocation5 + $0x4f0] sm:$0xf0]  ;;  %3091 = vmatpush.bf16.msra.mxu0 %v7637_v45 }
 0x178   :  { %v9712_v46 = vld [vmem:[#allocation5 + $0xb54] sm:$0xf]  ;;  %v7061_v53 = vor.u32 %v9504_v43, %v7058_v44 }
 0x179   :  { %v7890_v48 = vld [vmem:[#allocation5 + $0xb70] sm:$0xf0]  ;;  %3079 = vmatpush.bf16.msra.mxu1 %v7317_v49 }
 0x17a   :  { %v9640_v51 = vld [vmem:[#allocation5 + $0x914] sm:$0xf]  ;;  %v7893_v59 = vor.u32 %v9712_v46, %v7890_v48  ;;  %3065 = vmatpush.bf16.msra.mxu3 %v7061_v53  ;;  %v6681_v46 = vor.u32 %v9413_v35, %v6680_v34  ;;  %v6936_v48 = vld [vmem:[#allocation5 + $0x3d8] sm:$0xf] }
 0x17b   :  { %v7602_v9 = vld [vmem:[#allocation5 + $0x930] sm:$0xf0]  ;;  %v6648_v53 = vld [vmem:[#allocation5 + $0x198] sm:$0xf] }
 0x17c   :  { %v9560_v55 = vld [vmem:[#allocation5 + $0x694] sm:$0xf]  ;;  %v7605_v1 = vor.u32 %v9640_v51, %v7602_v9  ;;  %3105 = vmatpush.bf16.msrb.mxu2 %v7893_v59  ;;  %v9477_v9 = vld [vmem:[#allocation5 + $0x3f4] sm:$0xf0] }
 0x17d   :  { %v7282_v57 = vld [vmem:[#allocation5 + $0x6b0] sm:$0xf0]  ;;  %v6584_v35 = vld [vmem:[#allocation5 + $0x118] sm:$0xf] }
 0x17e   :  { %v9496_v62 = vld [vmem:[#allocation5 + $0x494] sm:$0xf]  ;;  %v7285_v5 = vor.u32 %v9560_v55, %v7282_v57  ;;  %3092 = vmatpush.bf16.msra.mxu0 %v7605_v1  ;;  %v9405_v55 = vld [vmem:[#allocation5 + $0x1b4] sm:$0xf0] }
 0x17f   :  { %v7026_v63 = vld [vmem:[#allocation5 + $0x4b0] sm:$0xf0] }
 0x180   :  { %v9704_v2 = vld [vmem:[#allocation5 + $0xb14] sm:$0xf]  ;;  %v7029_v11 = vor.u32 %v9496_v62, %v7026_v63  ;;  %3080 = vmatpush.bf16.msra.mxu1 %v7285_v5  ;;  %v7192_v5 = vld [vmem:[#allocation5 + $0x5d8] sm:$0xf] }
 0x181   :  { %v7858_v3 = vld [vmem:[#allocation5 + $0xb30] sm:$0xf0] }
 0x182   :  { %v9632_v7 = vld [vmem:[#allocation5 + $0x8d4] sm:$0xf]  ;;  %v7861_v14 = vor.u32 %v9704_v2, %v7858_v3  ;;  %3066 = vmatpush.bf16.msra.mxu3 %v7029_v11  ;;  %v6937_v2 = vor.u32 %v9477_v9, %v6936_v48  ;;  %v6649_v3 = vor.u32 %v9405_v55, %v6648_v53  ;;  %v9453_v48 = vld [vmem:[#allocation5 + $0x334] sm:$0xf0] }
 0x183   :  { %v7570_v10 = vld [vmem:[#allocation5 + $0x8f0] sm:$0xf0]  ;;  %v9381_v9 = vld [vmem:[#allocation5 + $0xf4] sm:$0xf0] }
 0x184   :  { %v9552_v12 = vld [vmem:[#allocation5 + $0x654] sm:$0xf]  ;;  %v7573_v18 = vor.u32 %v9632_v7, %v7570_v10  ;;  %3106 = vmatpush.bf16.msrb.mxu2 %v7861_v14  ;;  %v9541_v7 = vld [vmem:[#allocation5 + $0x5f4] sm:$0xf0] }
 0x185   :  { %v7250_v13 = vld [vmem:[#allocation5 + $0x670] sm:$0xf0]  ;;  %v6904_v10 = vld [vmem:[#allocation5 + $0x398] sm:$0xf] }
 0x186   :  { %v9488_v17 = vld [vmem:[#allocation5 + $0x454] sm:$0xf]  ;;  %v7253_v21 = vor.u32 %v9552_v12, %v7250_v13  ;;  %3093 = vmatpush.bf16.msra.mxu0 %v7573_v18  ;;  %v9469_v12 = vld [vmem:[#allocation5 + $0x3b4] sm:$0xf0] }
 0x187   :  { %v6994_v38 = vld [vmem:[#allocation5 + $0x470] sm:$0xf0]  ;;  %v6616_v13 = vld [vmem:[#allocation5 + $0x158] sm:$0xf] }
 0x188   :  { %v9696_v19 = vld [vmem:[#allocation5 + $0xad4] sm:$0xf]  ;;  %v6997_v25 = vor.u32 %v9488_v17, %v6994_v38  ;;  %3081 = vmatpush.bf16.msra.mxu1 %v7253_v21  ;;  %v9397_v14 = vld [vmem:[#allocation5 + $0x174] sm:$0xf0] }
 0x189   :  { %v7826_v20 = vld [vmem:[#allocation5 + $0xaf0] sm:$0xf0]  ;;  %v9605_v21 = vld [vmem:[#allocation5 + $0x7f4] sm:$0xf0] }
 0x18a   :  { %v9624_v22 = vld [vmem:[#allocation5 + $0x894] sm:$0xf]  ;;  %v7829_v32 = vor.u32 %v9696_v19, %v7826_v20  ;;  %3067 = vmatpush.bf16.msra.mxu3 %v6997_v25  ;;  %v7193_v19 = vor.u32 %v9541_v7, %v7192_v5  ;;  %v7448_v20 = vld [vmem:[#allocation5 + $0x7d8] sm:$0xf] }
 0x18b   :  { %v7538_v23 = vld [vmem:[#allocation5 + $0x8b0] sm:$0xf0]  ;;  %v9533_v25 = vld [vmem:[#allocation5 + $0x5b4] sm:$0xf0]  ;;  %v7449_v34 = vor.u32 %v9605_v21, %v7448_v20 }
 0x18c   :  { %v9480_v24 = vld [vmem:[#allocation5 + $0x414] sm:$0xf]  ;;  %v7541_v36 = vor.u32 %v9624_v22, %v7538_v23  ;;  %3107 = vmatpush.bf16.msrb.mxu2 %v7829_v32  ;;  %v6905_v22 = vor.u32 %v9469_v12, %v6904_v10  ;;  %v6617_v23 = vor.u32 %v9397_v14, %v6616_v13  ;;  %v10554_v32 = vpop.f32.mrf.mxu2  ;;  %v7384_v55 = vld [vmem:[#allocation5 + $0x758] sm:$0xf] }
 0x18d   :  { %v6962_v27 = vld [vmem:[#allocation5 + $0x430] sm:$0xf0]  ;;  %v6520_v10 = vld [vmem:[#allocation5 + $0x98] sm:$0xf] }
 0x18e   :  { %v9544_v30 = vld [vmem:[#allocation5 + $0x614] sm:$0xf]  ;;  %v6965_v45 = vor.u32 %v9480_v24, %v6962_v27  ;;  %3094 = vmatpush.bf16.msra.mxu0 %v7541_v36  ;;  %v7160_v24 = vld [vmem:[#allocation5 + $0x598] sm:$0xf] }
 0x18f   :  { %v7218_v31 = vld [vmem:[#allocation5 + $0x630] sm:$0xf0]  ;;  %v9389_v36 = vld [vmem:[#allocation5 + $0x134] sm:$0xf0] }
 0x190   :  { %v9688_v33 = vld [vmem:[#allocation5 + $0xa94] sm:$0xf]  ;;  %v7221_v41 = vor.u32 %v9544_v30, %v7218_v31  ;;  %3068 = vmatpush.bf16.msra.mxu3 %v6965_v45  ;;  %v6872_v30 = vld [vmem:[#allocation5 + $0x358] sm:$0xf]  ;;  %v6585_v45 = vor.u32 %v9389_v36, %v6584_v35  ;;  %v10568_v35 = vpop.f32.mrf.mxu3 }
 0x191   :  { %v7794_v61 = vld [vmem:[#allocation5 + $0xab0] sm:$0xf0]  ;;  %v9461_v31 = vld [vmem:[#allocation5 + $0x374] sm:$0xf0] }
 0x192   :  { %v9736_v39 = vld [vmem:[#allocation5 + $0xc14] sm:$0xf]  ;;  %v7797_v49 = vor.u32 %v9688_v33, %v7794_v61  ;;  %3082 = vmatpush.bf16.msra.mxu1 %v7221_v41  ;;  %v10556_v33 = vpop.f32.mrf.mxu0  ;;  %v7161_v61 = vor.u32 %v9533_v25, %v7160_v24  ;;  %v6873_v41 = vor.u32 %v9461_v31, %v6872_v30  ;;  %v7352_v13 = vld [vmem:[#allocation5 + $0x718] sm:$0xf] }
 0x193   :  { %v7986_v40 = vld [vmem:[#allocation5 + $0xc30] sm:$0xf0]  ;;  %3069 = vmatmul.bf16.vlgmr.msra.gmra.mxu3 %v10465_v54  ;;  %v9581_v14 = vld [vmem:[#allocation5 + $0x734] sm:$0xf0] }
 0x194   :  { %v9616_v43 = vld [vmem:[#allocation5 + $0x854] sm:$0xf]  ;;  %v7989_v51 = vor.u32 %v9736_v39, %v7986_v40  ;;  %3108 = vmatpush.bf16.msrb.mxu2 %v7797_v49  ;;  %v7416_v39 = vld [vmem:[#allocation5 + $0x798] sm:$0xf]  ;;  %v10560_v5 = vpop.f32.mrf.mxu2  ;;  %v7353_v24 = vor.u32 %v9581_v14, %v7352_v13 }
 0x195   :  { %v7506_v44 = vld [vmem:[#allocation5 + $0x870] sm:$0xf0]  ;;  %3083 = vmatmul.bf16.vlgmr.msra.gmra.mxu1 %v10469_v60  ;;  %v9597_v40 = vld [vmem:[#allocation5 + $0x7b4] sm:$0xf0] }
 0x196   :  { %v7509_v57 = vor.u32 %v9616_v43, %v7506_v44  ;;  %v9680_v59 = vld [vmem:[#allocation5 + $0xa54] sm:$0xf]  ;;  %3131 = vmatpush.bf16.msrb.mxu1 %v6681_v46  ;;  %3124 = vmatpush.bf16.msrb.mxu3 %v7989_v51  ;;  %v7128_v43 = vld [vmem:[#allocation5 + $0x558] sm:$0xf]  ;;  %v7417_v49 = vor.u32 %v9597_v40, %v7416_v39 }
 0x197   :  { %v7762_v62 = vld [vmem:[#allocation5 + $0xa70] sm:$0xf0]  ;;  %v9525_v44 = vld [vmem:[#allocation5 + $0x574] sm:$0xf0] }
 0x198   :  { %v9608_v63 = vld [vmem:[#allocation5 + $0x814] sm:$0xf]  ;;  %v7765_v11 = vor.u32 %v9680_v59, %v7762_v62  ;;  %3095 = vmatpush.bf16.msra.mxu0 %v7509_v57  ;;  %v6840_v46 = vld [vmem:[#allocation5 + $0x318] sm:$0xf]  ;;  %v7129_v53 = vor.u32 %v9525_v44, %v7128_v43 }
 0x199   :  { %v7474_v1 = vld [vmem:[#allocation5 + $0x830] sm:$0xf0]  ;;  %v6552_v51 = vld [vmem:[#allocation5 + $0xd8] sm:$0xf]  ;;  %v6841_v59 = vor.u32 %v9453_v48, %v6840_v46 }
 0x19a   :  { %v7477_v17 = vor.u32 %v9608_v63, %v7474_v1  ;;  %v9672_v38 = vld [vmem:[#allocation5 + $0xa14] sm:$0xf]  ;;  %3145 = vmatpush.bf16.msra.mxu3 %v6937_v2  ;;  %3132 = vmatpush.bf16.msrb.mxu1 %v6649_v3  ;;  %v9589_v57 = vld [vmem:[#allocation5 + $0x774] sm:$0xf0]  ;;  %v6553_v1 = vor.u32 %v9381_v9, %v6552_v51 }
 0x19b   :  { %v7730_v18 = vld [vmem:[#allocation5 + $0xa30] sm:$0xf0]  ;;  %3109 = vmatpush.bf16.msrb.mxu2 %v7765_v11  ;;  %v7096_v62 = vld [vmem:[#allocation5 + $0x518] sm:$0xf]  ;;  %v7385_v7 = vor.u32 %v9589_v57, %v7384_v55 }
 0x19c   :  { %v7733_v27 = vor.u32 %v9672_v38, %v7730_v18  ;;  %3096 = vmatpush.bf16.msra.mxu0 %v7477_v17  ;;  %v9517_v63 = vld [vmem:[#allocation5 + $0x534] sm:$0xf0]  ;;  %v10562_v17 = vpop.f32.mrf.mxu0  ;;  %v10570_v55 = vpop.f32.mrf.mxu2 }
 0x19d   :  { %v6808_v2 = vld [vmem:[#allocation5 + $0x2d8] sm:$0xf]  ;;  %v7097_v12 = vor.u32 %v9517_v63, %v7096_v62 }
 0x19e   :  { %3146 = vmatpush.bf16.msra.mxu3 %v6905_v22  ;;  %3133 = vmatpush.bf16.msrb.mxu1 %v6617_v23  ;;  %v9445_v3 = vld [vmem:[#allocation5 + $0x2f4] sm:$0xf0]  ;;  %v10564_v23 = vpop.f32.mrf.mxu1 }
 0x19f   :  { %3110 = vmatpush.bf16.msrb.mxu2 %v7733_v27  ;;  %3097 = vmatmul.bf16.vlgmr.msra.gmra.mxu0 %v10481_v37  ;;  %v9373_v11 = vld [vmem:[#allocation5 + $0xb4] sm:$0xf0]  ;;  %v6809_v38 = vor.u32 %v9445_v3, %v6808_v2 }
 0x1a0   :  { %3159 = vmatpush.bf16.msrb.mxu0 %v7193_v19  ;;  %v7064_v18 = vld [vmem:[#allocation5 + $0x4d8] sm:$0xf]  ;;  %v6521_v20 = vor.u32 %v9373_v11, %v6520_v10 }
 0x1a1   :  { %v9509_v19 = vld [vmem:[#allocation5 + $0x4f4] sm:$0xf0] }
 0x1a2   :  { %3111 = vmatmul.bf16.vlgmr.msrb.gmra.mxu2 %v10483_v42  ;;  %3147 = vmatpush.bf16.msra.mxu3 %v6873_v41  ;;  %v6776_v21 = vld [vmem:[#allocation5 + $0x298] sm:$0xf]  ;;  %v7065_v30 = vor.u32 %v9509_v19, %v7064_v18 }
 0x1a3   :  { %3173 = vmatpush.bf16.msra.mxu2 %v7449_v34  ;;  %3134 = vmatpush.bf16.msrb.mxu1 %v6585_v45  ;;  %v9437_v22 = vld [vmem:[#allocation5 + $0x2b4] sm:$0xf0] }
 0x1a4   :  { %3160 = vmatpush.bf16.msrb.mxu0 %v7161_v61  ;;  %v6488_v25 = vld [vmem:[#allocation5 + $0x58] sm:$0xf]  ;;  %8003 = vmatmul.msk.bf16.vlgmr.msrb.gmra.mxu3 %vm2539_vm0, %v10477_v50  ;;  %v6777_v36 = vor.u32 %v9437_v22, %v6776_v21  ;;  %v10576_v21 = vpop.f32.mrf.mxu3 }
 0x1a5   :  { %v9365_v27 = vld [vmem:[#allocation5 + $0x74] sm:$0xf0] }
 0x1a6   :  { %3148 = vmatpush.bf16.msra.mxu3 %v6841_v59  ;;  %v7320_v31 = vld [vmem:[#allocation5 + $0x6d8] sm:$0xf]  ;;  %v6489_v40 = vor.u32 %v9365_v27, %v6488_v25  ;;  %v10572_v3 = vpop.f32.mrf.mxu1 }
 0x1a7   :  { %3174 = vmatpush.bf16.msra.mxu2 %v7417_v49  ;;  %3135 = vmatpush.bf16.msrb.mxu1 %v6553_v1  ;;  %v9573_v34 = vld [vmem:[#allocation5 + $0x6f4] sm:$0xf0] }
 0x1a8   :  { %3161 = vmatpush.bf16.msrb.mxu0 %v7129_v53  ;;  %v7032_v61 = vld [vmem:[#allocation5 + $0x498] sm:$0xf]  ;;  %v7321_v44 = vor.u32 %v9573_v34, %v7320_v31 }
 0x1a9   :  { %v9501_v39 = vld [vmem:[#allocation5 + $0x4b4] sm:$0xf0] }
 0x1aa   :  { %3149 = vmatpush.bf16.msra.mxu3 %v6809_v38  ;;  %v6744_v41 = vld [vmem:[#allocation5 + $0x258] sm:$0xf]  ;;  %v7033_v49 = vor.u32 %v9501_v39, %v7032_v61 }
 0x1ab   :  { %3175 = vmatpush.bf16.msra.mxu2 %v7385_v7  ;;  %3136 = vmatpush.bf16.msrb.mxu1 %v6521_v20  ;;  %v9429_v43 = vld [vmem:[#allocation5 + $0x274] sm:$0xf0]  ;;  %v10574_v7 = vpop.f32.mrf.mxu0 }
 0x1ac   :  { %3162 = vmatpush.bf16.msrb.mxu0 %v7097_v12  ;;  %v6456_v45 = vld [vmem:[#allocation5 + $0x18] sm:$0xf]  ;;  %v6745_v57 = vor.u32 %v9429_v43, %v6744_v41 }
 0x1ad   :  { %v9357_v46 = vld [vmem:[#allocation5 + $0x34] sm:$0xf0] }
 0x1ae   :  { %v7288_v48 = vld [vmem:[#allocation5 + $0x698] sm:$0xf]  ;;  %3150 = vmatpush.bf16.msra.mxu3 %v6777_v36  ;;  %v6457_v63 = vor.u32 %v9357_v46, %v6456_v45  ;;  %v10578_v46 = vpop.f32.mrf.mxu2 }
 0x1af   :  { %3176 = vmatpush.bf16.msra.mxu2 %v7353_v24  ;;  %v9565_v51 = vld [vmem:[#allocation5 + $0x6b4] sm:$0xf0]  ;;  %3137 = vmatpush.bf16.msrb.mxu1 %v6489_v40 }
 0x1b0   :  { %3163 = vmatpush.bf16.msrb.mxu0 %v7065_v30  ;;  %v7704_v9 = vld [vmem:[#allocation5 + $0x9d8] sm:$0xf]  ;;  %v7289_v10 = vor.u32 %v9565_v51, %v7288_v48  ;;  %v6682_v51 = vld [vmem:[#allocation5 + $0x1f8] sm:$0xf0] }
 0x1b1   :  { %v9669_v53 = vld [vmem:[#allocation5 + $0x9f4] sm:$0xf0] }
 0x1b2   :  { %v7000_v59 = vld [vmem:[#allocation5 + $0x458] sm:$0xf]  ;;  %v7705_v11 = vor.u32 %v9669_v53, %v7704_v9  ;;  %3151 = vmatpush.bf16.msra.mxu3 %v6745_v57  ;;  %v9473_v53 = vld [vmem:[#allocation5 + $0x3dc] sm:$0xf] }
 0x1b3   :  { %v9493_v62 = vld [vmem:[#allocation5 + $0x474] sm:$0xf0]  ;;  %3177 = vmatpush.bf16.msra.mxu2 %v7321_v44  ;;  %3138 = vmatpush.bf16.msrb.mxu1 %v6457_v63  ;;  %v6938_v57 = vld [vmem:[#allocation5 + $0x3f8] sm:$0xf0] }
 0x1b4   :  { %v6712_v1 = vld [vmem:[#allocation5 + $0x218] sm:$0xf]  ;;  %3164 = vmatpush.bf16.msrb.mxu0 %v7033_v49  ;;  %v7001_v38 = vor.u32 %v9493_v62, %v7000_v59  ;;  %v9409_v49 = vld [vmem:[#allocation5 + $0x1dc] sm:$0xf]  ;;  %v10581_v59 = vpop.f32.mrf.mxu0 }
 0x1b5   :  { %v9421_v2 = vld [vmem:[#allocation5 + $0x234] sm:$0xf0]  ;;  %11125 = vst [vmem:[#allocation27_spill] sm:$0xff] %v10581_v59  ;;  %v9417_v59 = vld [vmem:[#allocation5 + $0x21c] sm:$0xf] }
 0x1b6   :  { %v7960_v12 = vld [vmem:[#allocation5 + $0xbd8] sm:$0xf]  ;;  %v6713_v22 = vor.u32 %v9421_v2, %v6712_v1  ;;  %3139 = vmatmul.bf16.vlgmr.msrb.gmra.mxu1 %v10467_v58 }
 0x1b7   :  { %v9733_v13 = vld [vmem:[#allocation5 + $0xbf4] sm:$0xf0]  ;;  %3178 = vmatpush.bf16.msra.mxu2 %v7289_v10  ;;  %3187 = vmatpush.bf16.msra.mxu1 %v7705_v11  ;;  %v6685_v10 = vor.u32 %v9409_v49, %v6682_v51 }
 0x1b8   :  { %v7256_v14 = vld [vmem:[#allocation5 + $0x658] sm:$0xf]  ;;  %v7961_v27 = vor.u32 %v9733_v13, %v7960_v12  ;;  %3165 = vmatpush.bf16.msrb.mxu0 %v7001_v38  ;;  %3152 = vmatpush.bf16.msra.mxu3 %v6713_v22  ;;  %v10584_v13 = vpop.f32.mrf.mxu1  ;;  %v9401_v38 = vld [vmem:[#allocation5 + $0x19c] sm:$0xf] }
 0x1b9   :  { %v9557_v18 = vld [vmem:[#allocation5 + $0x674] sm:$0xf0]  ;;  %v6906_v22 = vld [vmem:[#allocation5 + $0x3b8] sm:$0xf0] }
 0x1ba   :  { %v7672_v19 = vld [vmem:[#allocation5 + $0x998] sm:$0xf]  ;;  %v7257_v34 = vor.u32 %v9557_v18, %v7256_v14  ;;  %v6941_v14 = vor.u32 %v9473_v53, %v6938_v57  ;;  %v6650_v18 = vld [vmem:[#allocation5 + $0x1b8] sm:$0xf0] }
 0x1bb   :  { %v9661_v20 = vld [vmem:[#allocation5 + $0x9b4] sm:$0xf0]  ;;  %3153 = vmatmul.bf16.vlgmr.msra.gmra.mxu3 %v10473_v8 }
 0x1bc   :  { %v6968_v24 = vld [vmem:[#allocation5 + $0x418] sm:$0xf]  ;;  %v7673_v36 = vor.u32 %v9661_v20, %v7672_v19  ;;  %3201 = vmatpush.bf16.msrb.mxu3 %v7961_v27  ;;  %3179 = vmatpush.bf16.msra.mxu2 %v7257_v34  ;;  %v9465_v20 = vld [vmem:[#allocation5 + $0x39c] sm:$0xf] }
 0x1bd   :  { %v9485_v25 = vld [vmem:[#allocation5 + $0x434] sm:$0xf0] }
 0x1be   :  { %v7992_v30 = vld [vmem:[#allocation5 + $0xc18] sm:$0xf]  ;;  %v6969_v41 = vor.u32 %v9485_v25, %v6968_v24  ;;  %3188 = vmatpush.bf16.msra.mxu1 %v7673_v36  ;;  %v10586_v24 = vpop.f32.mrf.mxu3 }
 0x1bf   :  { %v9741_v31 = vld [vmem:[#allocation5 + $0xc34] sm:$0xf0] }
 0x1c0   :  { %v7928_v61 = vld [vmem:[#allocation5 + $0xb98] sm:$0xf]  ;;  %v7993_v48 = vor.u32 %v9741_v31, %v7992_v30  ;;  %3166 = vmatpush.bf16.msrb.mxu0 %v6969_v41  ;;  %v6653_v31 = vor.u32 %v9401_v38, %v6650_v18 }
 0x1c1   :  { %v9725_v39 = vld [vmem:[#allocation5 + $0xbb4] sm:$0xf0] }
 0x1c2   :  { %v7224_v40 = vld [vmem:[#allocation5 + $0x618] sm:$0xf]  ;;  %v7929_v9 = vor.u32 %v9725_v39, %v7928_v61  ;;  %v6909_v61 = vor.u32 %v9465_v20, %v6906_v22  ;;  %v9393_v39 = vld [vmem:[#allocation5 + $0x15c] sm:$0xf] }
 0x1c3   :  { %v9549_v43 = vld [vmem:[#allocation5 + $0x634] sm:$0xf0]  ;;  %3167 = vmatmul.bf16.vlgmr.msrb.gmra.mxu0 %v10465_v54  ;;  %v9529_v54 = vld [vmem:[#allocation5 + $0x59c] sm:$0xf] }
 0x1c4   :  { %v7640_v44 = vld [vmem:[#allocation5 + $0x958] sm:$0xf]  ;;  %v7225_v62 = vor.u32 %v9549_v43, %v7224_v40  ;;  %3222 = vmatpush.bf16.msra.mxu0 %v7993_v48  ;;  %3202 = vmatpush.bf16.msrb.mxu3 %v7929_v9  ;;  %v6618_v40 = vld [vmem:[#allocation5 + $0x178] sm:$0xf0] }
 0x1c5   :  { %v9653_v45 = vld [vmem:[#allocation5 + $0x974] sm:$0xf0]  ;;  %v9457_v43 = vld [vmem:[#allocation5 + $0x35c] sm:$0xf]  ;;  %v6621_v9 = vor.u32 %v9393_v39, %v6618_v40  ;;  %v10598_v40 = vld [vmem:[#allocation7] sm:$0xff] }
 0x1c6   :  { %v7641_v63 = vor.u32 %v9653_v45, %v7640_v44  ;;  %v7896_v1 = vld [vmem:[#allocation5 + $0xb58] sm:$0xf]  ;;  %3180 = vmatpush.bf16.msra.mxu2 %v7225_v62  ;;  %v6874_v44 = vld [vmem:[#allocation5 + $0x378] sm:$0xf0]  ;;  %v10590_v45 = vpop.f32.mrf.mxu2  ;;  %v10592_v62 = vpop.f32.mrf.mxu1 }
 0x1c7   :  { %v9717_v2 = vld [vmem:[#allocation5 + $0xb74] sm:$0xf0]  ;;  %v10596_v38 = vpop.f32.mrf.mxu3  ;;  %v6810_v39 = vld [vmem:[#allocation5 + $0x2f8] sm:$0xf0] }
 0x1c8   :  { %v7608_v11 = vld [vmem:[#allocation5 + $0x918] sm:$0xf]  ;;  %v7897_v19 = vor.u32 %v9717_v2, %v7896_v1  ;;  %3189 = vmatpush.bf16.msra.mxu1 %v7641_v63  ;;  %3243 = vmatpush.bf16.msrb.mxu0 %v6941_v14  ;;  %v10594_v63 = vpop.f32.mrf.mxu0  ;;  %v6877_v1 = vor.u32 %v9457_v43, %v6874_v44  ;;  %v9385_v2 = vld [vmem:[#allocation5 + $0x11c] sm:$0xf] }
 0x1c9   :  { %v9645_v12 = vld [vmem:[#allocation5 + $0x934] sm:$0xf0]  ;;  %3181 = vmatmul.bf16.vlgmr.msra.gmra.mxu2 %v10469_v60  ;;  %11126 = vst [vmem:[#allocation28_spill] sm:$0xff] %v10594_v63  ;;  %v6842_v14 = vld [vmem:[#allocation5 + $0x338] sm:$0xf0] }
 0x1ca   :  { %v7609_v25 = vor.u32 %v9645_v12, %v7608_v11  ;;  %v7864_v27 = vld [vmem:[#allocation5 + $0xb18] sm:$0xf]  ;;  %3229 = vmatpush.bf16.msrb.mxu2 %v6685_v10  ;;  %3203 = vmatpush.bf16.msrb.mxu3 %v7897_v19  ;;  %v6586_v10 = vld [vmem:[#allocation5 + $0x138] sm:$0xf0] }
 0x1cb   :  { %v9709_v30 = vld [vmem:[#allocation5 + $0xb34] sm:$0xf0]  ;;  %v9449_v12 = vld [vmem:[#allocation5 + $0x31c] sm:$0xf]  ;;  %v6589_v22 = vor.u32 %v9385_v2, %v6586_v10 }
 0x1cc   :  { %v7576_v34 = vld [vmem:[#allocation5 + $0x8d8] sm:$0xf]  ;;  %v7865_v41 = vor.u32 %v9709_v30, %v7864_v27  ;;  %3190 = vmatpush.bf16.msra.mxu1 %v7609_v25  ;;  %3244 = vmatpush.bf16.msrb.mxu0 %v6909_v61  ;;  %v6845_v30 = vor.u32 %v9449_v12, %v6842_v14  ;;  %v9441_v61 = vld [vmem:[#allocation5 + $0x2dc] sm:$0xf] }
 0x1cd   :  { %v9637_v36 = vld [vmem:[#allocation5 + $0x8f4] sm:$0xf0]  ;;  %v9537_v2 = vld [vmem:[#allocation5 + $0x5dc] sm:$0xf] }
 0x1ce   :  { %v7577_v48 = vor.u32 %v9637_v36, %v7576_v34  ;;  %v7832_v49 = vld [vmem:[#allocation5 + $0xad8] sm:$0xf]  ;;  %3230 = vmatpush.bf16.msrb.mxu2 %v6653_v31  ;;  %3204 = vmatpush.bf16.msrb.mxu3 %v7865_v41  ;;  %v9377_v31 = vld [vmem:[#allocation5 + $0xdc] sm:$0xf]  ;;  %v10600_v41 = vpop.f32.mrf.mxu2 }
 0x1cf   :  { %v9701_v51 = vld [vmem:[#allocation5 + $0xaf4] sm:$0xf0]  ;;  %v6554_v34 = vld [vmem:[#allocation5 + $0xf8] sm:$0xf0] }
 0x1d0   :  { %v7544_v53 = vld [vmem:[#allocation5 + $0x898] sm:$0xf]  ;;  %v7833_v11 = vor.u32 %v9701_v51, %v7832_v49  ;;  %3191 = vmatpush.bf16.msra.mxu1 %v7577_v48  ;;  %3245 = vmatpush.bf16.msrb.mxu0 %v6877_v1  ;;  %v6557_v49 = vor.u32 %v9377_v31, %v6554_v34  ;;  %v6522_v1 = vld [vmem:[#allocation5 + $0xb8] sm:$0xf0] }
 0x1d1   :  { %v9629_v57 = vld [vmem:[#allocation5 + $0x8b4] sm:$0xf0]  ;;  %v7194_v10 = vld [vmem:[#allocation5 + $0x5f8] sm:$0xf0] }
 0x1d2   :  { %v7545_v18 = vor.u32 %v9629_v57, %v7544_v53  ;;  %v7800_v19 = vld [vmem:[#allocation5 + $0xa98] sm:$0xf]  ;;  %3231 = vmatpush.bf16.msrb.mxu2 %v6621_v9  ;;  %3205 = vmatpush.bf16.msrb.mxu3 %v7833_v11  ;;  %v9369_v53 = vld [vmem:[#allocation5 + $0x9c] sm:$0xf]  ;;  %v6813_v57 = vor.u32 %v9441_v61, %v6810_v39  ;;  %v7197_v34 = vor.u32 %v9537_v2, %v7194_v10 }
 0x1d3   :  { %v9693_v20 = vld [vmem:[#allocation5 + $0xab4] sm:$0xf0]  ;;  %v9433_v12 = vld [vmem:[#allocation5 + $0x29c] sm:$0xf]  ;;  %v6525_v31 = vor.u32 %v9369_v53, %v6522_v1  ;;  %8004 = vmatmul.msk.bf16.vlgmr.msra.gmra.mxu0 %vm2539_vm0, %v10477_v50  ;;  %v2667_v10 = vadd.f32 %v10538_v29, %v10534_v15 }
 0x1d4   :  { %v7512_v25 = vld [vmem:[#allocation5 + $0x858] sm:$0xf]  ;;  %v7801_v36 = vor.u32 %v9693_v20, %v7800_v19  ;;  %3192 = vmatpush.bf16.msra.mxu1 %v7545_v18  ;;  %3246 = vmatpush.bf16.msrb.mxu0 %v6845_v30  ;;  %v6778_v14 = vld [vmem:[#allocation5 + $0x2b8] sm:$0xf0]  ;;  %v3337_v19 = vperm.slane %v10598_v40, 0  ;;  %v3338_v18 = vperm.slane %v10598_v40, 1  ;;  %v10604_v20 = vpop.f32.mrf.mxu1 }
 0x1d5   :  { %v9621_v27 = vld [vmem:[#allocation5 + $0x874] sm:$0xf0]  ;;  %v9601_v61 = vld [vmem:[#allocation5 + $0x7dc] sm:$0xf] }
 0x1d6   :  { %v7513_v43 = vor.u32 %v9621_v27, %v7512_v25  ;;  %v7768_v44 = vld [vmem:[#allocation5 + $0xa58] sm:$0xf]  ;;  %3232 = vmatpush.bf16.msrb.mxu2 %v6589_v22  ;;  %3206 = vmatpush.bf16.msrb.mxu3 %v7801_v36  ;;  %v10606_v22 = vpop.f32.mrf.mxu0  ;;  %v7450_v36 = vld [vmem:[#allocation5 + $0x7f8] sm:$0xf0]  ;;  %v10614_v53 = vpop.f32.mrf.mxu2 }
 0x1d7   :  { %v9685_v48 = vld [vmem:[#allocation5 + $0xa74] sm:$0xf0]  ;;  %v9361_v39 = vld [vmem:[#allocation5 + $0x5c] sm:$0xf]  ;;  %v7453_v1 = vor.u32 %v9601_v61, %v7450_v36 }
 0x1d8   :  { %v7480_v51 = vld [vmem:[#allocation5 + $0x818] sm:$0xf]  ;;  %v7769_v11 = vor.u32 %v9685_v48, %v7768_v44  ;;  %3193 = vmatpush.bf16.msra.mxu1 %v7513_v43  ;;  %v10610_v44 = vpop.f32.mrf.mxu3  ;;  %3247 = vmatpush.bf16.msrb.mxu0 %v6813_v57  ;;  %v6781_v48 = vor.u32 %v9433_v12, %v6778_v14  ;;  %v6490_v60 = vld [vmem:[#allocation5 + $0x78] sm:$0xf0] }
 0x1d9   :  { %v9613_v9 = vld [vmem:[#allocation5 + $0x834] sm:$0xf0]  ;;  %v7162_v63 = vld [vmem:[#allocation5 + $0x5b8] sm:$0xf0]  ;;  %v6493_v57 = vor.u32 %v9361_v39, %v6490_v60 }
 0x1da   :  { %v7481_v25 = vor.u32 %v9613_v9, %v7480_v51  ;;  %v7736_v27 = vld [vmem:[#allocation5 + $0xa18] sm:$0xf]  ;;  %3233 = vmatpush.bf16.msrb.mxu2 %v6557_v49  ;;  %3207 = vmatpush.bf16.msrb.mxu3 %v7769_v11  ;;  %v9425_v51 = vld [vmem:[#allocation5 + $0x25c] sm:$0xf]  ;;  %v2569_v49 = vadd.f32 %v10512_v52, %v10509_v47  ;;  %v7165_v12 = vor.u32 %v9529_v54, %v7162_v63 }
 0x1db   :  { %v9677_v30 = vld [vmem:[#allocation5 + $0xa34] sm:$0xf0]  ;;  %v6746_v9 = vld [vmem:[#allocation5 + $0x278] sm:$0xf0] }
 0x1dc   :  { %v7737_v43 = vor.u32 %v9677_v30, %v7736_v27  ;;  %3194 = vmatpush.bf16.msra.mxu1 %v7481_v25  ;;  %v9593_v2 = vld [vmem:[#allocation5 + $0x79c] sm:$0xf]  ;;  %v3353_v30 = vpack.c.bf16 %v3338_v18, %v3337_v19  ;;  %3248 = vmatpush.bf16.msrb.mxu0 %v6781_v48  ;;  %v6749_v50 = vor.u32 %v9425_v51, %v6746_v9  ;;  %v10620_v29 = vpop.f32.mrf.mxu1 }
 0x1dd   :  { %v7418_v14 = vld [vmem:[#allocation5 + $0x7b8] sm:$0xf0]  ;;  %v2583_v15 = vadd.f32 %v10507_v16, %v2569_v49  ;;  %v2681_v19 = vadd.f32 %v10541_v4, %v2667_v10 }
 0x1de   :  { %3234 = vmatpush.bf16.msrb.mxu2 %v6525_v31  ;;  %v9353_v11 = vld [vmem:[#allocation5 + $0x1c] sm:$0xf]  ;;  %3208 = vmatpush.bf16.msrb.mxu3 %v7737_v43  ;;  %v7421_v54 = vor.u32 %v9593_v2, %v7418_v14  ;;  %v3361_v48 = vunpack.c.l.b16 %v3353_v30  ;;  %v3362_v43 = vunpack.c.h.b16 %v3353_v30  ;;  %v2862_v51 = vpop.f32.mrf.mxu0 }
 0x1df   :  { %v6458_v27 = vld [vmem:[#allocation5 + $0x38] sm:$0xf0]  ;;  %3195 = vmatmul.bf16.vlgmr.msra.gmra.mxu1 %v10481_v37 }
 0x1e0   :  { %3257 = vmatpush.bf16.msrb.mxu1 %v7197_v34  ;;  %v9521_v47 = vld [vmem:[#allocation5 + $0x55c] sm:$0xf]  ;;  %v6461_v18 = vor.u32 %v9353_v11, %v6458_v27  ;;  %v10623_v9 = vpop.f32.mrf.mxu3  ;;  %3249 = vmatpush.bf16.msrb.mxu0 %v6749_v50  ;;  %v2695_v50 = vadd.f32 %v10564_v23, %v2681_v19 }
 0x1e1   :  { %v7130_v52 = vld [vmem:[#allocation5 + $0x578] sm:$0xf0]  ;;  %3209 = vmatmul.bf16.vlgmr.msrb.gmra.mxu3 %v10483_v42 }
 0x1e2   :  { %v6714_v25 = vld [vmem:[#allocation5 + $0x238] sm:$0xf0]  ;;  %3271 = vmatpush.bf16.msra.mxu3 %v7453_v1  ;;  %3235 = vmatpush.bf16.msrb.mxu2 %v6493_v57  ;;  %v7133_v31 = vor.u32 %v9521_v47, %v7130_v52  ;;  %v3339_v57 = vperm.slane %v10598_v40, 2  ;;  %v2597_v47 = vadd.f32 %v10518_v26, %v2583_v15  ;;  %v2763_v26 = vadd.f32 %v10576_v21, %v10572_v3 }
 0x1e3   :  { %v9665_v61 = vld [vmem:[#allocation5 + $0x9dc] sm:$0xf]  ;;  %v6717_v16 = vor.u32 %v9417_v59, %v6714_v25 }
 0x1e4   :  { %v7706_v36 = vld [vmem:[#allocation5 + $0x9f8] sm:$0xf0]  ;;  %3258 = vmatpush.bf16.msrb.mxu1 %v7165_v12  ;;  %v3340_v12 = vperm.slane %v10598_v40, 3 }
 0x1e5   :  { %v9729_v60 = vld [vmem:[#allocation5 + $0xbdc] sm:$0xf]  ;;  %v7709_v49 = vor.u32 %v9665_v61, %v7706_v36  ;;  %v3369_v61 = vpack.c.b16 %v3361_v48, %v3361_v48  ;;  %v3370_v36 = vpack.c.b16 %v3362_v43, %v3362_v43  ;;  %3250 = vmatpush.bf16.msrb.mxu0 %v6717_v16 }
 0x1e6   :  { %v7962_v63 = vld [vmem:[#allocation5 + $0xbf8] sm:$0xf0]  ;;  %3272 = vmatpush.bf16.msra.mxu3 %v7421_v54  ;;  %3236 = vmatpush.bf16.msrb.mxu2 %v6461_v18  ;;  %v2861_v18 = vadd.f32 %v10606_v22, %v10578_v46  ;;  %v2876_v22 = vpop.f32.mrf.mxu1 }
 0x1e7   :  { %v9585_v34 = vld [vmem:[#allocation5 + $0x75c] sm:$0xf]  ;;  %v7965_v14 = vor.u32 %v9729_v60, %v7962_v63  ;;  %v10630_v60 = vpop.f32.mrf.mxu2 }
 0x1e8   :  { %v7386_v39 = vld [vmem:[#allocation5 + $0x778] sm:$0xf0]  ;;  %3259 = vmatpush.bf16.msrb.mxu1 %v7133_v31  ;;  %v10637_v31 = vpack.c.bf16 %v3340_v12, %v3339_v57  ;;  %3251 = vmatmul.bf16.vlgmr.msrb.gmra.mxu0 %v10473_v8  ;;  %v2875_v46 = vadd.f32 %v10620_v29, %v2861_v18  ;;  %v2863_v57 = vadd.f32 %v2862_v51, %v10590_v45 }
 0x1e9   :  { %v9513_v1 = vld [vmem:[#allocation5 + $0x51c] sm:$0xf]  ;;  %v7389_v11 = vor.u32 %v9585_v34, %v7386_v39  ;;  %v2611_v34 = vadd.f32 %v10528_v56, %v2597_v47  ;;  %3299 = vmatpush.bf16.msra.mxu0 %v7965_v14  ;;  %3237 = vmatmul.bf16.vlgmr.msrb.gmra.mxu2 %v10467_v58  ;;  %v2709_v56 = vadd.f32 %v10568_v35, %v2695_v50 }
 0x1ea   :  { %v7098_v2 = vld [vmem:[#allocation5 + $0x538] sm:$0xf0]  ;;  %3285 = vmatpush.bf16.msra.mxu2 %v7709_v49  ;;  %v3378_v49 = vpack.i.b16 %v3369_v61, %v3369_v61  ;;  %v2765_v35 = vadd.f32 %v10586_v24, %v10584_v13  ;;  %v2777_v29 = vadd.f32 %v10562_v17, %v2763_v26  ;;  %v3363_v47 = vunpack.c.l.b16 %v10637_v31 }
 0x1eb   :  { %v9657_v4 = vld [vmem:[#allocation5 + $0x99c] sm:$0xf]  ;;  %v7101_v59 = vor.u32 %v9513_v1, %v7098_v2  ;;  %3273 = vmatpush.bf16.msra.mxu3 %v7389_v11  ;;  %v3382_v1 = vpack.i.b16 %v3370_v36, %v3370_v36  ;;  %v10643_v2 = vpop.f32.mrf.mxu0  ;;  %v2877_v13 = vadd.f32 %v2876_v22, %v2863_v57  ;;  %v3364_v24 = vunpack.c.h.b16 %v10637_v31 }
 0x1ec   :  { %v7674_v10 = vld [vmem:[#allocation5 + $0x9b8] sm:$0xf0]  ;;  %v10654_v61 = vperm.slane %v3378_v49, 0  ;;  %v3371_v18 = vpack.c.b16 %v3363_v47, %v3363_v47  ;;  %v3409_v47 = vunpack.c.l.bf16 %v10546_v0 }
 0x1ed   :  { %v9721_v27 = vld [vmem:[#allocation5 + $0xb9c] sm:$0xf]  ;;  %v7677_v40 = vor.u32 %v9657_v4, %v7674_v10  ;;  %3260 = vmatpush.bf16.msrb.mxu1 %v7101_v59  ;;  %v2625_v10 = vadd.f32 %v10532_v6, %v2611_v34  ;;  %v10656_v17 = vperm.slane %v3382_v1, 0 }
 0x1ee   :  { %v7930_v30 = vld [vmem:[#allocation5 + $0xbb8] sm:$0xf0] }
 0x1ef   :  { %v9577_v52 = vld [vmem:[#allocation5 + $0x71c] sm:$0xf]  ;;  %v7933_v23 = vor.u32 %v9721_v27, %v7930_v30  ;;  %3286 = vmatpush.bf16.msra.mxu2 %v7677_v40  ;;  %v2889_v27 = vadd.f32 %v10623_v9, %v2875_v46  ;;  %v2890_v30 = vpop.f32.mrf.mxu3  ;;  %v10662_v31 = vpop.f32.mrf.mxu2 }
 0x1f0   :  { %v7354_v25 = vld [vmem:[#allocation5 + $0x738] sm:$0xf0] }
 0x1f1   :  { %v9505_v54 = vld [vmem:[#allocation5 + $0x4dc] sm:$0xf]  ;;  %v7357_v39 = vor.u32 %v9577_v52, %v7354_v25  ;;  %3300 = vmatpush.bf16.msra.mxu0 %v7933_v23  ;;  %v2723_v52 = vadd.f32 %v10554_v32, %v2709_v56  ;;  %v2891_v32 = vadd.f32 %v2890_v30, %v2877_v13  ;;  %v3372_v56 = vpack.c.b16 %v3364_v24, %v3364_v24 }
 0x1f2   :  { %v7066_v63 = vld [vmem:[#allocation5 + $0x4f8] sm:$0xf0] }
 0x1f3   :  { %v9649_v15 = vld [vmem:[#allocation5 + $0x95c] sm:$0xf]  ;;  %v7069_v16 = vor.u32 %v9505_v54, %v7066_v63  ;;  %3274 = vmatpush.bf16.msra.mxu3 %v7357_v39  ;;  %v2737_v54 = vadd.f32 %v10556_v33, %v2723_v52  ;;  %v2779_v63 = vadd.f32 %v10574_v7, %v2765_v35  ;;  %v2639_v33 = vadd.f32 %v10520_v28, %v2625_v10  ;;  %v8120_v52 = vld [vmem:[#allocation8 + $0xe0] sm:$0xf] }
 0x1f4   :  { %v7642_v19 = vld [vmem:[#allocation5 + $0x978] sm:$0xf0] }
 0x1f5   :  { %v9713_v48 = vld [vmem:[#allocation5 + $0xb5c] sm:$0xf]  ;;  %v7645_v14 = vor.u32 %v9649_v15, %v7642_v19  ;;  %3261 = vmatpush.bf16.msrb.mxu1 %v7069_v16  ;;  %v2791_v15 = vadd.f32 %v10560_v5, %v2777_v29  ;;  %v2903_v19 = vadd.f32 %v10600_v41, %v2889_v27  ;;  %v3426_v5 = vunpack.c.l.bf16 %v10656_v17 }
 0x1f6   :  { %v7898_v43 = vld [vmem:[#allocation5 + $0xb78] sm:$0xf0]  ;;  %v2793_v28 = vadd.f32 %v10570_v55, %v2779_v63 }
 0x1f7   :  { %v9569_v3 = vld [vmem:[#allocation5 + $0x6dc] sm:$0xf]  ;;  %v7901_v8 = vor.u32 %v9713_v48, %v7898_v43  ;;  %3287 = vmatpush.bf16.msra.mxu2 %v7645_v14  ;;  %v2805_v41 = vadd.f32 %v10592_v62, %v2791_v15  ;;  %v10668_v14 = vpack.c.bf16 %v2737_v54, %v2639_v33  ;;  %v2917_v62 = vadd.f32 %v10643_v2, %v2903_v19  ;;  %v10687_v33 = vpop.f32.mrf.mxu2 }
 0x1f8   :  { %v7322_v21 = vld [vmem:[#allocation5 + $0x6f8] sm:$0xf0]  ;;  %v2807_v55 = vadd.f32 %v10604_v20, %v2793_v28 }
 0x1f9   :  { %v9497_v58 = vld [vmem:[#allocation5 + $0x49c] sm:$0xf]  ;;  %v7325_v50 = vor.u32 %v9569_v3, %v7322_v21  ;;  %3301 = vmatpush.bf16.msra.mxu0 %v7901_v8  ;;  %v3425_v21 = vunpack.c.l.bf16 %v10654_v61  ;;  %v2819_v8 = vadd.f32 %v10596_v38, %v2805_v41  ;;  %v3410_v38 = vunpack.c.h.bf16 %v10546_v0  ;;  %v11127_v0 = vld [vmem:[#allocation27_spill] sm:$0xff] }
 0x1fa   :  { %v7034_v4 = vld [vmem:[#allocation5 + $0x4b8] sm:$0xf0]  ;;  %v2931_v2 = vadd.f32 %v10630_v60, %v2917_v62  ;;  %v2821_v20 = vadd.f32 %v10610_v44, %v2807_v55  ;;  %v9764_v55 = vld [vmem:[#allocation8 + $0xac] sm:$0xf0] }
 0x1fb   :  { %v9641_v12 = vld [vmem:[#allocation5 + $0x91c] sm:$0xf]  ;;  %v7037_v45 = vor.u32 %v9497_v58, %v7034_v4  ;;  %3275 = vmatpush.bf16.msra.mxu3 %v7325_v50  ;;  %v2905_v58 = vadd.f32 %v10614_v53, %v2891_v32  ;;  %v3390_v53 = vpack.i.b16 %v3372_v56, %v3372_v56  ;;  %v3418_v32 = vunpack.c.h.bf16 %v10668_v14 }
 0x1fc   :  { %v7610_v11 = vld [vmem:[#allocation5 + $0x938] sm:$0xf0]  ;;  %v3433_v41 = vadd.f32 %v3425_v21, %v3409_v47  ;;  %v3434_v28 = vadd.f32 %v3426_v5, %v3410_v38  ;;  %v8088_v47 = vld [vmem:[#allocation8 + $0xa0] sm:$0xf] }
 0x1fd   :  { %v9705_v59 = vld [vmem:[#allocation5 + $0xb1c] sm:$0xf]  ;;  %v7613_v9 = vor.u32 %v9641_v12, %v7610_v11  ;;  %3262 = vmatpush.bf16.msrb.mxu1 %v7037_v45  ;;  %v2918_v12 = vpop.f32.mrf.mxu0  ;;  %v3386_v11 = vpack.i.b16 %v3371_v18, %v3371_v18  ;;  %v9772_v45 = vld [vmem:[#allocation8 + $0xec] sm:$0xf0]  ;;  %v10684_v19 = vperm.slane %v3390_v53, 0  ;;  %v11130_v53 = vld [vmem:[#allocation25_spill] sm:$0xff] }
 0x1fe   :  { %v7866_v6 = vld [vmem:[#allocation5 + $0xb38] sm:$0xf0]  ;;  %v8121_v44 = vor.u32 %v9772_v45, %v8120_v52  ;;  %v9796_v52 = vld [vmem:[#allocation8 + $0x1ac] sm:$0xf0]  ;;  %v10702_v38 = vpack.c.bf16 %v3434_v28, %v3433_v41  ;;  %v8184_v28 = vld [vmem:[#allocation8 + $0x160] sm:$0xf] }
 0x1ff   :  { %v9561_v51 = vld [vmem:[#allocation5 + $0x69c] sm:$0xf]  ;;  %v7869_v34 = vor.u32 %v9705_v59, %v7866_v6  ;;  %3288 = vmatpush.bf16.msra.mxu2 %v7613_v9  ;;  %v3417_v9 = vunpack.c.l.bf16 %v10668_v14  ;;  %v10682_v60 = vperm.slane %v3386_v11, 0  ;;  %v3428_v17 = vunpack.c.l.bf16 %v10684_v19  ;;  %v10709_v19 = vpop.f32.mrf.mxu2 }
 0x200   :  { %v7290_v25 = vld [vmem:[#allocation5 + $0x6b8] sm:$0xf0] }
 0x201   :  { %v9489_v36 = vld [vmem:[#allocation5 + $0x45c] sm:$0xf]  ;;  %v7293_v39 = vor.u32 %v9561_v51, %v7290_v25  ;;  %3302 = vmatpush.bf16.msra.mxu0 %v7869_v34  ;;  %v8248_v51 = vld [vmem:[#allocation8 + $0x1e0] sm:$0xf]  ;;  %v9804_v25 = vld [vmem:[#allocation8 + $0x1ec] sm:$0xf0]  ;;  %v2833_v34 = vadd.f32 %v11127_v0, %v2819_v8  ;;  %v3427_v62 = vunpack.c.l.bf16 %v10682_v60 }
 0x202   :  { %v7002_v40 = vld [vmem:[#allocation5 + $0x478] sm:$0xf0]  ;;  %v9836_v8 = vld [vmem:[#allocation8 + $0x2ec] sm:$0xf0]  ;;  %v8200_v60 = vld [vmem:[#allocation8 + $0x180] sm:$0xf] }
 0x203   :  { %v9633_v26 = vld [vmem:[#allocation5 + $0x8dc] sm:$0xf]  ;;  %v7005_v7 = vor.u32 %v9489_v36, %v7002_v40  ;;  %3276 = vmatpush.bf16.msra.mxu3 %v7293_v39  ;;  %v2919_v36 = vadd.f32 %v2918_v12, %v2905_v58  ;;  %v8249_v39 = vor.u32 %v9804_v25, %v8248_v51  ;;  %v3441_v58 = vadd.f32 %v3425_v21, %v3417_v9  ;;  %v9760_v0 = vld [vmem:[#allocation8 + $0x8c] sm:$0xf0] }
 0x204   :  { %v7578_v23 = vld [vmem:[#allocation5 + $0x8f8] sm:$0xf0]  ;;  %v8089_v9 = vor.u32 %v9764_v55, %v8088_v47  ;;  %v8760_v47 = vld [vmem:[#allocation8 + $0x5e0] sm:$0xf] }
 0x205   :  { %v9697_v48 = vld [vmem:[#allocation5 + $0xadc] sm:$0xf]  ;;  %v7581_v49 = vor.u32 %v9633_v26, %v7578_v23  ;;  %3263 = vmatpush.bf16.msrb.mxu1 %v7005_v7  ;;  %v2933_v18 = vadd.f32 %v10662_v31, %v2919_v36  ;;  %v9768_v7 = vld [vmem:[#allocation8 + $0xcc] sm:$0xf0] }
 0x206   :  { %v7834_v43 = vld [vmem:[#allocation5 + $0xaf8] sm:$0xf0]  ;;  %v9864_v36 = vld [vmem:[#allocation8 + $0x3cc] sm:$0xf0] }
 0x207   :  { %v9553_v16 = vld [vmem:[#allocation5 + $0x65c] sm:$0xf]  ;;  %v7837_v4 = vor.u32 %v9697_v48, %v7834_v43  ;;  %3289 = vmatpush.bf16.msra.mxu2 %v7581_v49  ;;  %v8104_v48 = vld [vmem:[#allocation8 + $0xc0] sm:$0xf]  ;;  %v3328_v43 = vpack.c.bf16 %v2931_v2, %v2833_v34 }
 0x208   :  { %v7258_v3 = vld [vmem:[#allocation5 + $0x678] sm:$0xf0]  ;;  %v8105_v11 = vor.u32 %v9768_v7, %v8104_v48 }
 0x209   :  { %v9481_v1 = vld [vmem:[#allocation5 + $0x41c] sm:$0xf]  ;;  %v7261_v29 = vor.u32 %v9553_v16, %v7258_v3  ;;  %3303 = vmatpush.bf16.msra.mxu0 %v7837_v4  ;;  %v8232_v16 = vld [vmem:[#allocation8 + $0x1c0] sm:$0xf]  ;;  %v9800_v3 = vld [vmem:[#allocation8 + $0x1cc] sm:$0xf0]  ;;  %v3442_v4 = vadd.f32 %v3426_v5, %v3418_v32  ;;  %v3411_v61 = vunpack.c.l.bf16 %v3328_v43  ;;  %v3412_v21 = vunpack.c.h.bf16 %v3328_v43 }
 0x20a   :  { %v6970_v46 = vld [vmem:[#allocation5 + $0x438] sm:$0xf0]  ;;  %v8072_v32 = vld [vmem:[#allocation8 + $0x80] sm:$0xf] }
 0x20b   :  { %v9625_v22 = vld [vmem:[#allocation5 + $0x89c] sm:$0xf]  ;;  %v6973_v50 = vor.u32 %v9481_v1, %v6970_v46  ;;  %3277 = vmatpush.bf16.msra.mxu3 %v7261_v29  ;;  %v8233_v29 = vor.u32 %v9800_v3, %v8232_v16  ;;  %v10704_v45 = vpack.c.bf16 %v3442_v4, %v3441_v58  ;;  %v8073_v7 = vor.u32 %v9760_v0, %v8072_v32  ;;  %v8472_v16 = vld [vmem:[#allocation8 + $0x3a0] sm:$0xf]  ;;  %v9860_v3 = vld [vmem:[#allocation8 + $0x3ac] sm:$0xf0]  ;;  %v10718_v58 = vpop.f32.mrf.mxu1 }
 0x20c   :  { %v7546_v10 = vld [vmem:[#allocation5 + $0x8b8] sm:$0xf0]  ;;  %v8473_v4 = vor.u32 %v9860_v3, %v8472_v16  ;;  %v9816_v16 = vld [vmem:[#allocation8 + $0x24c] sm:$0xf0]  ;;  %v8424_v3 = vld [vmem:[#allocation8 + $0x340] sm:$0xf] }
 0x20d   :  { %v9737_v35 = vld [vmem:[#allocation5 + $0xc1c] sm:$0xf]  ;;  %v7549_v13 = vor.u32 %v9625_v22, %v7546_v10  ;;  %3264 = vmatpush.bf16.msrb.mxu1 %v6973_v50  ;;  %v3465_v48 = vunpack.c.l.bf16 %v10704_v45  ;;  %v3466_v41 = vunpack.c.h.bf16 %v10704_v45 }
 0x20e   :  { %v7994_v57 = vld [vmem:[#allocation5 + $0xc38] sm:$0xf0] }
 0x20f   :  { %v9689_v27 = vld [vmem:[#allocation5 + $0xa9c] sm:$0xf]  ;;  %v7997_v24 = vor.u32 %v9737_v35, %v7994_v57  ;;  %3290 = vmatpush.bf16.msra.mxu2 %v7549_v13  ;;  %v8376_v57 = vld [vmem:[#allocation8 + $0x2e0] sm:$0xf]  ;;  %vm10736_vm3 = vcmp.gt.f32.partialorder %v3465_v48, 0.0  ;;  %vm10744_vm4 = vcmp.gt.f32.partialorder %v3466_v41, 0.0 }
 0x210   :  { %v7802_v30 = vld [vmem:[#allocation5 + $0xab8] sm:$0xf0]  ;;  %v8360_v13 = vld [vmem:[#allocation8 + $0x2c0] sm:$0xf]  ;;  %vm3517_vm5 = vmpackc.low %vm10744_vm4, %vm10736_vm3 }
 0x211   :  { %v9545_v59 = vld [vmem:[#allocation5 + $0x61c] sm:$0xf]  ;;  %v7805_v40 = vor.u32 %v9689_v27, %v7802_v30  ;;  %3320 = vmatpush.bf16.msra.mxu1 %v7997_v24  ;;  %v8504_v27 = vld [vmem:[#allocation8 + $0x3e0] sm:$0xf]  ;;  %v9868_v30 = vld [vmem:[#allocation8 + $0x3ec] sm:$0xf0] }
 0x212   :  { %v7226_v6 = vld [vmem:[#allocation5 + $0x638] sm:$0xf0]  ;;  %v8505_v2 = vor.u32 %v9868_v30, %v8504_v27  ;;  %v9832_v24 = vld [vmem:[#allocation8 + $0x2cc] sm:$0xf0] }
 0x213   :  { %v9617_v54 = vld [vmem:[#allocation5 + $0x85c] sm:$0xf]  ;;  %v7229_v26 = vor.u32 %v9545_v59, %v7226_v6  ;;  %3304 = vmatpush.bf16.msra.mxu0 %v7805_v40  ;;  %v8377_v59 = vor.u32 %v9836_v8, %v8376_v57  ;;  %v8216_v6 = vld [vmem:[#allocation8 + $0x1a0] sm:$0xf]  ;;  %v3435_v40 = vadd.f32 %v3427_v62, %v3411_v61  ;;  %v8361_v34 = vor.u32 %v9832_v24, %v8360_v13  ;;  %v10730_v61 = vpop.f32.mrf.mxu0 }
 0x214   :  { %v7514_v63 = vld [vmem:[#allocation5 + $0x878] sm:$0xf0]  ;;  %v11137_v13 = vld [vmem:[#allocation26_spill] sm:$0xff] }
 0x215   :  { %v9681_v23 = vld [vmem:[#allocation5 + $0xa5c] sm:$0xf]  ;;  %v7517_v56 = vor.u32 %v9617_v54, %v7514_v63  ;;  %3278 = vmatpush.bf16.msra.mxu3 %v7229_v26  ;;  %v3436_v54 = vadd.f32 %v3428_v17, %v3412_v21  ;;  %v8217_v63 = vor.u32 %v9796_v52, %v8216_v6  ;;  %v9792_v26 = vld [vmem:[#allocation8 + $0x18c] sm:$0xf0] }
 0x216   :  { %v7770_v15 = vld [vmem:[#allocation5 + $0xa78] sm:$0xf0] }
 0x217   :  { %v11128_v49 = vld [vmem:[#allocation28_spill] sm:$0xff]  ;;  %v7773_v31 = vor.u32 %v9681_v23, %v7770_v15  ;;  %3291 = vmatpush.bf16.msra.mxu2 %v7517_v56  ;;  %v3457_v23 = vunpack.c.l.bf16 %v10702_v38  ;;  %v10707_v15 = vpop.f32.mrf.mxu3 }
 0x218   :  { %v2835_v1 = vadd.f32 %v11128_v49, %v2821_v20  ;;  %v9609_v46 = vld [vmem:[#allocation5 + $0x81c] sm:$0xf]  ;;  %3279 = vmatmul.bf16.vlgmr.msra.gmra.mxu3 %v11130_v53  ;;  %v8488_v20 = vld [vmem:[#allocation8 + $0x3c0] sm:$0xf]  ;;  %v10714_v49 = vpack.c.bf16 %v3436_v54, %v3435_v40 }
 0x219   :  { %v7482_v22 = vld [vmem:[#allocation5 + $0x838] sm:$0xf0]  ;;  %5105 = vmatpush.bf16.msrb.mxu3 %v8121_v44  ;;  %3305 = vmatpush.bf16.msra.mxu0 %v7773_v31  ;;  %v8344_v44 = vld [vmem:[#allocation8 + $0x2a0] sm:$0xf]  ;;  %vm10720_vm1 = vcmp.gt.f32.partialorder %v3457_v23, 0.0  ;;  %v3489_v55 = vmul.f32 0.20019531, %v3457_v23 }
 0x21a   :  { %v9673_v14 = vld [vmem:[#allocation5 + $0xa1c] sm:$0xf]  ;;  %v3332_v12 = vpack.c.bf16 %v2933_v18, %v2835_v1  ;;  %v7485_v5 = vor.u32 %v9609_v46, %v7482_v22  ;;  %v8489_v18 = vor.u32 %v9864_v36, %v8488_v20  ;;  %v8201_v1 = vor.u32 %v9792_v26, %v8200_v60  ;;  %v8056_v31 = vld [vmem:[#allocation8 + $0x60] sm:$0xf]  ;;  %v9756_v46 = vld [vmem:[#allocation8 + $0x6c] sm:$0xf0] }
 0x21b   :  { %v11129_v10 = vld [vmem:[#allocation24_spill] sm:$0xff]  ;;  %v3458_v22 = vunpack.c.h.bf16 %v10702_v38  ;;  %v3459_v27 = vunpack.c.l.bf16 %v10714_v49  ;;  %v3460_v30 = vunpack.c.h.bf16 %v10714_v49  ;;  %v8440_v54 = vld [vmem:[#allocation8 + $0x360] sm:$0xf] }
 0x21c   :  { %3265 = vmatmul.bf16.vlgmr.msrb.gmra.mxu1 %v11129_v10  ;;  %v7738_v35 = vld [vmem:[#allocation5 + $0xa38] sm:$0xf0]  ;;  %v3419_v51 = vunpack.c.l.bf16 %v3332_v12  ;;  %v3420_v25 = vunpack.c.h.bf16 %v3332_v12  ;;  %3292 = vmatpush.bf16.msra.mxu2 %v7485_v5  ;;  %v8328_v10 = vld [vmem:[#allocation8 + $0x280] sm:$0xf]  ;;  %v9752_v5 = vld [vmem:[#allocation8 + $0x4c] sm:$0xf0] }
 0x21d   :  { %5119 = vmatpush.bf16.msrb.mxu1 %v8249_v39  ;;  %v7741_v50 = vor.u32 %v9673_v14, %v7738_v35  ;;  %5106 = vmatpush.bf16.msrb.mxu3 %v8105_v11  ;;  %v9828_v39 = vld [vmem:[#allocation8 + $0x2ac] sm:$0xf0]  ;;  %v8456_v12 = vld [vmem:[#allocation8 + $0x380] sm:$0xf]  ;;  %vm10732_vm2 = vcmp.gt.f32.partialorder %v3458_v22, 0.0  ;;  %v3490_v6 = vmul.f32 0.20019531, %v3458_v22 }
 0x21e   :  { %v3443_v43 = vadd.f32 %v3427_v62, %v3419_v51  ;;  %v3444_v56 = vadd.f32 %v3428_v17, %v3420_v25  ;;  %v8345_v14 = vor.u32 %v9828_v39, %v8344_v44  ;;  %v9824_v35 = vld [vmem:[#allocation8 + $0x28c] sm:$0xf0]  ;;  %v8057_v62 = vor.u32 %v9756_v46, %v8056_v31  ;;  %v8040_v17 = vld [vmem:[#allocation8 + $0x40] sm:$0xf]  ;;  %vm3513_vm6 = vmpackc.low %vm10732_vm2, %vm10720_vm1 }
 0x21f   :  { %3306 = vmatpush.bf16.msra.mxu0 %v7741_v50  ;;  %3293 = vmatmul.bf16.vlgmr.msra.gmra.mxu2 %v10481_v37  ;;  %v9788_v37 = vld [vmem:[#allocation8 + $0x16c] sm:$0xf0]  ;;  %v8329_v53 = vor.u32 %v9824_v35, %v8328_v10  ;;  %v8168_v50 = vld [vmem:[#allocation8 + $0x140] sm:$0xf]  ;;  %v8041_v40 = vor.u32 %v9752_v5, %v8040_v17  ;;  %v10753_v0 = vmul.f32 0.20019531, %v3459_v27  ;;  %v10759_v60 = vpop.f32.mrf.mxu3  ;;  %v10781_v17 = vpop.f32.mrf.mxu0  ;;  %vm10785_vm9 = vcmp.gt.f32.partialorder %v3459_v27, 0.0 }
 0x220   :  { %5133 = vmatpush.bf16.msrb.mxu2 %v8377_v59  ;;  %v10726_v8 = vpack.c.bf16 %v3444_v56, %v3443_v43  ;;  %v9856_v11 = vld [vmem:[#allocation8 + $0x38c] sm:$0xf0]  ;;  %v8185_v21 = vor.u32 %v9788_v37, %v8184_v28  ;;  %v8312_v51 = vld [vmem:[#allocation8 + $0x260] sm:$0xf]  ;;  %v3505_v56 = vpack.c.bf16 %v3490_v6, %v3489_v55  ;;  %v10766_v37 = vpop.f32.mrf.mxu1  ;;  %vm10791_vm10 = vcmp.gt.f32.partialorder %v3460_v30, 0.0 }
 0x221   :  { %5120 = vmatpush.bf16.msrb.mxu1 %v8233_v29  ;;  %5107 = vmatpush.bf16.msrb.mxu3 %v8089_v9  ;;  %v3498_v29 = vmul.f32 0.20019531, %v3466_v41  ;;  %v9784_v59 = vld [vmem:[#allocation8 + $0x14c] sm:$0xf0]  ;;  %v8457_v24 = vor.u32 %v9856_v11, %v8456_v12  ;;  %v8024_v23 = vld [vmem:[#allocation8 + $0x20] sm:$0xf]  ;;  %vm3514_vm12 = vmpackc.low %vm10791_vm10, %vm10785_vm9 }
 0x222   :  { %3307 = vmatmul.bf16.vlgmr.msra.gmra.mxu0 %v10483_v42  ;;  %v10724_v42 = vmul.f32 0.20019531, %v3465_v48  ;;  %v9820_v25 = vld [vmem:[#allocation8 + $0x26c] sm:$0xf0]  ;;  %v3467_v20 = vunpack.c.l.bf16 %v10726_v8  ;;  %v3468_v36 = vunpack.c.h.bf16 %v10726_v8  ;;  %v8169_v26 = vor.u32 %v9784_v59, %v8168_v50  ;;  %v8152_v39 = vld [vmem:[#allocation8 + $0x120] sm:$0xf] }
 0x223   :  { %5147 = vmatpush.bf16.msrb.mxu0 %v8505_v2  ;;  %v10740_v2 = vpop.f32.mrf.mxu2  ;;  %v8313_v44 = vor.u32 %v9820_v25, %v8312_v51  ;;  %v9780_v48 = vld [vmem:[#allocation8 + $0x12c] sm:$0xf0]  ;;  %v8296_v43 = vld [vmem:[#allocation8 + $0x240] sm:$0xf] }
 0x224   :  { %5134 = vmatpush.bf16.msrb.mxu2 %v8361_v34  ;;  %v3509_v32 = vpack.c.bf16 %v3498_v29, %v10724_v42  ;;  %v10757_v34 = vmul.f32 0.20019531, %v3460_v30  ;;  %v9848_v41 = vld [vmem:[#allocation8 + $0x34c] sm:$0xf0]  ;;  %v3500_v31 = vmul.f32 0.20019531, %v3468_v36  ;;  %v8008_v22 = vld [vmem:[#allocation8] sm:$0xf] }
 0x225   :  { %5121 = vmatpush.bf16.msrb.mxu1 %v8217_v63  ;;  %5108 = vmatpush.bf16.msrb.mxu3 %v8073_v7  ;;  %v9852_v63 = vld [vmem:[#allocation8 + $0x36c] sm:$0xf0]  ;;  %v8136_v10 = vld [vmem:[#allocation8 + $0x100] sm:$0xf]  ;;  %vm10772_vm7 = vcmp.gt.f32.partialorder %v3467_v20, 0.0  ;;  %vm10776_vm8 = vcmp.gt.f32.partialorder %v3468_v36, 0.0  ;;  %v8425_v57 = vor.u32 %v9848_v41, %v8424_v3 }
 0x226   :  { %v8441_v7 = vor.u32 %v9852_v63, %v8440_v54  ;;  %v3525_v28 = vsel %vm3517_vm5, %v10704_v45, %v3509_v32  ;;  %v9776_v35 = vld [vmem:[#allocation8 + $0x10c] sm:$0xf0]  ;;  %v8280_v42 = vld [vmem:[#allocation8 + $0x220] sm:$0xf]  ;;  %v8297_v45 = vor.u32 %v9816_v16, %v8296_v43  ;;  %vm3518_vm11 = vmpackc.low %vm10776_vm8, %vm10772_vm7 }
 0x227   :  { %5148 = vmatpush.bf16.msrb.mxu0 %v8489_v18  ;;  %v9748_v18 = vld [vmem:[#allocation8 + $0x2c] sm:$0xf0]  ;;  %v8632_v11 = vld [vmem:[#allocation8 + $0x4e0] sm:$0xf]  ;;  %v3801_v52 = vunpack.c.l.b16 %v3525_v28  ;;  %v10799_v51 = vpop.f32.mrf.mxu3  ;;  %v8137_v27 = vor.u32 %v9776_v35, %v8136_v10 }
 0x228   :  { %5135 = vmatpush.bf16.msrb.mxu2 %v8345_v14  ;;  %v8025_v46 = vor.u32 %v9748_v18, %v8024_v23  ;;  %v9744_v14 = vld [vmem:[#allocation8 + $0xc] sm:$0xf0]  ;;  %v8408_v59 = vld [vmem:[#allocation8 + $0x320] sm:$0xf]  ;;  %v10815_v43 = vpop.f32.mrf.mxu1 }
 0x229   :  { %5122 = vmatpush.bf16.msrb.mxu1 %v8201_v1  ;;  %5109 = vmatpush.bf16.msrb.mxu3 %v8057_v62  ;;  %v3499_v1 = vmul.f32 0.20019531, %v3467_v20  ;;  %v9900_v29 = vld [vmem:[#allocation8 + $0x4ec] sm:$0xf0]  ;;  %v8009_v50 = vor.u32 %v9744_v14, %v8008_v22  ;;  %v3506_v20 = vpack.c.bf16 %v10757_v34, %v10753_v0  ;;  %v8616_v54 = vld [vmem:[#allocation8 + $0x4c0] sm:$0xf] }
 0x22a   :  { %v9812_v5 = vld [vmem:[#allocation8 + $0x22c] sm:$0xf0]  ;;  %v8633_v9 = vor.u32 %v9900_v29, %v8632_v11  ;;  %v8392_v34 = vld [vmem:[#allocation8 + $0x300] sm:$0xf] }
 0x22b   :  { %5149 = vmatpush.bf16.msrb.mxu0 %v8473_v4  ;;  %v8153_v4 = vor.u32 %v9780_v48, %v8152_v39  ;;  %v9932_v55 = vld [vmem:[#allocation8 + $0x5ec] sm:$0xf0]  ;;  %v10801_v25 = vpop.f32.mrf.mxu2  ;;  %v8281_v30 = vor.u32 %v9812_v5, %v8280_v42  ;;  %v3522_v3 = vsel %vm3514_vm12, %v10714_v49, %v3506_v20 }
 0x22c   :  { %8005 = vmatmul.msk.bf16.vlgmr.msra.gmra.mxu1 %vm2539_vm0, %v11137_v13  ;;  %5136 = vmatpush.bf16.msrb.mxu2 %v8329_v53  ;;  %v3510_v53 = vpack.c.bf16 %v3500_v31, %v3499_v1  ;;  %v9844_v6 = vld [vmem:[#allocation8 + $0x32c] sm:$0xf0]  ;;  %v3802_v13 = vunpack.c.h.b16 %v3525_v28  ;;  %v8761_v36 = vor.u32 %v9932_v55, %v8760_v47  ;;  %v8600_v1 = vld [vmem:[#allocation8 + $0x4a0] sm:$0xf]  ;;  %v3795_v49 = vunpack.c.l.b16 %v3522_v3 }
 0x22d   :  { %5123 = vmatpush.bf16.msrb.mxu1 %v8185_v21  ;;  %5110 = vmatpush.bf16.msrb.mxu3 %v8041_v40  ;;  %v3521_v21 = vsel %vm3513_vm6, %v10702_v38, %v3505_v56  ;;  %v8264_v40 = vld [vmem:[#allocation8 + $0x200] sm:$0xf]  ;;  %v9896_v63 = vld [vmem:[#allocation8 + $0x4cc] sm:$0xf0]  ;;  %v8409_v32 = vor.u32 %v9844_v6, %v8408_v59  ;;  %v3796_v62 = vunpack.c.h.b16 %v3522_v3  ;;  %v10832_v6 = vld [vmem:[#allocation7] sm:$0xff] }
 0x22e   :  { %v3794_v23 = vunpack.c.h.b16 %v3521_v21  ;;  %v9808_v18 = vld [vmem:[#allocation8 + $0x20c] sm:$0xf0]  ;;  %v3526_v0 = vsel %vm3518_vm11, %v10726_v8, %v3510_v53  ;;  %v8617_v16 = vor.u32 %v9896_v63, %v8616_v54  ;;  %v8728_v28 = vld [vmem:[#allocation8 + $0x5a0] sm:$0xf] }
 0x22f   :  { %5150 = vmatpush.bf16.msrb.mxu0 %v8457_v24  ;;  %v9928_v39 = vld [vmem:[#allocation8 + $0x5cc] sm:$0xf0]  ;;  %v8265_v8 = vor.u32 %v9808_v18, %v8264_v40  ;;  %v3803_v14 = vunpack.c.l.b16 %v3526_v0  ;;  %v3804_v10 = vunpack.c.h.b16 %v3526_v0  ;;  %v10824_v29 = vpop.f32.mrf.mxu3  ;;  %v8696_v38 = vld [vmem:[#allocation8 + $0x560] sm:$0xf] }
 0x230   :  { %5137 = vmatpush.bf16.msrb.mxu2 %v8313_v44  ;;  %v8744_v44 = vld [vmem:[#allocation8 + $0x5c0] sm:$0xf]  ;;  %v9840_v48 = vld [vmem:[#allocation8 + $0x30c] sm:$0xf0]  ;;  %v10836_v24 = vpop.f32.mrf.mxu1 }
 0x231   :  { %5124 = vmatpush.bf16.msrb.mxu1 %v8169_v26  ;;  %5111 = vmatpush.bf16.msrb.mxu3 %v8025_v46  ;;  %v3793_v26 = vunpack.c.l.b16 %v3521_v21  ;;  %v8745_v41 = vor.u32 %v9928_v39, %v8744_v44  ;;  %v9892_v31 = vld [vmem:[#allocation8 + $0x4ac] sm:$0xf0]  ;;  %v3042_v46 = vpop.f32.mrf.mxu0  ;;  %v8393_v22 = vor.u32 %v9840_v48, %v8392_v34  ;;  %v10826_v21 = vpack.c.b16 %v3803_v14, %v3795_v49  ;;  %v8552_v54 = vld [vmem:[#allocation8 + $0x440] sm:$0xf] }
 0x232   :  { %v8601_v42 = vor.u32 %v9892_v31, %v8600_v1  ;;  %v9888_v11 = vld [vmem:[#allocation8 + $0x48c] sm:$0xf0]  ;;  %v10828_v47 = vpack.c.b16 %v3804_v10, %v3796_v62  ;;  %v8680_v18 = vld [vmem:[#allocation8 + $0x540] sm:$0xf] }
 0x233   :  { %5151 = vmatpush.bf16.msrb.mxu0 %v8441_v7  ;;  %v10817_v56 = vpack.c.b16 %v3801_v52, %v3793_v26  ;;  %v10819_v7 = vpack.c.b16 %v3802_v13, %v3794_v23  ;;  %v3056_v35 = vpop.f32.mrf.mxu2  ;;  %v9920_v5 = vld [vmem:[#allocation8 + $0x58c] sm:$0xf0]  ;;  %v3341_v52 = vperm.slane %v10832_v6, 4  ;;  %v3342_v13 = vperm.slane %v10832_v6, 5  ;;  %v8648_v49 = vld [vmem:[#allocation8 + $0x500] sm:$0xf] }
 0x234   :  { %5138 = vmatpush.bf16.msrb.mxu2 %v8297_v45  ;;  %v8584_v45 = vld [vmem:[#allocation8 + $0x480] sm:$0xf]  ;;  %v9884_v59 = vld [vmem:[#allocation8 + $0x46c] sm:$0xf0] }
 0x235   :  { %5125 = vmatpush.bf16.msrb.mxu1 %v8153_v4  ;;  %5112 = vmatpush.bf16.msrb.mxu3 %v8009_v50  ;;  %v9924_v4 = vld [vmem:[#allocation8 + $0x5ac] sm:$0xf0]  ;;  %v8585_v55 = vor.u32 %v9888_v11, %v8584_v45  ;;  %v8568_v50 = vld [vmem:[#allocation8 + $0x460] sm:$0xf]  ;;  %v9770_v45 = vld [vmem:[#allocation8 + $0xe4] sm:$0xf] }
 0x236   :  { %v8729_v12 = vor.u32 %v9924_v4, %v8728_v28  ;;  %v9880_v63 = vld [vmem:[#allocation8 + $0x44c] sm:$0xf0]  ;;  %v8122_v11 = vld [vmem:[#allocation8 + $0xf0] sm:$0xf0] }
 0x237   :  { %5152 = vmatpush.bf16.msrb.mxu0 %v8425_v57  ;;  %v8712_v57 = vld [vmem:[#allocation8 + $0x580] sm:$0xf]  ;;  %v3070_v26 = vpop.f32.mrf.mxu3  ;;  %v9912_v44 = vld [vmem:[#allocation8 + $0x54c] sm:$0xf0]  ;;  %v8553_v0 = vor.u32 %v9880_v63, %v8552_v54 }
 0x238   :  { %5139 = vmatpush.bf16.msrb.mxu2 %v8281_v30  ;;  %5113 = vmatmul.bf16.vlgmr.msrb.gmra.mxu3 %v10817_v56  ;;  %v8713_v53 = vor.u32 %v9920_v5, %v8712_v57  ;;  %v8569_v30 = vor.u32 %v9884_v59, %v8568_v50  ;;  %v9876_v48 = vld [vmem:[#allocation8 + $0x42c] sm:$0xf0]  ;;  %v9802_v5 = vld [vmem:[#allocation8 + $0x1e4] sm:$0xf] }
 0x239   :  { %5126 = vmatpush.bf16.msrb.mxu1 %v8137_v27  ;;  %5161 = vmatpush.bf16.msra.mxu3 %v8633_v9  ;;  %v9916_v27 = vld [vmem:[#allocation8 + $0x56c] sm:$0xf0]  ;;  %v2959_v9 = vadd.f32 %v10718_v58, %v10707_v15  ;;  %v3044_v20 = vpop.f32.mrf.mxu0  ;;  %v8681_v15 = vor.u32 %v9912_v44, %v8680_v18  ;;  %v8536_v58 = vld [vmem:[#allocation8 + $0x420] sm:$0xf] }
 0x23a   :  { %v8697_v40 = vor.u32 %v9916_v27, %v8696_v38  ;;  %v9908_v1 = vld [vmem:[#allocation8 + $0x52c] sm:$0xf0]  ;;  %v8125_v38 = vor.u32 %v9770_v45, %v8122_v11  ;;  %v9754_v11 = vld [vmem:[#allocation8 + $0x64] sm:$0xf] }
 0x23b   :  { %5153 = vmatpush.bf16.msrb.mxu0 %v8409_v32  ;;  %v3355_v32 = vpack.c.bf16 %v3342_v13, %v3341_v52  ;;  %v3058_v23 = vpop.f32.mrf.mxu2  ;;  %v2973_v39 = vadd.f32 %v10687_v33, %v2959_v9  ;;  %v8520_v33 = vld [vmem:[#allocation8 + $0x400] sm:$0xf]  ;;  %v9766_v9 = vld [vmem:[#allocation8 + $0xc4] sm:$0xf] }
 0x23c   :  { %5127 = vmatmul.bf16.vlgmr.msrb.gmra.mxu1 %v10819_v7  ;;  %5140 = vmatpush.bf16.msrb.mxu2 %v8265_v8  ;;  %v3084_v8 = vpop.f32.mrf.mxu1  ;;  %v3059_v57 = vadd.f32 %v3058_v23, %v3044_v20  ;;  %v9798_v20 = vld [vmem:[#allocation8 + $0x1c4] sm:$0xf] }
 0x23d   :  { %5175 = vmatpush.bf16.msra.mxu1 %v8761_v36  ;;  %5162 = vmatpush.bf16.msra.mxu3 %v8617_v16  ;;  %v3057_v36 = vadd.f32 %v3056_v35, %v3042_v46  ;;  %v3365_v16 = vunpack.c.l.b16 %v3355_v32  ;;  %v3366_v3 = vunpack.c.h.b16 %v3355_v32  ;;  %v2987_v31 = vadd.f32 %v10730_v61, %v2973_v39  ;;  %v9872_v35 = vld [vmem:[#allocation8 + $0x40c] sm:$0xf0]  ;;  %v9762_v39 = vld [vmem:[#allocation8 + $0xa4] sm:$0xf] }
 0x23e   :  { %v2961_v46 = vadd.f32 %v10766_v37, %v10759_v60  ;;  %v8250_v60 = vld [vmem:[#allocation8 + $0x1f0] sm:$0xf0] }
 0x23f   :  { %5154 = vmatpush.bf16.msrb.mxu0 %v8393_v22  ;;  %5141 = vmatmul.bf16.vlgmr.msrb.gmra.mxu2 %v10826_v21  ;;  %v3071_v34 = vadd.f32 %v3070_v26, %v3057_v36  ;;  %v8537_v22 = vor.u32 %v9876_v48, %v8536_v58  ;;  %v3373_v4 = vpack.c.b16 %v3365_v16, %v3365_v16  ;;  %v9794_v58 = vld [vmem:[#allocation8 + $0x1a4] sm:$0xf]  ;;  %v8218_v48 = vld [vmem:[#allocation8 + $0x1b0] sm:$0xf0] }
 0x240   :  { %v3374_v10 = vpack.c.b16 %v3366_v3, %v3366_v3  ;;  %v3001_v61 = vadd.f32 %v10799_v51, %v2987_v31  ;;  %v2975_v37 = vadd.f32 %v10709_v19, %v2961_v46  ;;  %v8253_v27 = vor.u32 %v9802_v5, %v8250_v60 }
 0x241   :  { %5176 = vmatpush.bf16.msra.mxu1 %v8745_v41  ;;  %5163 = vmatpush.bf16.msra.mxu3 %v8601_v42  ;;  %v8664_v41 = vld [vmem:[#allocation8 + $0x520] sm:$0xf]  ;;  %v3085_v14 = vadd.f32 %v3084_v8, %v3071_v34  ;;  %v9904_v42 = vld [vmem:[#allocation8 + $0x50c] sm:$0xf0]  ;;  %v3098_v62 = vpop.f32.mrf.mxu0  ;;  %v3394_v52 = vpack.i.b16 %v3373_v4, %v3373_v4  ;;  %v8221_v46 = vor.u32 %v9794_v58, %v8218_v48  ;;  %v9790_v4 = vld [vmem:[#allocation8 + $0x184] sm:$0xf] }
 0x242   :  { %5155 = vmatmul.bf16.vlgmr.msrb.gmra.mxu0 %v10828_v47  ;;  %v8665_v28 = vor.u32 %v9908_v1, %v8664_v41  ;;  %v8649_v50 = vor.u32 %v9904_v42, %v8648_v49  ;;  %v3398_v13 = vpack.i.b16 %v3374_v10, %v3374_v10  ;;  %v3015_v36 = vadd.f32 %v10815_v43, %v3001_v61  ;;  %v8090_v43 = vld [vmem:[#allocation8 + $0xb0] sm:$0xf0]  ;;  %v9742_v58 = vld [vmem:[#allocation8 + $0x4] sm:$0xf] }
 0x243   :  { %v3099_v59 = vadd.f32 %v3098_v62, %v3085_v14  ;;  %v2989_v54 = vadd.f32 %v10781_v17, %v2975_v37  ;;  %v10848_v32 = vperm.slane %v3394_v52, 0  ;;  %v8093_v1 = vor.u32 %v9762_v39, %v8090_v43  ;;  %v8202_v10 = vld [vmem:[#allocation8 + $0x190] sm:$0xf0] }
 0x244   :  { %v3086_v19 = vpop.f32.mrf.mxu1  ;;  %v10850_v26 = vperm.slane %v3398_v13, 0  ;;  %v8205_v45 = vor.u32 %v9790_v4, %v8202_v10  ;;  %v8058_v61 = vld [vmem:[#allocation8 + $0x70] sm:$0xf0] }
 0x245   :  { %5177 = vmatpush.bf16.msra.mxu1 %v8729_v12  ;;  %5164 = vmatpush.bf16.msra.mxu3 %v8585_v55  ;;  %v3072_v12 = vpop.f32.mrf.mxu3  ;;  %v3112_v55 = vpop.f32.mrf.mxu2  ;;  %v3003_v34 = vadd.f32 %v10824_v29, %v2989_v54  ;;  %v3429_v8 = vunpack.c.l.bf16 %v10848_v32  ;;  %v8186_v37 = vld [vmem:[#allocation8 + $0x170] sm:$0xf0] }
 0x246   :  { %v3073_v51 = vadd.f32 %v3072_v12, %v3059_v57  ;;  %v3113_v63 = vadd.f32 %v3112_v55, %v3099_v59  ;;  %v3430_v41 = vunpack.c.l.bf16 %v10850_v26  ;;  %v9778_v26 = vld [vmem:[#allocation8 + $0x124] sm:$0xf]  ;;  %v8010_v48 = vld [vmem:[#allocation8 + $0x10] sm:$0xf0] }
 0x247   :  { %v8634_v10 = vld [vmem:[#allocation8 + $0x4f0] sm:$0xf0] }
 0x248   :  { %v3087_v17 = vadd.f32 %v3086_v19, %v3073_v51 }
 0x249   :  { %5178 = vmatpush.bf16.msra.mxu1 %v8713_v53  ;;  %5165 = vmatpush.bf16.msra.mxu3 %v8569_v30  ;;  %v8521_v53 = vor.u32 %v9872_v35, %v8520_v33  ;;  %v8106_v30 = vld [vmem:[#allocation8 + $0xd0] sm:$0xf0]  ;;  %v3100_v16 = vpop.f32.mrf.mxu0 }
 0x24a   :  { %v8109_v23 = vor.u32 %v9766_v9, %v8106_v30  ;;  %v8074_v33 = vld [vmem:[#allocation8 + $0x90] sm:$0xf0]  ;;  %v3101_v29 = vadd.f32 %v3100_v16, %v3087_v17  ;;  %v9774_v16 = vld [vmem:[#allocation8 + $0x104] sm:$0xf] }
 0x24b   :  { %v8170_v9 = vld [vmem:[#allocation8 + $0x150] sm:$0xf0] }
 0x24d   :  { %5179 = vmatpush.bf16.msra.mxu1 %v8697_v40  ;;  %5166 = vmatpush.bf16.msra.mxu3 %v8553_v0  ;;  %v8234_v40 = vld [vmem:[#allocation8 + $0x1d0] sm:$0xf0]  ;;  %v3126_v18 = vpop.f32.mrf.mxu3  ;;  %v3029_v0 = vadd.f32 %v10740_v2, %v3015_v36  ;;  %v3114_v31 = vpop.f32.mrf.mxu2  ;;  %v3017_v2 = vadd.f32 %v10836_v24, %v3003_v34  ;;  %v9786_v24 = vld [vmem:[#allocation8 + $0x164] sm:$0xf] }
 0x24e   :  { %v8237_v44 = vor.u32 %v9798_v20, %v8234_v40  ;;  %v3115_v42 = vadd.f32 %v3114_v31, %v3101_v29  ;;  %v8189_v13 = vor.u32 %v9786_v24, %v8186_v37  ;;  %v9746_v20 = vld [vmem:[#allocation8 + $0x24] sm:$0xf]  ;;  %v8026_v40 = vld [vmem:[#allocation8 + $0x30] sm:$0xf0]  ;;  %v8872_v24 = vld [vmem:[#allocation8 + $0x6c0] sm:$0xf] }
 0x24f   :  { %v3031_v57 = vadd.f32 %v10801_v25, %v3017_v2  ;;  %v8029_v39 = vor.u32 %v9746_v20, %v8026_v40  ;;  %v9964_v2 = vld [vmem:[#allocation8 + $0x6ec] sm:$0xf0]  ;;  %v8856_v20 = vld [vmem:[#allocation8 + $0x6a0] sm:$0xf] }
 0x250   :  { %v9960_v37 = vld [vmem:[#allocation8 + $0x6cc] sm:$0xf0] }
 0x251   :  { %5180 = vmatpush.bf16.msra.mxu1 %v8681_v15  ;;  %5167 = vmatpush.bf16.msra.mxu3 %v8537_v22  ;;  %v3127_v15 = vadd.f32 %v3126_v18, %v3113_v63  ;;  %v9758_v22 = vld [vmem:[#allocation8 + $0x84] sm:$0xf]  ;;  %v9956_v40 = vld [vmem:[#allocation8 + $0x6ac] sm:$0xf0] }
 0x252   :  { %v8077_v62 = vor.u32 %v9758_v22, %v8074_v33  ;;  %v9898_v22 = vld [vmem:[#allocation8 + $0x4e4] sm:$0xf]  ;;  %v8888_v33 = vld [vmem:[#allocation8 + $0x6e0] sm:$0xf] }
 0x253   :  { %v3329_v3 = vpack.c.bf16 %v3127_v15, %v3029_v0 }
 0x255   :  { %5181 = vmatpush.bf16.msra.mxu1 %v8665_v28  ;;  %5168 = vmatpush.bf16.msra.mxu3 %v8521_v53  ;;  %v3413_v14 = vunpack.c.l.bf16 %v3329_v3  ;;  %v3414_v28 = vunpack.c.h.bf16 %v3329_v3  ;;  %v3128_v12 = vpop.f32.mrf.mxu3  ;;  %v8061_v53 = vor.u32 %v9754_v11, %v8058_v61  ;;  %v8138_v3 = vld [vmem:[#allocation8 + $0x110] sm:$0xf0] }
 0x256   :  { %v3129_v60 = vadd.f32 %v3128_v12, %v3115_v42  ;;  %v8141_v4 = vor.u32 %v9774_v16, %v8138_v3  ;;  %v9996_v42 = vld [vmem:[#allocation8 + $0x7ec] sm:$0xf0]  ;;  %v8762_v12 = vld [vmem:[#allocation8 + $0x5f0] sm:$0xf0]  ;;  %v8968_v3 = vld [vmem:[#allocation8 + $0x780] sm:$0xf] }
 0x257   :  { %v3437_v35 = vadd.f32 %v3429_v8, %v3413_v14  ;;  %v3438_v49 = vadd.f32 %v3430_v41, %v3414_v28  ;;  %v10878_v28 = vpop.f32.mrf.mxu0 }
 0x258   :  { %v3333_v55 = vpack.c.bf16 %v3129_v60, %v3031_v57 }
 0x259   :  { %5182 = vmatpush.bf16.msra.mxu1 %v8649_v50  ;;  %5217 = vmatpush.bf16.msrb.mxu3 %v8125_v38  ;;  %v3451_v5 = vpack.c.bf16 %v3438_v49, %v3437_v35  ;;  %v9750_v50 = vld [vmem:[#allocation8 + $0x44] sm:$0xf]  ;;  %v8042_v38 = vld [vmem:[#allocation8 + $0x50] sm:$0xf0]  ;;  %v8889_v35 = vor.u32 %v9964_v2, %v8888_v33  ;;  %v9016_v49 = vld [vmem:[#allocation8 + $0x7e0] sm:$0xf] }
 0x25a   :  { %v3421_v30 = vunpack.c.l.bf16 %v3333_v55  ;;  %v3422_v36 = vunpack.c.h.bf16 %v3333_v55  ;;  %v8045_v51 = vor.u32 %v9750_v50, %v8042_v38  ;;  %v8637_v55 = vor.u32 %v9898_v22, %v8634_v10  ;;  %v9894_v50 = vld [vmem:[#allocation8 + $0x4c4] sm:$0xf]  ;;  %v10884_v38 = vpop.f32.mrf.mxu1  ;;  %v8824_v2 = vld [vmem:[#allocation8 + $0x660] sm:$0xf] }
 0x25b   :  { %v3461_v59 = vunpack.c.l.bf16 %v3451_v5  ;;  %v3462_v52 = vunpack.c.h.bf16 %v3451_v5  ;;  %5189 = vmatpush.bf16.msra.mxu2 %v8889_v35  ;;  %v9882_v35 = vld [vmem:[#allocation8 + $0x464] sm:$0xf] }
 0x25c   :  { %v3445_v63 = vadd.f32 %v3429_v8, %v3421_v30  ;;  %v3446_v32 = vadd.f32 %v3430_v41, %v3422_v36  ;;  %v8618_v30 = vld [vmem:[#allocation8 + $0x4d0] sm:$0xf0]  ;;  %v9926_v36 = vld [vmem:[#allocation8 + $0x5c4] sm:$0xf]  ;;  %v9984_v8 = vld [vmem:[#allocation8 + $0x78c] sm:$0xf0] }
 0x25d   :  { %5231 = vmatpush.bf16.msrb.mxu1 %v8253_v27  ;;  %5218 = vmatpush.bf16.msrb.mxu3 %v8109_v23  ;;  %v9782_v27 = vld [vmem:[#allocation8 + $0x144] sm:$0xf]  ;;  %v3493_v54 = vmul.f32 0.20019531, %v3461_v59  ;;  %v3494_v19 = vmul.f32 0.20019531, %v3462_v52  ;;  %v8154_v23 = vld [vmem:[#allocation8 + $0x130] sm:$0xf0]  ;;  %v10894_v22 = vpop.f32.mrf.mxu3 }
 0x25e   :  { %v8173_v25 = vor.u32 %v9782_v27, %v8170_v9  ;;  %v3455_v18 = vpack.c.bf16 %v3446_v32, %v3445_v63  ;;  %vm10858_vm13 = vcmp.gt.f32.partialorder %v3461_v59, 0.0  ;;  %v8157_v43 = vor.u32 %v9778_v26, %v8154_v23  ;;  %v9890_v63 = vld [vmem:[#allocation8 + $0x4a4] sm:$0xf]  ;;  %v8984_v26 = vld [vmem:[#allocation8 + $0x7a0] sm:$0xf] }
 0x25f   :  { %vm10862_vm14 = vcmp.gt.f32.partialorder %v3462_v52, 0.0  ;;  %v3507_v34 = vpack.c.bf16 %v3494_v19, %v3493_v54  ;;  %v8873_v59 = vor.u32 %v9960_v37, %v8872_v24  ;;  %v9000_v52 = vld [vmem:[#allocation8 + $0x7c0] sm:$0xf]  ;;  %v8621_v54 = vor.u32 %v9894_v50, %v8618_v30  ;;  %v9988_v23 = vld [vmem:[#allocation8 + $0x7ac] sm:$0xf0]  ;;  %v10892_v0 = vpop.f32.mrf.mxu0 }
 0x260   :  { %v3469_v17 = vunpack.c.l.bf16 %v3455_v18  ;;  %v3470_v15 = vunpack.c.h.bf16 %v3455_v18  ;;  %vm3515_vm1 = vmpackc.low %vm10862_vm14, %vm10858_vm13  ;;  %v8857_v32 = vor.u32 %v9956_v40, %v8856_v20  ;;  %v8586_v41 = vld [vmem:[#allocation8 + $0x490] sm:$0xf0]  ;;  %v8936_v50 = vld [vmem:[#allocation8 + $0x740] sm:$0xf] }
 0x261   :  { %5232 = vmatpush.bf16.msrb.mxu1 %v8237_v44  ;;  %5219 = vmatpush.bf16.msrb.mxu3 %v8093_v1  ;;  %v3523_v29 = vsel %vm3515_vm1, %v3451_v5, %v3507_v34  ;;  %v9922_v44 = vld [vmem:[#allocation8 + $0x5a4] sm:$0xf]  ;;  %v8840_v34 = vld [vmem:[#allocation8 + $0x680] sm:$0xf]  ;;  %v8682_v30 = vld [vmem:[#allocation8 + $0x550] sm:$0xf0] }
 0x262   :  { %vm10866_vm15 = vcmp.gt.f32.partialorder %v3469_v17, 0.0  ;;  %vm10870_vm0 = vcmp.gt.f32.partialorder %v3470_v15, 0.0  ;;  %v3501_v1 = vmul.f32 0.20019531, %v3469_v17  ;;  %v3502_v31 = vmul.f32 0.20019531, %v3470_v15  ;;  %5190 = vmatpush.bf16.msra.mxu2 %v8873_v59  ;;  %v9952_v17 = vld [vmem:[#allocation8 + $0x68c] sm:$0xf0]  ;;  %v10896_v33 = vpop.f32.mrf.mxu1 }
 0x263   :  { %vm3519_vm2 = vmpackc.low %vm10870_vm0, %vm10866_vm15  ;;  %v3797_v61 = vunpack.c.l.b16 %v3523_v29  ;;  %v3798_v5 = vunpack.c.h.b16 %v3523_v29  ;;  %v8841_v16 = vor.u32 %v9952_v17, %v8840_v34  ;;  %v9948_v29 = vld [vmem:[#allocation8 + $0x66c] sm:$0xf0]  ;;  %v8920_v40 = vld [vmem:[#allocation8 + $0x720] sm:$0xf] }
 0x264   :  { %v3511_v14 = vpack.c.bf16 %v3502_v31, %v3501_v1  ;;  %v9918_v1 = vld [vmem:[#allocation8 + $0x584] sm:$0xf]  ;;  %v8714_v31 = vld [vmem:[#allocation8 + $0x590] sm:$0xf0]  ;;  %v9976_v59 = vld [vmem:[#allocation8 + $0x74c] sm:$0xf0] }
 0x265   :  { %5233 = vmatpush.bf16.msrb.mxu1 %v8221_v46  ;;  %5220 = vmatpush.bf16.msrb.mxu3 %v8077_v62  ;;  %v8013_v46 = vor.u32 %v9742_v58, %v8010_v48  ;;  %v9930_v62 = vld [vmem:[#allocation8 + $0x5e4] sm:$0xf]  ;;  %v8717_v10 = vor.u32 %v9918_v1, %v8714_v31  ;;  %v9940_v20 = vld [vmem:[#allocation8 + $0x62c] sm:$0xf0]  ;;  %v8522_v17 = vld [vmem:[#allocation8 + $0x410] sm:$0xf0] }
 0x266   :  { %v3527_v11 = vsel %vm3519_vm2, %v3455_v18, %v3511_v14  ;;  %v8602_v18 = vld [vmem:[#allocation8 + $0x4b0] sm:$0xf0]  ;;  %5191 = vmatpush.bf16.msra.mxu2 %v8857_v32  ;;  %v9886_v48 = vld [vmem:[#allocation8 + $0x484] sm:$0xf]  ;;  %v8952_v14 = vld [vmem:[#allocation8 + $0x760] sm:$0xf] }
 0x267   :  { %v3805_v57 = vunpack.c.l.b16 %v3527_v11  ;;  %v3806_v60 = vunpack.c.h.b16 %v3527_v11  ;;  %v8605_v15 = vor.u32 %v9890_v63, %v8602_v18  ;;  %v9874_v32 = vld [vmem:[#allocation8 + $0x424] sm:$0xf]  ;;  %v8538_v18 = vld [vmem:[#allocation8 + $0x430] sm:$0xf0]  ;;  %v8128_v1 = vld [vmem:[#allocation8 + $0xe8] sm:$0xf] }
 0x268   :  { %v9870_v34 = vld [vmem:[#allocation8 + $0x404] sm:$0xf]  ;;  %v8904_v31 = vld [vmem:[#allocation8 + $0x700] sm:$0xf] }
 0x269   :  { %5234 = vmatpush.bf16.msrb.mxu1 %v8205_v45  ;;  %5221 = vmatpush.bf16.msrb.mxu3 %v8061_v53  ;;  %v9017_v45 = vor.u32 %v9996_v42, %v9016_v49  ;;  %v8765_v53 = vor.u32 %v9930_v62, %v8762_v12  ;;  %v10886_v27 = vpack.c.b16 %v3805_v57, %v3797_v61  ;;  %v9980_v42 = vld [vmem:[#allocation8 + $0x76c] sm:$0xf0]  ;;  %v8570_v62 = vld [vmem:[#allocation8 + $0x470] sm:$0xf0]  ;;  %v9914_v12 = vld [vmem:[#allocation8 + $0x564] sm:$0xf]  ;;  %v10898_v61 = vpop.f32.mrf.mxu0 }
 0x26a   :  { %v10888_v9 = vpack.c.b16 %v3806_v60, %v3798_v5  ;;  %5192 = vmatpush.bf16.msra.mxu2 %v8841_v16  ;;  %v8825_v49 = vor.u32 %v9948_v29, %v8824_v2  ;;  %v8953_v11 = vor.u32 %v9980_v42, %v8952_v14  ;;  %v8808_v57 = vld [vmem:[#allocation8 + $0x640] sm:$0xf]  ;;  %v9944_v5 = vld [vmem:[#allocation8 + $0x64c] sm:$0xf0]  ;;  %v10900_v60 = vpop.f32.mrf.mxu2  ;;  %v8573_v24 = vor.u32 %v9882_v35, %v8570_v62  ;;  %v9834_v2 = vld [vmem:[#allocation8 + $0x2e4] sm:$0xf] }
 0x26b   :  { %5203 = vmatpush.bf16.msra.mxu0 %v9017_v45  ;;  %5169 = vmatmul.bf16.vlgmr.msra.gmra.mxu3 %v10886_v27  ;;  %v8698_v45 = vld [vmem:[#allocation8 + $0x570] sm:$0xf0]  ;;  %v9936_v16 = vld [vmem:[#allocation8 + $0x60c] sm:$0xf0]  ;;  %v9773_v42 = vld [vmem:[#allocation8 + $0xf4] sm:$0xf0] }
 0x26c   :  { %5183 = vmatmul.bf16.vlgmr.msra.gmra.mxu1 %v10888_v9  ;;  %v8701_v37 = vor.u32 %v9914_v12, %v8698_v45  ;;  %v8506_v35 = vld [vmem:[#allocation8 + $0x3f0] sm:$0xf0]  ;;  %v8256_v62 = vld [vmem:[#allocation8 + $0x1e8] sm:$0xf]  ;;  %v9805_v12 = vld [vmem:[#allocation8 + $0x1f4] sm:$0xf0] }
 0x26d   :  { %5235 = vmatpush.bf16.msrb.mxu1 %v8189_v13  ;;  %5222 = vmatpush.bf16.msrb.mxu3 %v8045_v51  ;;  %v9992_v13 = vld [vmem:[#allocation8 + $0x7cc] sm:$0xf0]  ;;  %v8746_v51 = vld [vmem:[#allocation8 + $0x5d0] sm:$0xf0] }
 0x26e   :  { %v8749_v19 = vor.u32 %v9926_v36, %v8746_v51  ;;  %5193 = vmatpush.bf16.msra.mxu2 %v8825_v49  ;;  %v8937_v36 = vor.u32 %v9976_v59, %v8936_v50  ;;  %v10902_v51 = vpop.f32.mrf.mxu1  ;;  %v8129_v50 = vor.u32 %v9773_v42, %v8128_v1  ;;  %v8257_v59 = vor.u32 %v9805_v12, %v8256_v62  ;;  %v9822_v1 = vld [vmem:[#allocation8 + $0x284] sm:$0xf]  ;;  %v9761_v42 = vld [vmem:[#allocation8 + $0x94] sm:$0xf0]  ;;  %v8208_v62 = vld [vmem:[#allocation8 + $0x188] sm:$0xf] }
 0x26f   :  { %v9793_v12 = vld [vmem:[#allocation8 + $0x194] sm:$0xf0] }
 0x271   :  { %5236 = vmatpush.bf16.msrb.mxu1 %v8173_v25  ;;  %5223 = vmatpush.bf16.msrb.mxu3 %v8029_v39  ;;  %v9001_v25 = vor.u32 %v9992_v13, %v9000_v52  ;;  %v8730_v39 = vld [vmem:[#allocation8 + $0x5b0] sm:$0xf0]  ;;  %v9910_v13 = vld [vmem:[#allocation8 + $0x544] sm:$0xf] }
 0x272   :  { %v8733_v58 = vor.u32 %v9922_v44, %v8730_v39  ;;  %v8554_v52 = vld [vmem:[#allocation8 + $0x450] sm:$0xf0]  ;;  %v8685_v63 = vor.u32 %v9910_v13, %v8682_v30  ;;  %v9906_v44 = vld [vmem:[#allocation8 + $0x524] sm:$0xf]  ;;  %v10910_v49 = vpop.f32.mrf.mxu2 }
 0x273   :  { %5204 = vmatpush.bf16.msra.mxu0 %v9001_v25  ;;  %v8792_v25 = vld [vmem:[#allocation8 + $0x620] sm:$0xf]  ;;  %v8666_v39 = vld [vmem:[#allocation8 + $0x530] sm:$0xf0]  ;;  %v9862_v13 = vld [vmem:[#allocation8 + $0x3c4] sm:$0xf] }
 0x274   :  { %v8490_v30 = vld [vmem:[#allocation8 + $0x3d0] sm:$0xf0] }
 0x275   :  { %5237 = vmatpush.bf16.msrb.mxu1 %v8157_v43  ;;  %5224 = vmatpush.bf16.msrb.mxu3 %v8013_v46  ;;  %v8985_v43 = vor.u32 %v9988_v23, %v8984_v26  ;;  %v8969_v46 = vor.u32 %v9984_v8, %v8968_v3  ;;  %v8793_v26 = vor.u32 %v9940_v20, %v8792_v25  ;;  %v9972_v23 = vld [vmem:[#allocation8 + $0x72c] sm:$0xf0]  ;;  %v10908_v3 = vpop.f32.mrf.mxu0  ;;  %v8240_v25 = vld [vmem:[#allocation8 + $0x1c8] sm:$0xf]  ;;  %v9801_v20 = vld [vmem:[#allocation8 + $0x1d4] sm:$0xf0] }
 0x276   :  { %v8541_v8 = vor.u32 %v9874_v32, %v8538_v18  ;;  %v8346_v32 = vld [vmem:[#allocation8 + $0x2b0] sm:$0xf0]  ;;  %v8096_v18 = vld [vmem:[#allocation8 + $0xa8] sm:$0xf] }
 0x277   :  { %5205 = vmatpush.bf16.msra.mxu0 %v8985_v43  ;;  %v8921_v43 = vor.u32 %v9972_v23, %v8920_v40  ;;  %v8241_v23 = vor.u32 %v9801_v20, %v8240_v25  ;;  %v9789_v25 = vld [vmem:[#allocation8 + $0x174] sm:$0xf0] }
 0x279   :  { %5238 = vmatpush.bf16.msrb.mxu1 %v8141_v4  ;;  %5273 = vmatpush.bf16.msra.mxu3 %v8637_v55  ;;  %v8589_v4 = vor.u32 %v9886_v48, %v8586_v41  ;;  %v9878_v55 = vld [vmem:[#allocation8 + $0x444] sm:$0xf]  ;;  %v8776_v48 = vld [vmem:[#allocation8 + $0x600] sm:$0xf]  ;;  %v8669_v41 = vor.u32 %v9906_v44, %v8666_v39  ;;  %v8474_v39 = vld [vmem:[#allocation8 + $0x3b0] sm:$0xf0] }
 0x27a   :  { %v8777_v29 = vor.u32 %v9936_v16, %v8776_v48  ;;  %v9858_v44 = vld [vmem:[#allocation8 + $0x3a4] sm:$0xf] }
 0x27b   :  { %5206 = vmatpush.bf16.msra.mxu0 %v8969_v46  ;;  %5225 = vmatmul.bf16.vlgmr.msrb.gmra.mxu3 %v10817_v56  ;;  %v9968_v46 = vld [vmem:[#allocation8 + $0x70c] sm:$0xf0]  ;;  %v8477_v16 = vor.u32 %v9858_v44, %v8474_v39 }
 0x27c   :  { %5239 = vmatmul.bf16.vlgmr.msrb.gmra.mxu1 %v10819_v7  ;;  %v8905_v14 = vor.u32 %v9968_v46, %v8904_v31  ;;  %v8330_v31 = vld [vmem:[#allocation8 + $0x290] sm:$0xf0] }
 0x27d   :  { %5287 = vmatpush.bf16.msra.mxu1 %v8765_v53  ;;  %5274 = vmatpush.bf16.msra.mxu3 %v8621_v54  ;;  %v8809_v53 = vor.u32 %v9944_v5, %v8808_v57  ;;  %v10906_v54 = vpop.f32.mrf.mxu3  ;;  %v8525_v5 = vor.u32 %v9870_v34, %v8522_v17  ;;  %v3252_v34 = vpop.f32.mrf.mxu0  ;;  %v9765_v17 = vld [vmem:[#allocation8 + $0xb4] sm:$0xf0] }
 0x27f   :  { %5207 = vmatpush.bf16.msra.mxu0 %v8953_v11  ;;  %5194 = vmatpush.bf16.msra.mxu2 %v8809_v53  ;;  %v10914_v53 = vpop.f32.mrf.mxu1 }
 0x281   :  { %5288 = vmatpush.bf16.msra.mxu1 %v8749_v19  ;;  %5275 = vmatpush.bf16.msra.mxu3 %v8605_v15  ;;  %v8557_v19 = vor.u32 %v9878_v55, %v8554_v52  ;;  %v9902_v15 = vld [vmem:[#allocation8 + $0x504] sm:$0xf]  ;;  %v8362_v52 = vld [vmem:[#allocation8 + $0x2d0] sm:$0xf0] }
 0x282   :  { %v9830_v55 = vld [vmem:[#allocation8 + $0x2c4] sm:$0xf] }
 0x283   :  { %5208 = vmatpush.bf16.msra.mxu0 %v8937_v36  ;;  %5195 = vmatpush.bf16.msra.mxu2 %v8793_v26  ;;  %v9769_v36 = vld [vmem:[#allocation8 + $0xd4] sm:$0xf0]  ;;  %v8365_v40 = vor.u32 %v9830_v55, %v8362_v52  ;;  %v9850_v52 = vld [vmem:[#allocation8 + $0x364] sm:$0xf] }
 0x285   :  { %5289 = vmatpush.bf16.msra.mxu1 %v8733_v58  ;;  %5276 = vmatpush.bf16.msra.mxu3 %v8589_v4  ;;  %v8650_v58 = vld [vmem:[#allocation8 + $0x510] sm:$0xf0]  ;;  %v10912_v57 = vpop.f32.mrf.mxu3 }
 0x286   :  { %v8378_v4 = vld [vmem:[#allocation8 + $0x2f0] sm:$0xf0] }
 0x287   :  { %5209 = vmatpush.bf16.msra.mxu0 %v8921_v43  ;;  %v8381_v45 = vor.u32 %v9834_v2, %v8378_v4  ;;  %5196 = vmatpush.bf16.msra.mxu2 %v8777_v29  ;;  %v3238_v43 = vpop.f32.mrf.mxu2  ;;  %v8097_v2 = vor.u32 %v9765_v17, %v8096_v18  ;;  %v9854_v4 = vld [vmem:[#allocation8 + $0x384] sm:$0xf] }
 0x288   :  { %v3253_v18 = vadd.f32 %v3252_v34, %v3238_v43  ;;  %v3157_v34 = vadd.f32 %v10906_v54, %v10896_v33 }
 0x289   :  { %5290 = vmatpush.bf16.msra.mxu1 %v8717_v10  ;;  %5277 = vmatpush.bf16.msra.mxu3 %v8573_v24  ;;  %v9866_v10 = vld [vmem:[#allocation8 + $0x3e4] sm:$0xf]  ;;  %v8653_v24 = vor.u32 %v9902_v15, %v8650_v58  ;;  %v8224_v15 = vld [vmem:[#allocation8 + $0x1a8] sm:$0xf]  ;;  %v9797_v58 = vld [vmem:[#allocation8 + $0x1b4] sm:$0xf0] }
 0x28a   :  { %v8509_v11 = vor.u32 %v9866_v10, %v8506_v35  ;;  %v8225_v29 = vor.u32 %v9797_v58, %v8224_v15  ;;  %v8458_v10 = vld [vmem:[#allocation8 + $0x390] sm:$0xf0]  ;;  %v8048_v15 = vld [vmem:[#allocation8 + $0x48] sm:$0xf]  ;;  %v9846_v58 = vld [vmem:[#allocation8 + $0x344] sm:$0xf] }
 0x28b   :  { %5210 = vmatpush.bf16.msra.mxu0 %v8905_v14  ;;  %5245 = vmatpush.bf16.msrb.mxu2 %v8381_v45  ;;  %v8080_v14 = vld [vmem:[#allocation8 + $0x88] sm:$0xf]  ;;  %v8333_v45 = vor.u32 %v9822_v1, %v8330_v31 }
 0x28c   :  { %v8081_v55 = vor.u32 %v9761_v42, %v8080_v14  ;;  %v9810_v14 = vld [vmem:[#allocation8 + $0x224] sm:$0xf] }
 0x28d   :  { %5291 = vmatpush.bf16.msra.mxu1 %v8701_v37  ;;  %5278 = vmatpush.bf16.msra.mxu3 %v8557_v19  ;;  %v8112_v37 = vld [vmem:[#allocation8 + $0xc8] sm:$0xf]  ;;  %v8493_v19 = vor.u32 %v9862_v13, %v8490_v30  ;;  %v10920_v35 = vpop.f32.mrf.mxu3  ;;  %v8442_v13 = vld [vmem:[#allocation8 + $0x370] sm:$0xf0]  ;;  %v9757_v30 = vld [vmem:[#allocation8 + $0x74] sm:$0xf0] }
 0x28e   :  { %v8113_v26 = vor.u32 %v9769_v36, %v8112_v37  ;;  %v8314_v37 = vld [vmem:[#allocation8 + $0x270] sm:$0xf0]  ;;  %v8192_v36 = vld [vmem:[#allocation8 + $0x168] sm:$0xf] }
 0x28f   :  { %5259 = vmatpush.bf16.msrb.mxu0 %v8509_v11  ;;  %5246 = vmatpush.bf16.msrb.mxu2 %v8365_v40  ;;  %v8461_v11 = vor.u32 %v9854_v4, %v8458_v10  ;;  %v8445_v40 = vor.u32 %v9850_v52, %v8442_v13  ;;  %v8193_v17 = vor.u32 %v9789_v25, %v8192_v36  ;;  %v8282_v4 = vld [vmem:[#allocation8 + $0x230] sm:$0xf0]  ;;  %v9806_v36 = vld [vmem:[#allocation8 + $0x204] sm:$0xf] }
 0x290   :  { %v8266_v25 = vld [vmem:[#allocation8 + $0x210] sm:$0xf0] }
 0x291   :  { %5292 = vmatpush.bf16.msra.mxu1 %v8685_v63  ;;  %5279 = vmatpush.bf16.msra.mxu3 %v8541_v8  ;;  %v9826_v63 = vld [vmem:[#allocation8 + $0x2a4] sm:$0xf]  ;;  %v3343_v8 = vperm.slane %v10832_v6, 6 }
 0x292   :  { %v8349_v48 = vor.u32 %v9826_v63, %v8346_v32  ;;  %v10927_v32 = vpop.f32.mrf.mxu0 }
 0x293   :  { %5260 = vmatpush.bf16.msrb.mxu0 %v8493_v19 }
 0x294   :  { %5247 = vmatpush.bf16.msrb.mxu2 %v8349_v48  ;;  %v8426_v48 = vld [vmem:[#allocation8 + $0x350] sm:$0xf0] }
 0x295   :  { %5293 = vmatpush.bf16.msra.mxu1 %v8669_v41  ;;  %5280 = vmatpush.bf16.msra.mxu3 %v8525_v5  ;;  %v3344_v41 = vperm.slane %v10832_v6, 7  ;;  %v3155_v5 = vadd.f32 %v10894_v22, %v10884_v38  ;;  %v10925_v22 = vpop.f32.mrf.mxu2  ;;  %v8429_v31 = vor.u32 %v9846_v58, %v8426_v48 }
 0x296   :  { %v3255_v58 = vadd.f32 %v10927_v32, %v10925_v22 }
 0x297   :  { %5261 = vmatpush.bf16.msrb.mxu0 %v8477_v16  ;;  %v3356_v6 = vpack.c.bf16 %v3344_v41, %v3343_v8  ;;  %v3169_v38 = vadd.f32 %v10878_v28, %v3155_v5  ;;  %v9753_v8 = vld [vmem:[#allocation8 + $0x54] sm:$0xf0]  ;;  %v8176_v41 = vld [vmem:[#allocation8 + $0x148] sm:$0xf] }
 0x298   :  { %5281 = vmatmul.bf16.vlgmr.msra.gmra.mxu3 %v10886_v27  ;;  %5248 = vmatpush.bf16.msrb.mxu2 %v8333_v45  ;;  %v9785_v28 = vld [vmem:[#allocation8 + $0x154] sm:$0xf0]  ;;  %v8049_v42 = vor.u32 %v9753_v8, %v8048_v15  ;;  %v9842_v45 = vld [vmem:[#allocation8 + $0x324] sm:$0xf] }
 0x299   :  { %5294 = vmatpush.bf16.msra.mxu1 %v8653_v24  ;;  %5329 = vmatpush.bf16.msrb.mxu3 %v8129_v50  ;;  %v3266_v46 = vpop.f32.mrf.mxu1  ;;  %v9818_v24 = vld [vmem:[#allocation8 + $0x264] sm:$0xf]  ;;  %v8209_v50 = vor.u32 %v9793_v12, %v8208_v62  ;;  %v3367_v19 = vunpack.c.l.b16 %v3356_v6  ;;  %v3368_v63 = vunpack.c.h.b16 %v3356_v6  ;;  %v3183_v43 = vadd.f32 %v10900_v60, %v3169_v38  ;;  %v8032_v12 = vld [vmem:[#allocation8 + $0x28] sm:$0xf]  ;;  %v9749_v5 = vld [vmem:[#allocation8 + $0x34] sm:$0xf0] }
 0x29a   :  { %v8317_v20 = vor.u32 %v9818_v24, %v8314_v37  ;;  %v3267_v10 = vadd.f32 %v3266_v46, %v3253_v18  ;;  %v8177_v62 = vor.u32 %v9785_v28, %v8176_v41  ;;  %v8160_v24 = vld [vmem:[#allocation8 + $0x128] sm:$0xf]  ;;  %v9781_v37 = vld [vmem:[#allocation8 + $0x134] sm:$0xf0]  ;;  %v8285_v60 = vor.u32 %v9810_v14, %v8282_v4  ;;  %v8394_v38 = vld [vmem:[#allocation8 + $0x310] sm:$0xf0] }
 0x29b   :  { %5262 = vmatpush.bf16.msrb.mxu0 %v8461_v11  ;;  %v3280_v16 = vpop.f32.mrf.mxu3  ;;  %v8410_v11 = vld [vmem:[#allocation8 + $0x330] sm:$0xf0]  ;;  %v3197_v6 = vadd.f32 %v10902_v51, %v3183_v43  ;;  %v8016_v46 = vld [vmem:[#allocation8 + $0x8] sm:$0xf]  ;;  %v9777_v18 = vld [vmem:[#allocation8 + $0x114] sm:$0xf0] }
 0x29c   :  { %5295 = vmatmul.bf16.vlgmr.msra.gmra.mxu1 %v10888_v9  ;;  %5249 = vmatpush.bf16.msrb.mxu2 %v8317_v20  ;;  %v3281_v33 = vadd.f32 %v3280_v16, %v3267_v10  ;;  %v8033_v20 = vor.u32 %v9749_v5, %v8032_v12  ;;  %v8768_v41 = vld [vmem:[#allocation8 + $0x5e8] sm:$0xf]  ;;  %v9933_v28 = vld [vmem:[#allocation8 + $0x5f4] sm:$0xf0] }
 0x29d   :  { %5343 = vmatpush.bf16.msrb.mxu1 %v8257_v59  ;;  %5330 = vmatpush.bf16.msrb.mxu3 %v8113_v26  ;;  %v8064_v59 = vld [vmem:[#allocation8 + $0x68] sm:$0xf]  ;;  %v9814_v26 = vld [vmem:[#allocation8 + $0x244] sm:$0xf]  ;;  %v8769_v14 = vor.u32 %v9933_v28, %v8768_v41 }
 0x29e   :  { %v8065_v39 = vor.u32 %v9757_v30, %v8064_v59  ;;  %v3211_v59 = vadd.f32 %v10912_v57, %v3197_v6  ;;  %v9745_v30 = vld [vmem:[#allocation8 + $0x14] sm:$0xf0]  ;;  %v8269_v57 = vor.u32 %v9806_v36, %v8266_v25  ;;  %v8624_v4 = vld [vmem:[#allocation8 + $0x4c8] sm:$0xf] }
 0x29f   :  { %5263 = vmatpush.bf16.msrb.mxu0 %v8445_v40  ;;  %v3308_v52 = vpop.f32.mrf.mxu0  ;;  %v8161_v40 = vor.u32 %v9781_v37, %v8160_v24  ;;  %v8752_v12 = vld [vmem:[#allocation8 + $0x5c8] sm:$0xf] }
 0x2a1   :  { %5344 = vmatpush.bf16.msrb.mxu1 %v8241_v23  ;;  %5331 = vmatpush.bf16.msrb.mxu3 %v8097_v2  ;;  %v8298_v23 = vld [vmem:[#allocation8 + $0x250] sm:$0xf0]  ;;  %v10929_v44 = vpop.f32.mrf.mxu1  ;;  %v3375_v2 = vpack.c.b16 %v3367_v19, %v3367_v19  ;;  %v8144_v19 = vld [vmem:[#allocation8 + $0x108] sm:$0xf] }
 0x2a2   :  { %v8301_v1 = vor.u32 %v9814_v26, %v8298_v23  ;;  %v3294_v13 = vpop.f32.mrf.mxu2  ;;  %v3171_v26 = vadd.f32 %v10892_v0, %v3157_v34  ;;  %v8145_v34 = vor.u32 %v9777_v18, %v8144_v19  ;;  %v9889_v19 = vld [vmem:[#allocation8 + $0x494] sm:$0xf0] }
 0x2a3   :  { %5264 = vmatpush.bf16.msrb.mxu0 %v8429_v31  ;;  %v3402_v54 = vpack.i.b16 %v3375_v2, %v3375_v2  ;;  %v3295_v51 = vadd.f32 %v3294_v13, %v3281_v33  ;;  %v3282_v31 = vpop.f32.mrf.mxu3  ;;  %v8017_v2 = vor.u32 %v9745_v30, %v8016_v46  ;;  %v9893_v46 = vld [vmem:[#allocation8 + $0x4b4] sm:$0xf0] }
 0x2a4   :  { %5250 = vmatpush.bf16.msrb.mxu2 %v8301_v1  ;;  %v3185_v0 = vadd.f32 %v10910_v49, %v3171_v26  ;;  %v3225_v1 = vadd.f32 %v10898_v61, %v3211_v59  ;;  %v8736_v59 = vld [vmem:[#allocation8 + $0x5a8] sm:$0xf] }
 0x2a5   :  { %5345 = vmatpush.bf16.msrb.mxu1 %v8225_v29  ;;  %5332 = vmatpush.bf16.msrb.mxu3 %v8081_v55  ;;  %v3376_v29 = vpack.c.b16 %v3368_v63, %v3368_v63  ;;  %v8413_v55 = vor.u32 %v9842_v45, %v8410_v11  ;;  %v9838_v63 = vld [vmem:[#allocation8 + $0x304] sm:$0xf]  ;;  %v3309_v48 = vadd.f32 %v3308_v52, %v3295_v51  ;;  %v10939_v16 = vperm.slane %v3402_v54, 0  ;;  %v9925_v52 = vld [vmem:[#allocation8 + $0x5b4] sm:$0xf0] }
 0x2a6   :  { %v8397_v15 = vor.u32 %v9838_v63, %v8394_v38  ;;  %v3199_v22 = vadd.f32 %v10914_v53, %v3185_v0  ;;  %v8737_v51 = vor.u32 %v9925_v52, %v8736_v59  ;;  %v8720_v63 = vld [vmem:[#allocation8 + $0x588] sm:$0xf]  ;;  %v9921_v38 = vld [vmem:[#allocation8 + $0x594] sm:$0xf0] }
 0x2a7   :  { %5265 = vmatpush.bf16.msrb.mxu0 %v8413_v55  ;;  %v3431_v49 = vunpack.c.l.bf16 %v10939_v16  ;;  %v3310_v24 = vpop.f32.mrf.mxu0  ;;  %v8608_v55 = vld [vmem:[#allocation8 + $0x4a8] sm:$0xf]  ;;  %v9873_v52 = vld [vmem:[#allocation8 + $0x414] sm:$0xf0] }
 0x2a8   :  { %5251 = vmatpush.bf16.msrb.mxu2 %v8285_v60  ;;  %v3213_v11 = vadd.f32 %v10920_v35, %v3199_v22  ;;  %v8609_v25 = vor.u32 %v9893_v46, %v8608_v55  ;;  %v8560_v0 = vld [vmem:[#allocation8 + $0x448] sm:$0xf]  ;;  %v9994_v55 = vld [vmem:[#allocation8 + $0x7e4] sm:$0xf] }
 0x2a9   :  { %5346 = vmatpush.bf16.msrb.mxu1 %v8209_v50  ;;  %5333 = vmatpush.bf16.msrb.mxu3 %v8065_v39  ;;  %v3406_v50 = vpack.i.b16 %v3376_v29, %v3376_v29  ;;  %v3322_v23 = vpop.f32.mrf.mxu1  ;;  %v8640_v39 = vld [vmem:[#allocation8 + $0x4e8] sm:$0xf]  ;;  %v3269_v29 = vadd.f32 %v10929_v44, %v3255_v58  ;;  %v9929_v44 = vld [vmem:[#allocation8 + $0x5d4] sm:$0xf0] }
 0x2aa   :  { %v3323_v43 = vadd.f32 %v3322_v23, %v3309_v48  ;;  %v3296_v45 = vpop.f32.mrf.mxu2  ;;  %v8753_v60 = vor.u32 %v9929_v44, %v8752_v12  ;;  %v3227_v35 = vadd.f32 %v10908_v3, %v3213_v11  ;;  %v8576_v3 = vld [vmem:[#allocation8 + $0x468] sm:$0xf]  ;;  %v9917_v48 = vld [vmem:[#allocation8 + $0x574] sm:$0xf0]  ;;  %v8842_v12 = vld [vmem:[#allocation8 + $0x690] sm:$0xf0] }
 0x2ab   :  { %v10941_v8 = vperm.slane %v3406_v50, 0  ;;  %5266 = vmatpush.bf16.msrb.mxu0 %v8397_v15  ;;  %v9885_v15 = vld [vmem:[#allocation8 + $0x474] sm:$0xf0]  ;;  %v8704_v58 = vld [vmem:[#allocation8 + $0x568] sm:$0xf] }
 0x2ac   :  { %5252 = vmatpush.bf16.msrb.mxu2 %v8269_v57  ;;  %v3330_v10 = vpack.c.bf16 %v3323_v43, %v3225_v1  ;;  %v8721_v57 = vor.u32 %v9921_v38, %v8720_v63  ;;  %v8688_v43 = vld [vmem:[#allocation8 + $0x548] sm:$0xf]  ;;  %v9877_v11 = vld [vmem:[#allocation8 + $0x434] sm:$0xf0]  ;;  %v9803_v38 = vld [vmem:[#allocation8 + $0x1ec] sm:$0xf] }
 0x2ad   :  { %5347 = vmatpush.bf16.msrb.mxu1 %v8193_v17  ;;  %5334 = vmatpush.bf16.msrb.mxu3 %v8049_v42  ;;  %v9901_v17 = vld [vmem:[#allocation8 + $0x4f4] sm:$0xf0]  ;;  %v3432_v61 = vunpack.c.l.bf16 %v10941_v8  ;;  %v3283_v42 = vadd.f32 %v3282_v31, %v3269_v29  ;;  %v8577_v31 = vor.u32 %v9885_v15, %v8576_v3  ;;  %v8528_v59 = vld [vmem:[#allocation8 + $0x408] sm:$0xf]  ;;  %v9002_v3 = vld [vmem:[#allocation8 + $0x7d0] sm:$0xf0] }
 0x2ae   :  { %v8641_v32 = vor.u32 %v9901_v17, %v8640_v39  ;;  %v3415_v6 = vunpack.c.l.bf16 %v3330_v10  ;;  %v3416_v5 = vunpack.c.h.bf16 %v3330_v10  ;;  %v9881_v29 = vld [vmem:[#allocation8 + $0x454] sm:$0xf0]  ;;  %v8529_v15 = vor.u32 %v9873_v52, %v8528_v59 }
 0x2af   :  { %v3297_v53 = vadd.f32 %v3296_v45, %v3283_v42  ;;  %v8544_v42 = vld [vmem:[#allocation8 + $0x428] sm:$0xf] }
 0x2b0   :  { %v3439_v33 = vadd.f32 %v3431_v49, %v3415_v6  ;;  %v3440_v54 = vadd.f32 %v3432_v61, %v3416_v5  ;;  %v8672_v6 = vld [vmem:[#allocation8 + $0x528] sm:$0xf]  ;;  %v9909_v5 = vld [vmem:[#allocation8 + $0x534] sm:$0xf0] }
 0x2b1   :  { %5348 = vmatpush.bf16.msrb.mxu1 %v8177_v62  ;;  %5335 = vmatpush.bf16.msrb.mxu3 %v8033_v20  ;;  %v9897_v62 = vld [vmem:[#allocation8 + $0x4d4] sm:$0xf0]  ;;  %v3311_v50 = vadd.f32 %v3310_v24, %v3297_v53  ;;  %v3324_v13 = vpop.f32.mrf.mxu1  ;;  %v8592_v20 = vld [vmem:[#allocation8 + $0x488] sm:$0xf]  ;;  %v8673_v46 = vor.u32 %v9909_v5, %v8672_v6  ;;  %v9759_v5 = vld [vmem:[#allocation8 + $0x8c] sm:$0xf] }
 0x2b2   :  { %v8625_v37 = vor.u32 %v9897_v62, %v8624_v4  ;;  %v3452_v30 = vpack.c.bf16 %v3440_v54, %v3439_v33  ;;  %v8593_v17 = vor.u32 %v9889_v19, %v8592_v20  ;;  %v9018_v33 = vld [vmem:[#allocation8 + $0x7f0] sm:$0xf0]  ;;  %v9771_v20 = vld [vmem:[#allocation8 + $0xec] sm:$0xf]  ;;  %v9950_v62 = vld [vmem:[#allocation8 + $0x684] sm:$0xf] }
 0x2b3   :  { %v3325_v36 = vadd.f32 %v3324_v13, %v3311_v50  ;;  %v8545_v50 = vor.u32 %v9877_v11, %v8544_v42  ;;  %v8656_v13 = vld [vmem:[#allocation8 + $0x508] sm:$0xf]  ;;  %v9021_v63 = vor.u32 %v9994_v55, %v9018_v33  ;;  %v8226_v42 = vld [vmem:[#allocation8 + $0x1b8] sm:$0xf0]  ;;  %v9946_v33 = vld [vmem:[#allocation8 + $0x664] sm:$0xf] }
 0x2b4   :  { %v3463_v26 = vunpack.c.l.bf16 %v3452_v30  ;;  %v3464_v23 = vunpack.c.h.bf16 %v3452_v30  ;;  %v8210_v55 = vld [vmem:[#allocation8 + $0x198] sm:$0xf0] }
 0x2b5   :  { %5349 = vmatpush.bf16.msrb.mxu1 %v8161_v40  ;;  %5336 = vmatpush.bf16.msrb.mxu3 %v8017_v2  ;;  %v3334_v40 = vpack.c.bf16 %v3325_v36, %v3227_v35  ;;  %v8705_v2 = vor.u32 %v9917_v48, %v8704_v58 }
 0x2b6   :  { %v3495_v16 = vmul.f32 0.20019531, %v3463_v26  ;;  %v3496_v8 = vmul.f32 0.20019531, %v3464_v23  ;;  %vm10953_vm3 = vcmp.gt.f32.partialorder %v3463_v26, 0.0  ;;  %vm10957_vm4 = vcmp.gt.f32.partialorder %v3464_v23, 0.0  ;;  %v8258_v26 = vld [vmem:[#allocation8 + $0x1f8] sm:$0xf0] }
 0x2b7   :  { %v3423_v18 = vunpack.c.l.bf16 %v3334_v40  ;;  %v3424_v39 = vunpack.c.h.bf16 %v3334_v40  ;;  %vm3516_vm7 = vmpackc.low %vm10957_vm4, %vm10953_vm3  ;;  %v8130_v40 = vld [vmem:[#allocation8 + $0xf8] sm:$0xf0]  ;;  %v9958_v23 = vld [vmem:[#allocation8 + $0x6c4] sm:$0xf] }
 0x2b8   :  { %5337 = vmatmul.bf16.vlgmr.msrb.gmra.mxu3 %v10817_v56  ;;  %v8133_v48 = vor.u32 %v9771_v20, %v8130_v40  ;;  %v9942_v20 = vld [vmem:[#allocation8 + $0x644] sm:$0xf]  ;;  %v8810_v40 = vld [vmem:[#allocation8 + $0x650] sm:$0xf0] }
 0x2b9   :  { %5350 = vmatpush.bf16.msrb.mxu1 %v8145_v34  ;;  %5385 = vmatpush.bf16.msra.mxu3 %v8641_v32  ;;  %v3447_v41 = vadd.f32 %v3431_v49, %v3423_v18  ;;  %v3448_v28 = vadd.f32 %v3432_v61, %v3424_v39  ;;  %v9913_v34 = vld [vmem:[#allocation8 + $0x554] sm:$0xf0]  ;;  %v8561_v49 = vor.u32 %v9881_v29, %v8560_v0  ;;  %v8858_v29 = vld [vmem:[#allocation8 + $0x6b0] sm:$0xf0] }
 0x2ba   :  { %v8689_v61 = vor.u32 %v9913_v34, %v8688_v43  ;;  %v9986_v43 = vld [vmem:[#allocation8 + $0x7a4] sm:$0xf]  ;;  %v8986_v34 = vld [vmem:[#allocation8 + $0x7b0] sm:$0xf0] }
 0x2bb   :  { %v3456_v1 = vpack.c.bf16 %v3448_v28, %v3447_v41  ;;  %v8114_v41 = vld [vmem:[#allocation8 + $0xd8] sm:$0xf0] }
 0x2bc   :  { %5351 = vmatmul.bf16.vlgmr.msrb.gmra.mxu1 %v10819_v7 }
 0x2bd   :  { %5399 = vmatpush.bf16.msra.mxu1 %v8769_v14  ;;  %5386 = vmatpush.bf16.msra.mxu3 %v8625_v37  ;;  %v3508_v14 = vpack.c.bf16 %v3496_v8, %v3495_v16  ;;  %v3471_v4 = vunpack.c.l.bf16 %v3456_v1  ;;  %v3472_v10 = vunpack.c.h.bf16 %v3456_v1  ;;  %v9962_v37 = vld [vmem:[#allocation8 + $0x6e4] sm:$0xf]  ;;  %v8261_v16 = vor.u32 %v9803_v38, %v8258_v26  ;;  %v9767_v8 = vld [vmem:[#allocation8 + $0xcc] sm:$0xf] }
 0x2be   :  { %v8117_v22 = vor.u32 %v9767_v8, %v8114_v41  ;;  %v9970_v8 = vld [vmem:[#allocation8 + $0x724] sm:$0xf]  ;;  %v8922_v41 = vld [vmem:[#allocation8 + $0x730] sm:$0xf0] }
 0x2bf   :  { %vm10961_vm5 = vcmp.gt.f32.partialorder %v3471_v4, 0.0  ;;  %vm10965_vm6 = vcmp.gt.f32.partialorder %v3472_v10, 0.0  ;;  %v3503_v44 = vmul.f32 0.20019531, %v3471_v4  ;;  %v3504_v45 = vmul.f32 0.20019531, %v3472_v10  ;;  %v8098_v4 = vld [vmem:[#allocation8 + $0xb8] sm:$0xf0] }
 0x2c0   :  { %v3524_v53 = vsel %vm3516_vm7, %v3452_v30, %v3508_v14  ;;  %vm3520_vm8 = vmpackc.low %vm10965_vm6, %vm10961_vm5  ;;  %v9763_v14 = vld [vmem:[#allocation8 + $0xac] sm:$0xf] }
 0x2c1   :  { %5400 = vmatpush.bf16.msra.mxu1 %v8753_v60  ;;  %5387 = vmatpush.bf16.msra.mxu3 %v8609_v25  ;;  %v3512_v24 = vpack.c.bf16 %v3504_v45, %v3503_v44  ;;  %v8890_v60 = vld [vmem:[#allocation8 + $0x6f0] sm:$0xf0]  ;;  %v3799_v35 = vunpack.c.l.b16 %v3524_v53  ;;  %v3800_v36 = vunpack.c.h.b16 %v3524_v53  ;;  %v9982_v44 = vld [vmem:[#allocation8 + $0x784] sm:$0xf]  ;;  %v8101_v11 = vor.u32 %v9763_v14, %v8098_v4 }
 0x2c2   :  { %v8893_v19 = vor.u32 %v9962_v37, %v8890_v60  ;;  %v8970_v45 = vld [vmem:[#allocation8 + $0x790] sm:$0xf0]  ;;  %v8845_v53 = vor.u32 %v9950_v62, %v8842_v12  ;;  %v8082_v37 = vld [vmem:[#allocation8 + $0x98] sm:$0xf0]  ;;  %v9791_v60 = vld [vmem:[#allocation8 + $0x18c] sm:$0xf] }
 0x2c3   :  { %v3528_v54 = vsel %vm3520_vm8, %v3456_v1, %v3512_v24  ;;  %v9799_v1 = vld [vmem:[#allocation8 + $0x1cc] sm:$0xf]  ;;  %v8973_v24 = vor.u32 %v9982_v44, %v8970_v45  ;;  %v8085_v59 = vor.u32 %v9759_v5, %v8082_v37  ;;  %v8213_v52 = vor.u32 %v9791_v60, %v8210_v55  ;;  %v9966_v14 = vld [vmem:[#allocation8 + $0x704] sm:$0xf]  ;;  %v8906_v4 = vld [vmem:[#allocation8 + $0x710] sm:$0xf0] }
 0x2c4   :  { %v3807_v30 = vunpack.c.l.b16 %v3528_v54  ;;  %v3808_v25 = vunpack.c.h.b16 %v3528_v54  ;;  %v8826_v54 = vld [vmem:[#allocation8 + $0x670] sm:$0xf0]  ;;  %v8512_v62 = vld [vmem:[#allocation8 + $0x3e8] sm:$0xf]  ;;  %v9869_v12 = vld [vmem:[#allocation8 + $0x3f4] sm:$0xf0] }
 0x2c5   :  { %5401 = vmatpush.bf16.msra.mxu1 %v8737_v51  ;;  %5388 = vmatpush.bf16.msra.mxu3 %v8593_v17  ;;  %v9905_v51 = vld [vmem:[#allocation8 + $0x514] sm:$0xf0]  ;;  %v8874_v17 = vld [vmem:[#allocation8 + $0x6d0] sm:$0xf0]  ;;  %v9743_v44 = vld [vmem:[#allocation8 + $0xc] sm:$0xf]  ;;  %v8513_v55 = vor.u32 %v9869_v12, %v8512_v62 }
 0x2c6   :  { %v10977_v18 = vpack.c.b16 %v3807_v30, %v3799_v35  ;;  %v10979_v39 = vpack.c.b16 %v3808_v25, %v3800_v36  ;;  %v8657_v58 = vor.u32 %v9905_v51, %v8656_v13  ;;  %v8877_v28 = vor.u32 %v9958_v23, %v8874_v17  ;;  %v9755_v13 = vld [vmem:[#allocation8 + $0x6c] sm:$0xf]  ;;  %v8066_v35 = vld [vmem:[#allocation8 + $0x78] sm:$0xf0] }
 0x2c7   :  { %v9787_v30 = vld [vmem:[#allocation8 + $0x16c] sm:$0xf]  ;;  %v8194_v36 = vld [vmem:[#allocation8 + $0x178] sm:$0xf0]  ;;  %v8829_v25 = vor.u32 %v9946_v33, %v8826_v54  ;;  %v8069_v38 = vor.u32 %v9755_v13, %v8066_v35  ;;  %v8496_v13 = vld [vmem:[#allocation8 + $0x3c8] sm:$0xf] }
 0x2c8   :  { %5197 = vmatmul.bf16.vlgmr.msra.gmra.mxu2 %v10977_v18  ;;  %5211 = vmatmul.bf16.vlgmr.msra.gmra.mxu0 %v10979_v39  ;;  %v8197_v26 = vor.u32 %v9787_v30, %v8194_v36  ;;  %v9751_v23 = vld [vmem:[#allocation8 + $0x4c] sm:$0xf]  ;;  %v8050_v17 = vld [vmem:[#allocation8 + $0x58] sm:$0xf0]  ;;  %v9865_v35 = vld [vmem:[#allocation8 + $0x3d4] sm:$0xf0] }
 0x2c9   :  { %5402 = vmatpush.bf16.msra.mxu1 %v8721_v57  ;;  %5389 = vmatpush.bf16.msra.mxu3 %v8577_v31  ;;  %v9990_v57 = vld [vmem:[#allocation8 + $0x7c4] sm:$0xf]  ;;  %v8242_v31 = vld [vmem:[#allocation8 + $0x1d8] sm:$0xf0]  ;;  %v9931_v33 = vld [vmem:[#allocation8 + $0x5ec] sm:$0xf] }
 0x2ca   :  { %5301 = vmatpush.bf16.msra.mxu2 %v8893_v19  ;;  %5315 = vmatpush.bf16.msra.mxu0 %v9021_v63  ;;  %v9005_v0 = vor.u32 %v9990_v57, %v9002_v3  ;;  %v8245_v32 = vor.u32 %v9799_v1, %v8242_v31  ;;  %v9974_v19 = vld [vmem:[#allocation8 + $0x744] sm:$0xf]  ;;  %v8938_v63 = vld [vmem:[#allocation8 + $0x750] sm:$0xf0]  ;;  %v9783_v57 = vld [vmem:[#allocation8 + $0x14c] sm:$0xf] }
 0x2cb   :  { %v8178_v3 = vld [vmem:[#allocation8 + $0x158] sm:$0xf0]  ;;  %v9747_v1 = vld [vmem:[#allocation8 + $0x2c] sm:$0xf] }
 0x2cc   :  { %v8034_v31 = vld [vmem:[#allocation8 + $0x38] sm:$0xf0]  ;;  %v9883_v62 = vld [vmem:[#allocation8 + $0x46c] sm:$0xf] }
 0x2cd   :  { %5403 = vmatpush.bf16.msra.mxu1 %v8705_v2  ;;  %5390 = vmatpush.bf16.msra.mxu3 %v8561_v49  ;;  %v9954_v2 = vld [vmem:[#allocation8 + $0x6a4] sm:$0xf]  ;;  %v8989_v49 = vor.u32 %v9986_v43, %v8986_v34  ;;  %v8925_v34 = vor.u32 %v9970_v8, %v8922_v41  ;;  %v8018_v45 = vld [vmem:[#allocation8 + $0x18] sm:$0xf0]  ;;  %v9923_v8 = vld [vmem:[#allocation8 + $0x5ac] sm:$0xf] }
 0x2ce   :  { %5302 = vmatpush.bf16.msra.mxu2 %v8877_v28  ;;  %5316 = vmatpush.bf16.msra.mxu0 %v9005_v0  ;;  %v8861_v10 = vor.u32 %v9954_v2, %v8858_v29  ;;  %v8053_v28 = vor.u32 %v9751_v23, %v8050_v17  ;;  %v8181_v0 = vor.u32 %v9783_v57, %v8178_v3  ;;  %v9779_v2 = vld [vmem:[#allocation8 + $0x12c] sm:$0xf]  ;;  %v8162_v29 = vld [vmem:[#allocation8 + $0x138] sm:$0xf0]  ;;  %v8480_v23 = vld [vmem:[#allocation8 + $0x3a8] sm:$0xf] }
 0x2cf   :  { %v8642_v37 = vld [vmem:[#allocation8 + $0x4f8] sm:$0xf0]  ;;  %v9861_v17 = vld [vmem:[#allocation8 + $0x3b4] sm:$0xf0] }
 0x2d0   :  { %v8770_v54 = vld [vmem:[#allocation8 + $0x5f8] sm:$0xf0] }
 0x2d1   :  { %5404 = vmatpush.bf16.msra.mxu1 %v8689_v61  ;;  %5391 = vmatpush.bf16.msra.mxu3 %v8545_v50  ;;  %v9795_v61 = vld [vmem:[#allocation8 + $0x1ac] sm:$0xf]  ;;  %v9978_v50 = vld [vmem:[#allocation8 + $0x764] sm:$0xf]  ;;  %v8773_v36 = vor.u32 %v9931_v33, %v8770_v54  ;;  %v8738_v41 = vld [vmem:[#allocation8 + $0x5b8] sm:$0xf0] }
 0x2d2   :  { %v8229_v6 = vor.u32 %v9795_v61, %v8226_v42  ;;  %5303 = vmatpush.bf16.msra.mxu2 %v8861_v10  ;;  %5317 = vmatpush.bf16.msra.mxu0 %v8989_v49  ;;  %v8384_v10 = vld [vmem:[#allocation8 + $0x2e8] sm:$0xf]  ;;  %v9837_v49 = vld [vmem:[#allocation8 + $0x2f4] sm:$0xf0]  ;;  %v8037_v61 = vor.u32 %v9747_v1, %v8034_v31  ;;  %v8165_v42 = vor.u32 %v9779_v2, %v8162_v29  ;;  %v8578_v12 = vld [vmem:[#allocation8 + $0x478] sm:$0xf0] }
 0x2d3   :  { %v8385_v60 = vor.u32 %v9837_v49, %v8384_v10  ;;  %v8464_v1 = vld [vmem:[#allocation8 + $0x388] sm:$0xf]  ;;  %v9857_v31 = vld [vmem:[#allocation8 + $0x394] sm:$0xf0]  ;;  %v8741_v29 = vor.u32 %v9923_v8, %v8738_v41  ;;  %v9879_v33 = vld [vmem:[#allocation8 + $0x44c] sm:$0xf] }
 0x2d4   :  { %v8320_v10 = vld [vmem:[#allocation8 + $0x268] sm:$0xf]  ;;  %v9821_v49 = vld [vmem:[#allocation8 + $0x274] sm:$0xf0]  ;;  %v8562_v54 = vld [vmem:[#allocation8 + $0x458] sm:$0xf0] }
 0x2d5   :  { %5405 = vmatpush.bf16.msra.mxu1 %v8673_v46  ;;  %5392 = vmatpush.bf16.msra.mxu3 %v8529_v15  ;;  %v8954_v46 = vld [vmem:[#allocation8 + $0x770] sm:$0xf0]  ;;  %v8813_v15 = vor.u32 %v9942_v20, %v8810_v40  ;;  %v8497_v40 = vor.u32 %v9865_v35, %v8496_v13  ;;  %v8288_v13 = vld [vmem:[#allocation8 + $0x228] sm:$0xf]  ;;  %v9813_v35 = vld [vmem:[#allocation8 + $0x234] sm:$0xf0] }
 0x2d6   :  { %5304 = vmatpush.bf16.msra.mxu2 %v8845_v53  ;;  %5318 = vmatpush.bf16.msra.mxu0 %v8973_v24  ;;  %v8957_v51 = vor.u32 %v9978_v50, %v8954_v46  ;;  %v8909_v53 = vor.u32 %v9966_v14, %v8906_v4  ;;  %v9899_v24 = vld [vmem:[#allocation8 + $0x4ec] sm:$0xf]  ;;  %v8368_v50 = vld [vmem:[#allocation8 + $0x2c8] sm:$0xf]  ;;  %v8021_v46 = vor.u32 %v9743_v44, %v8018_v45  ;;  %v8722_v4 = vld [vmem:[#allocation8 + $0x598] sm:$0xf0] }
 0x2d7   :  { %v8645_v30 = vor.u32 %v9899_v24, %v8642_v37  ;;  %v9919_v14 = vld [vmem:[#allocation8 + $0x58c] sm:$0xf]  ;;  %v8321_v44 = vor.u32 %v9821_v49, %v8320_v10  ;;  %v8432_v24 = vld [vmem:[#allocation8 + $0x348] sm:$0xf]  ;;  %v9849_v37 = vld [vmem:[#allocation8 + $0x354] sm:$0xf0] }
 0x2d8   :  { %5393 = vmatmul.bf16.vlgmr.msra.gmra.mxu3 %v10886_v27  ;;  %5253 = vmatmul.bf16.vlgmr.msrb.gmra.mxu2 %v10826_v21 }
 0x2d9   :  { %5406 = vmatpush.bf16.msra.mxu1 %v8657_v58  ;;  %5441 = vmatpush.bf16.msrb.mxu3 %v8133_v48  ;;  %v8941_v58 = vor.u32 %v9974_v19, %v8938_v63  ;;  %v9938_v48 = vld [vmem:[#allocation8 + $0x624] sm:$0xf]  ;;  %v9927_v19 = vld [vmem:[#allocation8 + $0x5cc] sm:$0xf]  ;;  %v8754_v63 = vld [vmem:[#allocation8 + $0x5d8] sm:$0xf0] }
 0x2da   :  { %5267 = vmatmul.bf16.vlgmr.msrb.gmra.mxu0 %v10828_v47  ;;  %5305 = vmatpush.bf16.msra.mxu2 %v8829_v25  ;;  %v9895_v25 = vld [vmem:[#allocation8 + $0x4cc] sm:$0xf]  ;;  %v8757_v3 = vor.u32 %v9927_v19, %v8754_v63  ;;  %v8289_v63 = vor.u32 %v9813_v35, %v8288_v13  ;;  %v8944_v13 = vld [vmem:[#allocation8 + $0x748] sm:$0xf]  ;;  %v9977_v35 = vld [vmem:[#allocation8 + $0x754] sm:$0xf0] }
 0x2db   :  { %5319 = vmatpush.bf16.msra.mxu0 %v8957_v51  ;;  %v8626_v51 = vld [vmem:[#allocation8 + $0x4d8] sm:$0xf0]  ;;  %v9907_v19 = vld [vmem:[#allocation8 + $0x52c] sm:$0xf] }
 0x2dc   :  { %5407 = vmatmul.bf16.vlgmr.msra.gmra.mxu1 %v10888_v9  ;;  %v8629_v57 = vor.u32 %v9895_v25, %v8626_v51  ;;  %v8565_v25 = vor.u32 %v9879_v33, %v8562_v54  ;;  %v8960_v33 = vld [vmem:[#allocation8 + $0x768] sm:$0xf]  ;;  %v9981_v54 = vld [vmem:[#allocation8 + $0x774] sm:$0xf0] }
 0x2dd   :  { %5455 = vmatpush.bf16.msrb.mxu1 %v8261_v16  ;;  %5442 = vmatpush.bf16.msrb.mxu3 %v8117_v22  ;;  %v8794_v16 = vld [vmem:[#allocation8 + $0x630] sm:$0xf0]  ;;  %v9934_v22 = vld [vmem:[#allocation8 + $0x604] sm:$0xf] }
 0x2de   :  { %5306 = vmatpush.bf16.msra.mxu2 %v8813_v15  ;;  %v8797_v43 = vor.u32 %v9938_v48, %v8794_v16  ;;  %v9891_v15 = vld [vmem:[#allocation8 + $0x4ac] sm:$0xf]  ;;  %v8481_v16 = vor.u32 %v9861_v17, %v8480_v23  ;;  %v8272_v23 = vld [vmem:[#allocation8 + $0x208] sm:$0xf]  ;;  %v9809_v17 = vld [vmem:[#allocation8 + $0x214] sm:$0xf0] }
 0x2df   :  { %5320 = vmatpush.bf16.msra.mxu0 %v8941_v58  ;;  %v8610_v58 = vld [vmem:[#allocation8 + $0x4b8] sm:$0xf0] }
 0x2e0   :  { %v8613_v2 = vor.u32 %v9891_v15, %v8610_v58  ;;  %v8896_v15 = vld [vmem:[#allocation8 + $0x6e8] sm:$0xf]  ;;  %v9965_v58 = vld [vmem:[#allocation8 + $0x6f4] sm:$0xf0] }
 0x2e1   :  { %5456 = vmatpush.bf16.msrb.mxu1 %v8245_v32  ;;  %5443 = vmatpush.bf16.msrb.mxu3 %v8101_v11  ;;  %v8778_v32 = vld [vmem:[#allocation8 + $0x610] sm:$0xf0]  ;;  %v9775_v11 = vld [vmem:[#allocation8 + $0x10c] sm:$0xf] }
 0x2e2   :  { %5307 = vmatpush.bf16.msra.mxu2 %v8797_v43  ;;  %v8781_v5 = vor.u32 %v9934_v22, %v8778_v32  ;;  %v9887_v43 = vld [vmem:[#allocation8 + $0x48c] sm:$0xf]  ;;  %v8465_v32 = vor.u32 %v9857_v31, %v8464_v1  ;;  %v8530_v31 = vld [vmem:[#allocation8 + $0x418] sm:$0xf0] }
 0x2e3   :  { %5321 = vmatpush.bf16.msra.mxu0 %v8925_v34  ;;  %v8594_v34 = vld [vmem:[#allocation8 + $0x498] sm:$0xf0]  ;;  %v9871_v1 = vld [vmem:[#allocation8 + $0x40c] sm:$0xf] }
 0x2e4   :  { %v8533_v10 = vor.u32 %v9871_v1, %v8530_v31 }
 0x2e5   :  { %5457 = vmatpush.bf16.msrb.mxu1 %v8229_v6  ;;  %5444 = vmatpush.bf16.msrb.mxu3 %v8085_v59  ;;  %v8146_v6 = vld [vmem:[#allocation8 + $0x118] sm:$0xf0] }
 0x2e6   :  { %v8149_v59 = vor.u32 %v9775_v11, %v8146_v6  ;;  %5308 = vmatpush.bf16.msra.mxu2 %v8781_v5  ;;  %v9915_v11 = vld [vmem:[#allocation8 + $0x56c] sm:$0xf]  ;;  %v8706_v6 = vld [vmem:[#allocation8 + $0x578] sm:$0xf0]  ;;  %v8304_v5 = vld [vmem:[#allocation8 + $0x248] sm:$0xf] }
 0x2e7   :  { %5322 = vmatpush.bf16.msra.mxu0 %v8909_v53  ;;  %v9817_v53 = vld [vmem:[#allocation8 + $0x254] sm:$0xf0] }
 0x2e9   :  { %5458 = vmatpush.bf16.msrb.mxu1 %v8213_v52  ;;  %5445 = vmatpush.bf16.msrb.mxu3 %v8069_v38  ;;  %v9833_v52 = vld [vmem:[#allocation8 + $0x2d4] sm:$0xf0]  ;;  %v8352_v38 = vld [vmem:[#allocation8 + $0x2a8] sm:$0xf] }
 0x2ea   :  { %5357 = vmatpush.bf16.msrb.mxu2 %v8385_v60  ;;  %v8369_v20 = vor.u32 %v9833_v52, %v8368_v50  ;;  %5323 = vmatmul.bf16.vlgmr.msra.gmra.mxu0 %v10979_v39  ;;  %v8581_v60 = vor.u32 %v9883_v62, %v8578_v12  ;;  %v8305_v50 = vor.u32 %v9817_v53, %v8304_v5  ;;  %v8690_v52 = vld [vmem:[#allocation8 + $0x558] sm:$0xf0]  ;;  %v8992_v62 = vld [vmem:[#allocation8 + $0x7a8] sm:$0xf]  ;;  %v9989_v12 = vld [vmem:[#allocation8 + $0x7b4] sm:$0xf0] }
 0x2eb   :  { %5371 = vmatpush.bf16.msrb.mxu0 %v8513_v55  ;;  %5309 = vmatmul.bf16.vlgmr.msra.gmra.mxu2 %v10977_v18  ;;  %v8709_v55 = vor.u32 %v9915_v11, %v8706_v6  ;;  %v8848_v11 = vld [vmem:[#allocation8 + $0x688] sm:$0xf]  ;;  %v9953_v6 = vld [vmem:[#allocation8 + $0x694] sm:$0xf0] }
 0x2ec   :  { %v8976_v5 = vld [vmem:[#allocation8 + $0x788] sm:$0xf]  ;;  %v9985_v53 = vld [vmem:[#allocation8 + $0x794] sm:$0xf0] }
 0x2ed   :  { %5459 = vmatpush.bf16.msrb.mxu1 %v8197_v26  ;;  %5446 = vmatpush.bf16.msrb.mxu3 %v8053_v28  ;;  %v9829_v26 = vld [vmem:[#allocation8 + $0x2b4] sm:$0xf0]  ;;  %v8336_v28 = vld [vmem:[#allocation8 + $0x288] sm:$0xf] }
 0x2ee   :  { %5358 = vmatpush.bf16.msrb.mxu2 %v8369_v20  ;;  %v8353_v48 = vor.u32 %v9829_v26, %v8352_v38  ;;  %v9875_v20 = vld [vmem:[#allocation8 + $0x42c] sm:$0xf]  ;;  %v8674_v26 = vld [vmem:[#allocation8 + $0x538] sm:$0xf0] }
 0x2ef   :  { %5372 = vmatpush.bf16.msrb.mxu0 %v8497_v40  ;;  %v8546_v40 = vld [vmem:[#allocation8 + $0x438] sm:$0xf0]  ;;  %v8677_v41 = vor.u32 %v9907_v19, %v8674_v26  ;;  %v8784_v19 = vld [vmem:[#allocation8 + $0x608] sm:$0xf]  ;;  %v9969_v26 = vld [vmem:[#allocation8 + $0x714] sm:$0xf0] }
 0x2f0   :  { %v8549_v8 = vor.u32 %v9875_v20, %v8546_v40 }
 0x2f1   :  { %5460 = vmatpush.bf16.msrb.mxu1 %v8181_v0  ;;  %5447 = vmatpush.bf16.msrb.mxu3 %v8037_v61  ;;  %v9825_v0 = vld [vmem:[#allocation8 + $0x294] sm:$0xf0] }
 0x2f2   :  { %5359 = vmatpush.bf16.msrb.mxu2 %v8353_v48  ;;  %v8337_v22 = vor.u32 %v9825_v0, %v8336_v28  ;;  %v9853_v61 = vld [vmem:[#allocation8 + $0x374] sm:$0xf0]  ;;  %v9024_v48 = vld [vmem:[#allocation8 + $0x7e8] sm:$0xf]  ;;  %v8273_v28 = vor.u32 %v9809_v17, %v8272_v23  ;;  %v9835_v23 = vld [vmem:[#allocation8 + $0x2ec] sm:$0xf] }
 0x2f3   :  { %5373 = vmatpush.bf16.msrb.mxu0 %v8481_v16  ;;  %v9997_v16 = vld [vmem:[#allocation8 + $0x7f4] sm:$0xf0]  ;;  %v8386_v17 = vld [vmem:[#allocation8 + $0x2f8] sm:$0xf0] }
 0x2f5   :  { %5461 = vmatpush.bf16.msrb.mxu1 %v8165_v42  ;;  %5448 = vmatpush.bf16.msrb.mxu3 %v8021_v46  ;;  %v8725_v42 = vor.u32 %v9919_v14, %v8722_v4  ;;  %v8433_v46 = vor.u32 %v9849_v37, %v8432_v24  ;;  %v9008_v14 = vld [vmem:[#allocation8 + $0x7c8] sm:$0xf]  ;;  %v9993_v4 = vld [vmem:[#allocation8 + $0x7d4] sm:$0xf0]  ;;  %v8849_v24 = vor.u32 %v9953_v6, %v8848_v11  ;;  %v9815_v6 = vld [vmem:[#allocation8 + $0x24c] sm:$0xf] }
 0x2f6   :  { %5360 = vmatpush.bf16.msrb.mxu2 %v8337_v22  ;;  %v8880_v22 = vld [vmem:[#allocation8 + $0x6c8] sm:$0xf]  ;;  %v8977_v37 = vor.u32 %v9985_v53, %v8976_v5  ;;  %v10999_v5 = vpop.f32.mrf.mxu1  ;;  %v8306_v53 = vld [vmem:[#allocation8 + $0x258] sm:$0xf0] }
 0x2f7   :  { %5374 = vmatpush.bf16.msrb.mxu0 %v8465_v32  ;;  %v9961_v32 = vld [vmem:[#allocation8 + $0x6d4] sm:$0xf0] }
 0x2f8   :  { %5449 = vmatmul.bf16.vlgmr.msrb.gmra.mxu3 %v10817_v56  ;;  %v8448_v56 = vld [vmem:[#allocation8 + $0x368] sm:$0xf] }
 0x2f9   :  { %5462 = vmatpush.bf16.msrb.mxu1 %v8149_v59  ;;  %5497 = vmatpush.bf16.msra.mxu3 %v8645_v30  ;;  %v8449_v45 = vor.u32 %v9853_v61, %v8448_v56  ;;  %v9911_v59 = vld [vmem:[#allocation8 + $0x54c] sm:$0xf]  ;;  %v8416_v30 = vld [vmem:[#allocation8 + $0x328] sm:$0xf]  ;;  %v8881_v56 = vor.u32 %v9961_v32, %v8880_v22  ;;  %v9009_v61 = vor.u32 %v9993_v4, %v9008_v14  ;;  %v8338_v4 = vld [vmem:[#allocation8 + $0x298] sm:$0xf0] }
 0x2fa   :  { %5361 = vmatpush.bf16.msrb.mxu2 %v8321_v44  ;;  %v8693_v51 = vor.u32 %v9911_v59, %v8690_v52  ;;  %v8816_v59 = vld [vmem:[#allocation8 + $0x648] sm:$0xf]  ;;  %v9945_v52 = vld [vmem:[#allocation8 + $0x654] sm:$0xf0]  ;;  %v9823_v14 = vld [vmem:[#allocation8 + $0x28c] sm:$0xf] }
 0x2fb   :  { %5375 = vmatpush.bf16.msrb.mxu0 %v8449_v45  ;;  %v8993_v45 = vor.u32 %v9989_v12, %v8992_v62  ;;  %v8322_v62 = vld [vmem:[#allocation8 + $0x278] sm:$0xf0]  ;;  %v9851_v12 = vld [vmem:[#allocation8 + $0x36c] sm:$0xf] }
 0x2fc   :  { %5463 = vmatmul.bf16.vlgmr.msrb.gmra.mxu1 %v10819_v7  ;;  %v8597_v7 = vor.u32 %v9887_v43, %v8594_v34  ;;  %v9903_v43 = vld [vmem:[#allocation8 + $0x50c] sm:$0xf]  ;;  %v8658_v34 = vld [vmem:[#allocation8 + $0x518] sm:$0xf0] }
 0x2fd   :  { %5511 = vmatpush.bf16.msra.mxu1 %v8773_v36  ;;  %5498 = vmatpush.bf16.msra.mxu3 %v8629_v57  ;;  %v9845_v36 = vld [vmem:[#allocation8 + $0x334] sm:$0xf0]  ;;  %v8400_v57 = vld [vmem:[#allocation8 + $0x308] sm:$0xf]  ;;  %v8661_v49 = vor.u32 %v9903_v43, %v8658_v34  ;;  %v9859_v43 = vld [vmem:[#allocation8 + $0x3ac] sm:$0xf] }
 0x2fe   :  { %5362 = vmatpush.bf16.msrb.mxu2 %v8305_v50  ;;  %v8417_v38 = vor.u32 %v9845_v36, %v8416_v30  ;;  %v8800_v30 = vld [vmem:[#allocation8 + $0x628] sm:$0xf]  ;;  %v9941_v36 = vld [vmem:[#allocation8 + $0x634] sm:$0xf0]  ;;  %v8482_v34 = vld [vmem:[#allocation8 + $0x3b8] sm:$0xf0] }
 0x2ff   :  { %5376 = vmatpush.bf16.msrb.mxu0 %v8433_v46  ;;  %v8961_v46 = vor.u32 %v9981_v54, %v8960_v33  ;;  %v8801_v20 = vor.u32 %v9941_v36, %v8800_v30  ;;  %v8485_v32 = vor.u32 %v9859_v43, %v8482_v34  ;;  %v9811_v33 = vld [vmem:[#allocation8 + $0x22c] sm:$0xf]  ;;  %v8290_v54 = vld [vmem:[#allocation8 + $0x238] sm:$0xf0]  ;;  %v9152_v43 = vld [vmem:[#allocation11 + $0xf0] sm:$0xf] }
 0x300   :  { %v9839_v30 = vld [vmem:[#allocation8 + $0x30c] sm:$0xf]  ;;  %v8402_v36 = vld [vmem:[#allocation8 + $0x318] sm:$0xf0] }
 0x301   :  { %5512 = vmatpush.bf16.msra.mxu1 %v8757_v3  ;;  %5499 = vmatpush.bf16.msra.mxu3 %v8613_v2  ;;  %v9841_v3 = vld [vmem:[#allocation8 + $0x314] sm:$0xf0]  ;;  %v8897_v2 = vor.u32 %v9965_v58, %v8896_v15 }
 0x302   :  { %5363 = vmatpush.bf16.msrb.mxu2 %v8289_v63  ;;  %v8401_v0 = vor.u32 %v9841_v3, %v8400_v57  ;;  %v9937_v63 = vld [vmem:[#allocation8 + $0x614] sm:$0xf0]  ;;  %v9867_v57 = vld [vmem:[#allocation8 + $0x3ec] sm:$0xf]  ;;  %v8514_v3 = vld [vmem:[#allocation8 + $0x3f8] sm:$0xf0] }
 0x303   :  { %5377 = vmatpush.bf16.msrb.mxu0 %v8417_v38  ;;  %v8912_v38 = vld [vmem:[#allocation8 + $0x708] sm:$0xf]  ;;  %v8785_v15 = vor.u32 %v9937_v63, %v8784_v19  ;;  %v11005_v19 = vpop.f32.mrf.mxu1  ;;  %v11007_v63 = vpop.f32.mrf.mxu2 }
 0x304   :  { %v8913_v58 = vor.u32 %v9969_v26, %v8912_v38  ;;  %v8405_v26 = vor.u32 %v9839_v30, %v8402_v36 }
 0x305   :  { %5513 = vmatpush.bf16.msra.mxu1 %v8741_v29  ;;  %5500 = vmatpush.bf16.msra.mxu3 %v8597_v7  ;;  %v9025_v29 = vor.u32 %v9997_v16, %v9024_v48  ;;  %v8864_v7 = vld [vmem:[#allocation8 + $0x6a8] sm:$0xf]  ;;  %v8389_v48 = vor.u32 %v9835_v23, %v8386_v17  ;;  %v8517_v16 = vor.u32 %v9867_v57, %v8514_v3  ;;  %v9959_v57 = vld [vmem:[#allocation8 + $0x6cc] sm:$0xf]  ;;  %v8882_v3 = vld [vmem:[#allocation8 + $0x6d8] sm:$0xf0] }
 0x306   :  { %5364 = vmatpush.bf16.msrb.mxu2 %v8273_v28  ;;  %v9863_v28 = vld [vmem:[#allocation8 + $0x3cc] sm:$0xf] }
 0x307   :  { %5378 = vmatpush.bf16.msrb.mxu0 %v8401_v0  ;;  %v8498_v0 = vld [vmem:[#allocation8 + $0x3d8] sm:$0xf0] }
 0x308   :  { %v8501_v31 = vor.u32 %v9863_v28, %v8498_v0  ;;  %v8866_v0 = vld [vmem:[#allocation8 + $0x6b8] sm:$0xf0] }
 0x309   :  { %5514 = vmatpush.bf16.msra.mxu1 %v8725_v42  ;;  %5501 = vmatpush.bf16.msra.mxu3 %v8581_v60  ;;  %v9957_v42 = vld [vmem:[#allocation8 + $0x6b4] sm:$0xf0]  ;;  %v8832_v60 = vld [vmem:[#allocation8 + $0x668] sm:$0xf] }
 0x30a   :  { %5413 = vmatpush.bf16.msra.mxu2 %v8897_v2  ;;  %5379 = vmatmul.bf16.vlgmr.msrb.gmra.mxu0 %v10828_v47  ;;  %v8865_v44 = vor.u32 %v9957_v42, %v8864_v7  ;;  %v9827_v2 = vld [vmem:[#allocation8 + $0x2ac] sm:$0xf]  ;;  %v10997_v42 = vpop.f32.mrf.mxu3 }
 0x30b   :  { %5427 = vmatpush.bf16.msra.mxu0 %v9025_v29  ;;  %5365 = vmatmul.bf16.vlgmr.msrb.gmra.mxu2 %v10826_v21  ;;  %v8354_v29 = vld [vmem:[#allocation8 + $0x2b8] sm:$0xf0]  ;;  %v9819_v7 = vld [vmem:[#allocation8 + $0x26c] sm:$0xf]  ;;  %v11013_v34 = vpop.f32.mrf.mxu1 }
 0x30c   :  { %v8357_v22 = vor.u32 %v9827_v2, %v8354_v29  ;;  %v9088_v2 = vld [vmem:[#allocation11 + $0x70] sm:$0xf]  ;;  %v10013_v29 = vld [vmem:[#allocation11 + $0x74] sm:$0xf0] }
 0x30d   :  { %5515 = vmatpush.bf16.msra.mxu1 %v8709_v55  ;;  %5502 = vmatpush.bf16.msra.mxu3 %v8565_v25  ;;  %v9949_v55 = vld [vmem:[#allocation8 + $0x674] sm:$0xf0]  ;;  %v8928_v25 = vld [vmem:[#allocation8 + $0x728] sm:$0xf] }
 0x30e   :  { %5414 = vmatpush.bf16.msra.mxu2 %v8881_v56  ;;  %v8833_v50 = vor.u32 %v9949_v55, %v8832_v60  ;;  %v8341_v56 = vor.u32 %v9823_v14, %v8338_v4  ;;  %v8309_v60 = vor.u32 %v9815_v6, %v8306_v53  ;;  %v9951_v14 = vld [vmem:[#allocation8 + $0x68c] sm:$0xf] }
 0x30f   :  { %5428 = vmatpush.bf16.msra.mxu0 %v9009_v61  ;;  %v9947_v6 = vld [vmem:[#allocation8 + $0x66c] sm:$0xf] }
 0x311   :  { %5516 = vmatpush.bf16.msra.mxu1 %v8693_v51  ;;  %5503 = vmatpush.bf16.msra.mxu3 %v8549_v8  ;;  %v9973_v51 = vld [vmem:[#allocation8 + $0x734] sm:$0xf0]  ;;  %v9831_v8 = vld [vmem:[#allocation8 + $0x2cc] sm:$0xf] }
 0x312   :  { %5415 = vmatpush.bf16.msra.mxu2 %v8865_v44  ;;  %v8929_v40 = vor.u32 %v9973_v51, %v8928_v25  ;;  %v8450_v44 = vld [vmem:[#allocation8 + $0x378] sm:$0xf0]  ;;  %v9963_v25 = vld [vmem:[#allocation8 + $0x6ec] sm:$0xf] }
 0x313   :  { %5429 = vmatpush.bf16.msra.mxu0 %v8993_v45  ;;  %v8325_v45 = vor.u32 %v9819_v7, %v8322_v62  ;;  %v8453_v11 = vor.u32 %v9851_v12, %v8450_v44  ;;  %v8898_v51 = vld [vmem:[#allocation8 + $0x6f8] sm:$0xf0]  ;;  %v11017_v62 = vpop.f32.mrf.mxu2  ;;  %v9080_v12 = vld [vmem:[#allocation11 + $0x60] sm:$0xf]  ;;  %v10011_v44 = vld [vmem:[#allocation11 + $0x64] sm:$0xf0]  ;;  %v11023_v36 = vpop.f32.mrf.mxu1 }
 0x314   :  { %v8901_v23 = vor.u32 %v9963_v25, %v8898_v51  ;;  %v8978_v7 = vld [vmem:[#allocation8 + $0x798] sm:$0xf0] }
 0x315   :  { %5517 = vmatpush.bf16.msra.mxu1 %v8677_v41  ;;  %5504 = vmatpush.bf16.msra.mxu3 %v8533_v10  ;;  %v8370_v41 = vld [vmem:[#allocation8 + $0x2d8] sm:$0xf0]  ;;  %v9855_v10 = vld [vmem:[#allocation8 + $0x38c] sm:$0xf] }
 0x316   :  { %5416 = vmatpush.bf16.msra.mxu2 %v8849_v24  ;;  %v8373_v1 = vor.u32 %v9831_v8, %v8370_v41  ;;  %v9847_v24 = vld [vmem:[#allocation8 + $0x34c] sm:$0xf]  ;;  %v8885_v41 = vor.u32 %v9959_v57, %v8882_v3  ;;  %v9128_v57 = vld [vmem:[#allocation11 + $0xc0] sm:$0xf] }
 0x317   :  { %5430 = vmatpush.bf16.msra.mxu0 %v8977_v37  ;;  %v8434_v37 = vld [vmem:[#allocation8 + $0x358] sm:$0xf0]  ;;  %v9955_v8 = vld [vmem:[#allocation8 + $0x6ac] sm:$0xf] }
 0x318   :  { %5505 = vmatmul.bf16.vlgmr.msra.gmra.mxu3 %v10886_v27  ;;  %v8817_v27 = vor.u32 %v9945_v52, %v8816_v59  ;;  %v8437_v55 = vor.u32 %v9847_v24, %v8434_v37  ;;  %v11001_v59 = vpop.f32.mrf.mxu0  ;;  %v11003_v52 = vpop.f32.mrf.mxu3 }
 0x319   :  { %5518 = vmatpush.bf16.msra.mxu1 %v8661_v49  ;;  %v8466_v49 = vld [vmem:[#allocation8 + $0x398] sm:$0xf0] }
 0x31a   :  { %5417 = vmatpush.bf16.msra.mxu2 %v8833_v50  ;;  %v8469_v61 = vor.u32 %v9855_v10, %v8466_v49  ;;  %v9843_v50 = vld [vmem:[#allocation8 + $0x32c] sm:$0xf]  ;;  %v8869_v10 = vor.u32 %v9955_v8, %v8866_v0 }
 0x31b   :  { %5431 = vmatpush.bf16.msra.mxu0 %v8961_v46  ;;  %v8418_v46 = vld [vmem:[#allocation8 + $0x338] sm:$0xf0] }
 0x31c   :  { %5519 = vmatmul.bf16.vlgmr.msra.gmra.mxu1 %v10888_v9  ;;  %v8945_v9 = vor.u32 %v9977_v35, %v8944_v13  ;;  %v8293_v13 = vor.u32 %v9811_v33, %v8290_v54  ;;  %v8421_v35 = vor.u32 %v9843_v50, %v8418_v46  ;;  %v9979_v33 = vld [vmem:[#allocation8 + $0x76c] sm:$0xf]  ;;  %v8962_v54 = vld [vmem:[#allocation8 + $0x778] sm:$0xf0]  ;;  %v9072_v50 = vld [vmem:[#allocation11 + $0x50] sm:$0xf] }
 0x31d   :  { %v10009_v46 = vld [vmem:[#allocation11 + $0x54] sm:$0xf0]  ;;  %v8965_v51 = vor.u32 %v9979_v33, %v8962_v54 }
 0x31e   :  { %5418 = vmatpush.bf16.msra.mxu2 %v8817_v27  ;;  %v9807_v27 = vld [vmem:[#allocation8 + $0x20c] sm:$0xf] }
 0x31f   :  { %5432 = vmatpush.bf16.msra.mxu0 %v8945_v9  ;;  %v8274_v9 = vld [vmem:[#allocation8 + $0x218] sm:$0xf0] }
 0x320   :  { %v8277_v38 = vor.u32 %v9807_v27, %v8274_v9  ;;  %v10025_v27 = vld [vmem:[#allocation11 + $0xd4] sm:$0xf0]  ;;  %v9943_v9 = vld [vmem:[#allocation8 + $0x64c] sm:$0xf] }
 0x322   :  { %5419 = vmatpush.bf16.msra.mxu2 %v8801_v20  ;;  %v9995_v20 = vld [vmem:[#allocation8 + $0x7ec] sm:$0xf] }
 0x323   :  { %5433 = vmatpush.bf16.msra.mxu0 %v8929_v40  ;;  %v9026_v40 = vld [vmem:[#allocation8 + $0x7f8] sm:$0xf0] }
 0x324   :  { %v9029_v17 = vor.u32 %v9995_v20, %v9026_v40  ;;  %v8818_v20 = vld [vmem:[#allocation8 + $0x658] sm:$0xf0]  ;;  %v9975_v40 = vld [vmem:[#allocation8 + $0x74c] sm:$0xf] }
 0x326   :  { %5420 = vmatpush.bf16.msra.mxu2 %v8785_v15  ;;  %v9991_v15 = vld [vmem:[#allocation8 + $0x7cc] sm:$0xf] }
 0x327   :  { %5434 = vmatpush.bf16.msra.mxu0 %v8913_v58  ;;  %v9010_v58 = vld [vmem:[#allocation8 + $0x7d8] sm:$0xf0] }
 0x328   :  { %v9013_v28 = vor.u32 %v9991_v15, %v9010_v58  ;;  %v10023_v15 = vld [vmem:[#allocation11 + $0xc4] sm:$0xf0] }
 0x329   :  { %5421 = vmatmul.bf16.vlgmr.msra.gmra.mxu2 %v10977_v18  ;;  %v9939_v58 = vld [vmem:[#allocation8 + $0x62c] sm:$0xf]  ;;  %v9129_v8 = vor.u32 %v10023_v15, %v9128_v57  ;;  %v5129_v57 = vadd.f32 %v10999_v5, %v10997_v42  ;;  %v10010_v5 = vld [vmem:[#allocation11 + $0x64] sm:$0xf] }
 0x32a   :  { %5469 = vmatpush.bf16.msrb.mxu2 %v8389_v48  ;;  %5435 = vmatmul.bf16.vlgmr.msra.gmra.mxu0 %v10979_v39  ;;  %v11009_v48 = vpop.f32.mrf.mxu3 }
 0x32b   :  { %5483 = vmatpush.bf16.msrb.mxu0 %v8517_v16  ;;  %v11011_v16 = vpop.f32.mrf.mxu0 }
 0x32e   :  { %5470 = vmatpush.bf16.msrb.mxu2 %v8373_v1  ;;  %v9987_v1 = vld [vmem:[#allocation8 + $0x7ac] sm:$0xf] }
 0x32f   :  { %5484 = vmatpush.bf16.msrb.mxu0 %v8501_v31  ;;  %v8994_v31 = vld [vmem:[#allocation8 + $0x7b8] sm:$0xf0] }
 0x330   :  { %v8997_v49 = vor.u32 %v9987_v1, %v8994_v31  ;;  %v8802_v1 = vld [vmem:[#allocation8 + $0x638] sm:$0xf0]  ;;  %v9971_v31 = vld [vmem:[#allocation8 + $0x72c] sm:$0xf] }
 0x332   :  { %5471 = vmatpush.bf16.msrb.mxu2 %v8357_v22  ;;  %v9089_v22 = vor.u32 %v10013_v29, %v9088_v2  ;;  %v11021_v24 = vpop.f32.mrf.mxu3  ;;  %v8930_v2 = vld [vmem:[#allocation8 + $0x738] sm:$0xf0]  ;;  %v9056_v29 = vld [vmem:[#allocation11 + $0x30] sm:$0xf] }
 0x333   :  { %5485 = vmatpush.bf16.msrb.mxu0 %v8485_v32  ;;  %v10029_v32 = vld [vmem:[#allocation11 + $0xf4] sm:$0xf0] }
 0x334   :  { %v9153_v4 = vor.u32 %v10029_v32, %v9152_v43  ;;  %6059 = vmatpush.bf16.msrb.mxu3 %v9089_v22  ;;  %v10005_v43 = vld [vmem:[#allocation11 + $0x34] sm:$0xf0]  ;;  %v9120_v22 = vld [vmem:[#allocation11 + $0xb0] sm:$0xf] }
 0x336   :  { %5472 = vmatpush.bf16.msrb.mxu2 %v8341_v56  ;;  %v8850_v56 = vld [vmem:[#allocation8 + $0x698] sm:$0xf0]  ;;  %6073 = vmatpush.bf16.msrb.mxu1 %v9153_v4 }
 0x337   :  { %5486 = vmatpush.bf16.msrb.mxu0 %v8469_v61  ;;  %v9983_v61 = vld [vmem:[#allocation8 + $0x78c] sm:$0xf]  ;;  %v8853_v37 = vor.u32 %v9951_v14, %v8850_v56  ;;  %v9057_v14 = vor.u32 %v10005_v43, %v9056_v29  ;;  %v10021_v4 = vld [vmem:[#allocation11 + $0xb4] sm:$0xf0]  ;;  %v8933_v56 = vor.u32 %v9971_v31, %v8930_v2  ;;  %v10028_v29 = vld [vmem:[#allocation11 + $0xf4] sm:$0xf] }
 0x338   :  { %v9154_v43 = vld [vmem:[#allocation11 + $0xf8] sm:$0xf0] }
 0x33a   :  { %5473 = vmatpush.bf16.msrb.mxu2 %v8325_v45  ;;  %v9081_v45 = vor.u32 %v10011_v44, %v9080_v12  ;;  %v5226_v32 = vpop.f32.mrf.mxu3  ;;  %v9967_v12 = vld [vmem:[#allocation8 + $0x70c] sm:$0xf] }
 0x33b   :  { %5487 = vmatpush.bf16.msrb.mxu0 %v8453_v11 }
 0x33c   :  { %6060 = vmatpush.bf16.msrb.mxu3 %v9081_v45  ;;  %v9048_v45 = vld [vmem:[#allocation11 + $0x20] sm:$0xf] }
 0x33e   :  { %5474 = vmatpush.bf16.msrb.mxu2 %v8309_v60  ;;  %v8981_v60 = vor.u32 %v9983_v61, %v8978_v7  ;;  %v9935_v61 = vld [vmem:[#allocation8 + $0x60c] sm:$0xf]  ;;  %v8786_v7 = vld [vmem:[#allocation8 + $0x618] sm:$0xf0] }
 0x33f   :  { %5488 = vmatpush.bf16.msrb.mxu0 %v8437_v55  ;;  %v8834_v55 = vld [vmem:[#allocation8 + $0x678] sm:$0xf0]  ;;  %v8789_v33 = vor.u32 %v9935_v61, %v8786_v7 }
 0x340   :  { %v8837_v25 = vor.u32 %v9947_v6, %v8834_v55  ;;  %v5240_v6 = vpop.f32.mrf.mxu1 }
 0x342   :  { %5475 = vmatpush.bf16.msrb.mxu2 %v8293_v13  ;;  %v9136_v13 = vld [vmem:[#allocation11 + $0xd0] sm:$0xf] }
 0x343   :  { %5489 = vmatpush.bf16.msrb.mxu0 %v8421_v35  ;;  %v9073_v35 = vor.u32 %v10009_v46, %v9072_v50  ;;  %v9137_v30 = vor.u32 %v10025_v27, %v9136_v13  ;;  %v11031_v50 = vld [vmem:[#allocation10] sm:$0xf]  ;;  %v9040_v46 = vld [vmem:[#allocation11 + $0x10] sm:$0xf]  ;;  %v10001_v13 = vld [vmem:[#allocation11 + $0x14] sm:$0xf0] }
 0x345   :  { %v11019_v11 = vpop.f32.mrf.mxu0  ;;  %6061 = vmatpush.bf16.msrb.mxu3 %v9073_v35  ;;  %v9104_v35 = vld [vmem:[#allocation11 + $0x90] sm:$0xf] }
 0x346   :  { %5476 = vmatpush.bf16.msrb.mxu2 %v8277_v38  ;;  %v8946_v38 = vld [vmem:[#allocation8 + $0x758] sm:$0xf0] }
 0x347   :  { %5490 = vmatpush.bf16.msrb.mxu0 %v8405_v26  ;;  %v8949_v0 = vor.u32 %v9975_v40, %v8946_v38  ;;  %v5228_v40 = vpop.f32.mrf.mxu3  ;;  %v9032_v38 = vld [vmem:[#allocation11] sm:$0xf] }
 0x349   :  { %5477 = vmatmul.bf16.vlgmr.msrb.gmra.mxu2 %v10826_v21  ;;  %v9144_v21 = vld [vmem:[#allocation11 + $0xe0] sm:$0xf] }
 0x34a   :  { %5525 = vmatpush.bf16.msra.mxu2 %v8901_v23  ;;  %5491 = vmatmul.bf16.vlgmr.msrb.gmra.mxu0 %v10828_v47  ;;  %v10027_v47 = vld [vmem:[#allocation11 + $0xe4] sm:$0xf0]  ;;  %v9064_v23 = vld [vmem:[#allocation11 + $0x40] sm:$0xf] }
 0x34b   :  { %5539 = vmatpush.bf16.msra.mxu0 %v9029_v17  ;;  %v9145_v53 = vor.u32 %v10027_v47, %v9144_v21  ;;  %v11025_v26 = vpop.f32.mrf.mxu2  ;;  %v10007_v17 = vld [vmem:[#allocation11 + $0x44] sm:$0xf0]  ;;  %v8914_v21 = vld [vmem:[#allocation8 + $0x718] sm:$0xf0] }
 0x34c   :  { %v9065_v3 = vor.u32 %v10007_v17, %v9064_v23  ;;  %v10003_v47 = vld [vmem:[#allocation11 + $0x24] sm:$0xf0]  ;;  %v8917_v54 = vor.u32 %v9967_v12, %v8914_v21  ;;  %v9096_v17 = vld [vmem:[#allocation11 + $0x80] sm:$0xf] }
 0x34d   :  { %6074 = vmatpush.bf16.msrb.mxu1 %v9145_v53  ;;  %v9049_v53 = vor.u32 %v10003_v47, %v9048_v45  ;;  %v9999_v23 = vld [vmem:[#allocation11 + $0x4] sm:$0xf0] }
 0x34e   :  { %5526 = vmatpush.bf16.msra.mxu2 %v8885_v41  ;;  %v11027_v41 = vpop.f32.mrf.mxu0  ;;  %6062 = vmatpush.bf16.msrb.mxu3 %v9065_v3  ;;  %v5241_v3 = vadd.f32 %v5240_v6, %v5226_v32  ;;  %v9082_v32 = vld [vmem:[#allocation11 + $0x68] sm:$0xf0] }
 0x34f   :  { %5540 = vmatpush.bf16.msra.mxu0 %v9013_v28  ;;  %v8821_v28 = vor.u32 %v9943_v9, %v8818_v20  ;;  %v9041_v9 = vor.u32 %v10001_v13, %v9040_v46  ;;  %v5282_v47 = vpop.f32.mrf.mxu3 }
 0x351   :  { %6075 = vmatpush.bf16.msrb.mxu1 %v9137_v30  ;;  %v10017_v30 = vld [vmem:[#allocation11 + $0x94] sm:$0xf0] }
 0x352   :  { %5527 = vmatpush.bf16.msra.mxu2 %v8869_v10  ;;  %v9121_v10 = vor.u32 %v10021_v4, %v9120_v22  ;;  %6063 = vmatpush.bf16.msrb.mxu3 %v9057_v14  ;;  %v9105_v20 = vor.u32 %v10017_v30, %v9104_v35  ;;  %v5143_v22 = vadd.f32 %v11007_v63, %v5129_v57  ;;  %v5242_v14 = vpop.f32.mrf.mxu1  ;;  %v10022_v30 = vld [vmem:[#allocation11 + $0xc4] sm:$0xf] }
 0x353   :  { %5541 = vmatpush.bf16.msra.mxu0 %v8997_v49  ;;  %v8805_v49 = vor.u32 %v9939_v58, %v8802_v1  ;;  %v11029_v44 = vpop.f32.mrf.mxu2  ;;  %v9033_v58 = vor.u32 %v9999_v23, %v9032_v38  ;;  %v9157_v4 = vor.u32 %v10028_v29, %v9154_v43  ;;  %v5131_v63 = vadd.f32 %v11005_v19, %v11003_v52  ;;  %v10006_v19 = vld [vmem:[#allocation11 + $0x44] sm:$0xf]  ;;  %v9130_v38 = vld [vmem:[#allocation11 + $0xc8] sm:$0xf0]  ;;  %v9122_v43 = vld [vmem:[#allocation11 + $0xb8] sm:$0xf0] }
 0x354   :  { %v5157_v61 = vadd.f32 %v11001_v59, %v5143_v22  ;;  %v9138_v59 = vld [vmem:[#allocation11 + $0xd8] sm:$0xf0] }
 0x355   :  { %6076 = vmatpush.bf16.msrb.mxu1 %v9129_v8  ;;  %v10015_v8 = vld [vmem:[#allocation11 + $0x84] sm:$0xf0]  ;;  %v5145_v13 = vadd.f32 %v11017_v62, %v5131_v63 }
 0x356   :  { %5528 = vmatpush.bf16.msra.mxu2 %v8853_v37  ;;  %v9112_v37 = vld [vmem:[#allocation11 + $0xa0] sm:$0xf]  ;;  %6064 = vmatpush.bf16.msrb.mxu3 %v9049_v53  ;;  %v9097_v31 = vor.u32 %v10015_v8, %v9096_v17  ;;  %v5171_v45 = vadd.f32 %v11009_v48, %v5157_v61  ;;  %v10008_v53 = vld [vmem:[#allocation11 + $0x54] sm:$0xf]  ;;  %v9066_v48 = vld [vmem:[#allocation11 + $0x48] sm:$0xf0]  ;;  %v9133_v17 = vor.u32 %v10022_v30, %v9130_v38 }
 0x357   :  { %5542 = vmatpush.bf16.msra.mxu0 %v8981_v60  ;;  %v10019_v60 = vld [vmem:[#allocation11 + $0xa4] sm:$0xf0]  ;;  %v5268_v27 = vpop.f32.mrf.mxu0  ;;  %v5159_v23 = vadd.f32 %v11011_v16, %v5145_v13  ;;  %v5284_v16 = vpop.f32.mrf.mxu3 }
 0x358   :  { %v9113_v55 = vor.u32 %v10019_v60, %v9112_v37  ;;  %v9074_v37 = vld [vmem:[#allocation11 + $0x58] sm:$0xf0]  ;;  %v10024_v60 = vld [vmem:[#allocation11 + $0xd4] sm:$0xf] }
 0x359   :  { %6077 = vmatpush.bf16.msrb.mxu1 %v9121_v10  ;;  %v10026_v10 = vld [vmem:[#allocation11 + $0xe4] sm:$0xf]  ;;  %v9077_v46 = vor.u32 %v10008_v53, %v9074_v37  ;;  %v9141_v35 = vor.u32 %v10024_v60, %v9138_v59 }
 0x35a   :  { %5529 = vmatpush.bf16.msra.mxu2 %v8837_v25  ;;  %v5559_v25 = vperm.slane %v11031_v50, 0  ;;  %6065 = vmatpush.bf16.msrb.mxu3 %v9041_v9  ;;  %v5296_v52 = vpop.f32.mrf.mxu1 }
 0x35b   :  { %5543 = vmatpush.bf16.msra.mxu0 %v8965_v51  ;;  %v5560_v51 = vperm.slane %v11031_v50, 1  ;;  %v5254_v15 = vpop.f32.mrf.mxu2 }
 0x35c   :  { %v5255_v42 = vadd.f32 %v5254_v15, %v5241_v3  ;;  %v5173_v15 = vadd.f32 %v11021_v24, %v5159_v23 }
 0x35d   :  { %6078 = vmatpush.bf16.msrb.mxu1 %v9113_v55  ;;  %v5567_v1 = vpack.c.bf16 %v5560_v51, %v5559_v25  ;;  %v5243_v55 = vadd.f32 %v5242_v14, %v5228_v40  ;;  %v5185_v25 = vadd.f32 %v11013_v34, %v5171_v45  ;;  %v9069_v40 = vor.u32 %v10006_v19, %v9066_v48  ;;  %v10020_v34 = vld [vmem:[#allocation11 + $0xb4] sm:$0xf] }
 0x35e   :  { %5530 = vmatpush.bf16.msra.mxu2 %v8821_v28  ;;  %v10012_v28 = vld [vmem:[#allocation11 + $0x74] sm:$0xf]  ;;  %6066 = vmatpush.bf16.msrb.mxu3 %v9033_v58  ;;  %v5269_v21 = vadd.f32 %v5268_v27, %v5255_v42  ;;  %v9125_v22 = vor.u32 %v10020_v34, %v9122_v43  ;;  %v5187_v24 = vadd.f32 %v11023_v36, %v5173_v15  ;;  %v10002_v42 = vld [vmem:[#allocation11 + $0x24] sm:$0xf] }
 0x35f   :  { %5544 = vmatpush.bf16.msra.mxu0 %v8949_v0  ;;  %v9090_v0 = vld [vmem:[#allocation11 + $0x78] sm:$0xf0]  ;;  %v5270_v7 = vpop.f32.mrf.mxu0  ;;  %v5199_v62 = vadd.f32 %v11025_v26, %v5185_v25  ;;  %v10000_v36 = vld [vmem:[#allocation11 + $0x14] sm:$0xf] }
 0x360   :  { %v9093_v2 = vor.u32 %v10012_v28, %v9090_v0  ;;  %v5283_v9 = vadd.f32 %v5282_v47, %v5269_v21  ;;  %v10004_v28 = vld [vmem:[#allocation11 + $0x34] sm:$0xf]  ;;  %v9058_v0 = vld [vmem:[#allocation11 + $0x38] sm:$0xf0] }
 0x361   :  { %6079 = vmatpush.bf16.msrb.mxu1 %v9105_v20  ;;  %v9061_v29 = vor.u32 %v10004_v28, %v9058_v0  ;;  %v5213_v26 = vadd.f32 %v11019_v11, %v5199_v62  ;;  %v9042_v47 = vld [vmem:[#allocation11 + $0x18] sm:$0xf0] }
 0x362   :  { %5531 = vmatpush.bf16.msra.mxu2 %v8805_v49  ;;  %6115 = vmatpush.bf16.msra.mxu3 %v9093_v2  ;;  %v5572_v49 = vunpack.c.h.b16 %v5567_v1  ;;  %v5297_v3 = vadd.f32 %v5296_v52, %v5283_v9  ;;  %v5298_v61 = vpop.f32.mrf.mxu1 }
 0x363   :  { %5545 = vmatpush.bf16.msra.mxu0 %v8933_v56  ;;  %v9146_v56 = vld [vmem:[#allocation11 + $0xe8] sm:$0xf0]  ;;  %v5256_v6 = vpop.f32.mrf.mxu2 }
 0x364   :  { %v9149_v12 = vor.u32 %v10026_v10, %v9146_v56  ;;  %v5257_v27 = vadd.f32 %v5256_v6, %v5243_v55  ;;  %v9114_v56 = vld [vmem:[#allocation11 + $0xa8] sm:$0xf0]  ;;  %v10016_v6 = vld [vmem:[#allocation11 + $0x94] sm:$0xf]  ;;  %v9045_v55 = vor.u32 %v10000_v36, %v9042_v47 }
 0x365   :  { %6080 = vmatpush.bf16.msrb.mxu1 %v9097_v31 }
 0x366   :  { %5532 = vmatpush.bf16.msra.mxu2 %v8789_v33  ;;  %v5271_v57 = vadd.f32 %v5270_v7, %v5257_v27 }
 0x367   :  { %5546 = vmatpush.bf16.msra.mxu0 %v8917_v54  ;;  %v5576_v54 = vpack.c.b16 %v5572_v49, %v5572_v49  ;;  %v5324_v58 = vpop.f32.mrf.mxu0 }
 0x369   :  { %5533 = vmatmul.bf16.vlgmr.msra.gmra.mxu2 %v10977_v18  ;;  %6129 = vmatpush.bf16.msra.mxu1 %v9157_v4  ;;  %v5571_v18 = vunpack.c.l.b16 %v5567_v1  ;;  %v5584_v20 = vpack.i.b16 %v5576_v54, %v5576_v54  ;;  %v5285_v4 = vadd.f32 %v5284_v16, %v5271_v57  ;;  %v9998_v54 = vld [vmem:[#allocation11 + $0x4] sm:$0xf] }
 0x36a   :  { %5547 = vmatmul.bf16.vlgmr.msra.gmra.mxu0 %v10979_v39  ;;  %v9085_v39 = vor.u32 %v10010_v5, %v9082_v32  ;;  %v9050_v5 = vld [vmem:[#allocation11 + $0x28] sm:$0xf0]  ;;  %v10018_v32 = vld [vmem:[#allocation11 + $0xa4] sm:$0xf] }
 0x36b   :  { %v5575_v33 = vpack.c.b16 %v5571_v18, %v5571_v18  ;;  %v5586_v2 = vperm.slane %v5584_v20, 0  ;;  %v9117_v7 = vor.u32 %v10018_v32, %v9114_v56  ;;  %v5299_v63 = vadd.f32 %v5298_v61, %v5285_v4  ;;  %v9280_v32 = vld [vmem:[#allocation11 + $0x1f0] sm:$0xf] }
 0x36c   :  { %6116 = vmatpush.bf16.msra.mxu3 %v9085_v39  ;;  %v9053_v39 = vor.u32 %v10002_v42, %v9050_v5  ;;  %v9216_v42 = vld [vmem:[#allocation11 + $0x170] sm:$0xf]  ;;  %v10045_v5 = vld [vmem:[#allocation11 + $0x174] sm:$0xf0] }
 0x36d   :  { %6130 = vmatpush.bf16.msra.mxu1 %v9149_v12  ;;  %v5580_v51 = vpack.i.b16 %v5575_v33, %v5575_v33  ;;  %v5604_v49 = vunpack.c.l.bf16 %v5586_v2  ;;  %v5201_v12 = vadd.f32 %v11029_v44, %v5187_v24  ;;  %v9106_v33 = vld [vmem:[#allocation11 + $0x98] sm:$0xf0]  ;;  %v9098_v44 = vld [vmem:[#allocation11 + $0x88] sm:$0xf0] }
 0x36e   :  { %v5310_v8 = vpop.f32.mrf.mxu2  ;;  %v9109_v13 = vor.u32 %v10016_v6, %v9106_v33  ;;  %v9200_v6 = vld [vmem:[#allocation11 + $0x150] sm:$0xf] }
 0x36f   :  { %v5311_v1 = vadd.f32 %v5310_v8, %v5297_v3  ;;  %v5582_v31 = vperm.slane %v5580_v51, 0  ;;  %v5326_v59 = vpop.f32.mrf.mxu0  ;;  %v5215_v27 = vadd.f32 %v11027_v41, %v5201_v12  ;;  %v10059_v12 = vld [vmem:[#allocation11 + $0x1e4] sm:$0xf0] }
 0x370   :  { %6117 = vmatpush.bf16.msra.mxu3 %v9077_v46  ;;  %v9034_v46 = vld [vmem:[#allocation11 + $0x8] sm:$0xf0] }
 0x371   :  { %6131 = vmatpush.bf16.msra.mxu1 %v9141_v35  ;;  %v5325_v14 = vadd.f32 %v5324_v58, %v5311_v1  ;;  %v5603_v18 = vunpack.c.l.bf16 %v5582_v31  ;;  %v10014_v35 = vld [vmem:[#allocation11 + $0x84] sm:$0xf]  ;;  %v9037_v19 = vor.u32 %v9998_v54, %v9034_v46 }
 0x372   :  { %v9101_v48 = vor.u32 %v10014_v35, %v9098_v44  ;;  %v10039_v35 = vld [vmem:[#allocation11 + $0x144] sm:$0xf0]  ;;  %v9256_v44 = vld [vmem:[#allocation11 + $0x1c0] sm:$0xf] }
 0x373   :  { %v5553_v10 = vpack.c.bf16 %v5325_v14, %v5213_v26  ;;  %v11055_v26 = vpop.f32.mrf.mxu1 }
 0x374   :  { %6118 = vmatpush.bf16.msra.mxu3 %v9069_v40 }
 0x375   :  { %6132 = vmatpush.bf16.msra.mxu1 %v9133_v17  ;;  %v5595_v21 = vunpack.c.l.bf16 %v5553_v10  ;;  %v5596_v11 = vunpack.c.h.bf16 %v5553_v10  ;;  %v9217_v10 = vor.u32 %v10045_v5, %v9216_v42  ;;  %v9160_v5 = vld [vmem:[#allocation11 + $0x100] sm:$0xf] }
 0x376   :  { %v5312_v45 = vpop.f32.mrf.mxu2 }
 0x377   :  { %v5607_v53 = vadd.f32 %v5603_v18, %v5595_v21  ;;  %v5608_v37 = vadd.f32 %v5604_v49, %v5596_v11  ;;  %v5313_v60 = vadd.f32 %v5312_v45, %v5299_v63  ;;  %6087 = vmatpush.bf16.msrb.mxu2 %v9217_v10  ;;  %v9224_v10 = vld [vmem:[#allocation11 + $0x180] sm:$0xf] }
 0x378   :  { %6119 = vmatpush.bf16.msra.mxu3 %v9061_v29 }
 0x379   :  { %6133 = vmatpush.bf16.msra.mxu1 %v9125_v22  ;;  %v5615_v9 = vpack.c.bf16 %v5608_v37, %v5607_v53  ;;  %v5327_v52 = vadd.f32 %v5326_v59, %v5313_v60  ;;  %v11053_v22 = vpop.f32.mrf.mxu3  ;;  %v10041_v53 = vld [vmem:[#allocation11 + $0x154] sm:$0xf0]  ;;  %v9264_v37 = vld [vmem:[#allocation11 + $0x1d0] sm:$0xf] }
 0x37a   :  { %v9201_v60 = vor.u32 %v10041_v53, %v9200_v6  ;;  %v9282_v53 = vld [vmem:[#allocation11 + $0x1f8] sm:$0xf0] }
 0x37b   :  { %v5555_v30 = vpack.c.bf16 %v5327_v52, %v5215_v27  ;;  %v5619_v25 = vunpack.c.l.bf16 %v5615_v9  ;;  %v5620_v51 = vunpack.c.h.bf16 %v5615_v9  ;;  %v11063_v56 = vpop.f32.mrf.mxu1 }
 0x37c   :  { %6120 = vmatpush.bf16.msra.mxu3 %v9053_v39  ;;  %v10043_v39 = vld [vmem:[#allocation11 + $0x164] sm:$0xf0] }
 0x37d   :  { %6134 = vmatpush.bf16.msra.mxu1 %v9117_v7  ;;  %v5599_v20 = vunpack.c.l.bf16 %v5555_v30  ;;  %v5600_v40 = vunpack.c.h.bf16 %v5555_v30  ;;  %v5635_v38 = vmul.f32 0.20019531, %v5619_v25  ;;  %v5636_v23 = vmul.f32 0.20019531, %v5620_v51  ;;  %v9272_v7 = vld [vmem:[#allocation11 + $0x1e0] sm:$0xf]  ;;  %v10037_v30 = vld [vmem:[#allocation11 + $0x134] sm:$0xf0] }
 0x37e   :  { %vm5627_vm9 = vcmp.gt.f32.partialorder %v5619_v25, 0.0  ;;  %vm5628_vm10 = vcmp.gt.f32.partialorder %v5620_v51, 0.0  ;;  %v9273_v11 = vor.u32 %v10059_v12, %v9272_v7  ;;  %v9248_v25 = vld [vmem:[#allocation11 + $0x1b0] sm:$0xf]  ;;  %v10044_v7 = vld [vmem:[#allocation11 + $0x174] sm:$0xf] }
 0x37f   :  { %v5611_v17 = vadd.f32 %v5603_v18, %v5599_v20  ;;  %v5612_v62 = vadd.f32 %v5604_v49, %v5600_v40  ;;  %v5643_v41 = vpack.c.bf16 %v5636_v23, %v5635_v38  ;;  %vm5647_vm13 = vmpackc.low %vm5628_vm10, %vm5627_vm9  ;;  %v10061_v18 = vld [vmem:[#allocation11 + $0x1f4] sm:$0xf0]  ;;  %v9208_v49 = vld [vmem:[#allocation11 + $0x160] sm:$0xf] }
 0x380   :  { %6121 = vmatpush.bf16.msra.mxu3 %v9045_v55  ;;  %v9281_v61 = vor.u32 %v10061_v18, %v9280_v32  ;;  %v9209_v21 = vor.u32 %v10043_v39, %v9208_v49  ;;  %v10057_v55 = vld [vmem:[#allocation11 + $0x1d4] sm:$0xf0]  ;;  %v10031_v32 = vld [vmem:[#allocation11 + $0x104] sm:$0xf0]  ;;  %v5353_v18 = vadd.f32 %v11055_v26, %v11053_v22  ;;  %v9218_v12 = vld [vmem:[#allocation11 + $0x178] sm:$0xf0] }
 0x381   :  { %6135 = vmatpush.bf16.msra.mxu1 %v9109_v13  ;;  %v5617_v57 = vpack.c.bf16 %v5612_v62, %v5611_v17  ;;  %v5651_v0 = vsel %vm5647_vm13, %v5615_v9, %v5643_v41  ;;  %v11061_v24 = vpop.f32.mrf.mxu3  ;;  %v9265_v46 = vor.u32 %v10057_v55, %v9264_v37  ;;  %v9192_v13 = vld [vmem:[#allocation11 + $0x140] sm:$0xf]  ;;  %v10055_v9 = vld [vmem:[#allocation11 + $0x1c4] sm:$0xf0]  ;;  %v10053_v20 = vld [vmem:[#allocation11 + $0x1b4] sm:$0xf0]  ;;  %v9161_v39 = vor.u32 %v10031_v32, %v9160_v5 }
 0x382   :  { %v5723_v1 = vunpack.c.l.b16 %v5651_v0  ;;  %v5724_v2 = vunpack.c.h.b16 %v5651_v0  ;;  %6101 = vmatpush.bf16.msrb.mxu0 %v9281_v61  ;;  %6088 = vmatpush.bf16.msrb.mxu2 %v9209_v21  ;;  %v9193_v27 = vor.u32 %v10039_v35, %v9192_v13  ;;  %v9257_v52 = vor.u32 %v10055_v9, %v9256_v44  ;;  %v9176_v62 = vld [vmem:[#allocation11 + $0x120] sm:$0xf]  ;;  %v10033_v0 = vld [vmem:[#allocation11 + $0x114] sm:$0xf0]  ;;  %v10047_v61 = vld [vmem:[#allocation11 + $0x184] sm:$0xf0] }
 0x383   :  { %v5623_v3 = vunpack.c.l.bf16 %v5617_v57  ;;  %v5624_v15 = vunpack.c.h.bf16 %v5617_v57  ;;  %v11071_v47 = vpop.f32.mrf.mxu1  ;;  %v9249_v40 = vor.u32 %v10053_v20, %v9248_v25  ;;  %v9221_v6 = vor.u32 %v10044_v7, %v9218_v12  ;;  %v10042_v22 = vld [vmem:[#allocation11 + $0x164] sm:$0xf]  ;;  %v9210_v26 = vld [vmem:[#allocation11 + $0x168] sm:$0xf0]  ;;  %v10040_v20 = vld [vmem:[#allocation11 + $0x154] sm:$0xf] }
 0x384   :  { %6122 = vmatpush.bf16.msra.mxu3 %v9037_v19  ;;  %v10058_v13 = vld [vmem:[#allocation11 + $0x1e4] sm:$0xf]  ;;  %v9213_v9 = vor.u32 %v10042_v22, %v9210_v26  ;;  %v9242_v22 = vld [vmem:[#allocation11 + $0x1a8] sm:$0xf0] }
 0x385   :  { %6136 = vmatpush.bf16.msra.mxu1 %v9101_v48  ;;  %vm5631_vm11 = vcmp.gt.f32.partialorder %v5623_v3, 0.0  ;;  %vm5632_vm12 = vcmp.gt.f32.partialorder %v5624_v15, 0.0  ;;  %v5639_v58 = vmul.f32 0.20019531, %v5623_v3  ;;  %v5640_v8 = vmul.f32 0.20019531, %v5624_v15  ;;  %v9184_v48 = vld [vmem:[#allocation11 + $0x130] sm:$0xf] }
 0x386   :  { %vm5649_vm14 = vmpackc.low %vm5632_vm12, %vm5631_vm11  ;;  %6102 = vmatpush.bf16.msrb.mxu0 %v9273_v11  ;;  %6089 = vmatpush.bf16.msrb.mxu2 %v9201_v60  ;;  %v9185_v51 = vor.u32 %v10037_v30, %v9184_v48  ;;  %v9240_v3 = vld [vmem:[#allocation11 + $0x1a0] sm:$0xf]  ;;  %v10051_v15 = vld [vmem:[#allocation11 + $0x1a4] sm:$0xf0]  ;;  %v9225_v11 = vor.u32 %v10047_v61, %v9224_v10 }
 0x387   :  { %v5645_v28 = vpack.c.bf16 %v5640_v8, %v5639_v58  ;;  %v11057_v14 = vpop.f32.mrf.mxu0  ;;  %v9241_v58 = vor.u32 %v10051_v15, %v9240_v3  ;;  %v10052_v61 = vld [vmem:[#allocation11 + $0x1b4] sm:$0xf] }
 0x389   :  { %v5653_v34 = vsel %vm5649_vm14, %v5617_v57, %v5645_v28  ;;  %v11065_v63 = vpop.f32.mrf.mxu3  ;;  %v10035_v57 = vld [vmem:[#allocation11 + $0x124] sm:$0xf0]  ;;  %v9168_v28 = vld [vmem:[#allocation11 + $0x110] sm:$0xf] }
 0x38a   :  { %v5727_v31 = vunpack.c.l.b16 %v5653_v34  ;;  %v5728_v29 = vunpack.c.h.b16 %v5653_v34  ;;  %6103 = vmatpush.bf16.msrb.mxu0 %v9265_v46  ;;  %6090 = vmatpush.bf16.msrb.mxu2 %v9193_v27  ;;  %v9177_v41 = vor.u32 %v10035_v57, %v9176_v62  ;;  %v9232_v34 = vld [vmem:[#allocation11 + $0x190] sm:$0xf] }
 0x38b   :  { %v11079_v19 = vpop.f32.mrf.mxu1 }
 0x38c   :  { %v5731_v43 = vpack.c.b16 %v5727_v31, %v5723_v1  ;;  %v5732_v16 = vpack.c.b16 %v5728_v29, %v5724_v2  ;;  %v9169_v1 = vor.u32 %v10033_v0, %v9168_v28  ;;  %v10049_v31 = vld [vmem:[#allocation11 + $0x194] sm:$0xf0]  ;;  %v5561_v2 = vperm.slane %v11031_v50, 2 }
 0x38d   :  { %v5562_v29 = vperm.slane %v11031_v50, 3  ;;  %v10060_v50 = vld [vmem:[#allocation11 + $0x1f4] sm:$0xf] }
 0x38e   :  { %6067 = vmatmul.bf16.vlgmr.msrb.gmra.mxu3 %v5731_v43  ;;  %6081 = vmatmul.bf16.vlgmr.msrb.gmra.mxu1 %v5732_v16  ;;  %v11059_v4 = vpop.f32.mrf.mxu2  ;;  %v9285_v55 = vor.u32 %v10060_v50, %v9282_v53  ;;  %v9250_v50 = vld [vmem:[#allocation11 + $0x1b8] sm:$0xf0] }
 0x38f   :  { %v11067_v45 = vpop.f32.mrf.mxu0  ;;  %6104 = vmatpush.bf16.msrb.mxu0 %v9257_v52  ;;  %6091 = vmatpush.bf16.msrb.mxu2 %v9185_v51  ;;  %v5568_v21 = vpack.c.bf16 %v5562_v29, %v5561_v2  ;;  %v5367_v60 = vadd.f32 %v11059_v4, %v5353_v18  ;;  %v9274_v52 = vld [vmem:[#allocation11 + $0x1e8] sm:$0xf0]  ;;  %v5355_v4 = vadd.f32 %v11063_v56, %v11061_v24  ;;  %v10038_v24 = vld [vmem:[#allocation11 + $0x144] sm:$0xf] }
 0x390   :  { %v9277_v30 = vor.u32 %v10058_v13, %v9274_v52  ;;  %v9194_v56 = vld [vmem:[#allocation11 + $0x148] sm:$0xf0]  ;;  %v10048_v52 = vld [vmem:[#allocation11 + $0x194] sm:$0xf] }
 0x391   :  { %v11077_v59 = vpop.f32.mrf.mxu3  ;;  %v5573_v44 = vunpack.c.l.b16 %v5568_v21  ;;  %v5574_v27 = vunpack.c.h.b16 %v5568_v21  ;;  %v5381_v48 = vadd.f32 %v11057_v14, %v5367_v60  ;;  %v9197_v2 = vor.u32 %v10038_v24, %v9194_v56  ;;  %v9258_v29 = vld [vmem:[#allocation11 + $0x1c8] sm:$0xf0] }
 0x392   :  { %v9178_v60 = vld [vmem:[#allocation11 + $0x128] sm:$0xf0] }
 0x393   :  { %6105 = vmatpush.bf16.msrb.mxu0 %v9249_v40  ;;  %6092 = vmatpush.bf16.msrb.mxu2 %v9177_v41  ;;  %v5464_v8 = vpop.f32.mrf.mxu1  ;;  %v9202_v40 = vld [vmem:[#allocation11 + $0x158] sm:$0xf0]  ;;  %v5577_v3 = vpack.c.b16 %v5573_v44, %v5573_v44  ;;  %v5578_v15 = vpack.c.b16 %v5574_v27, %v5574_v27  ;;  %v5395_v28 = vadd.f32 %v11065_v63, %v5381_v48  ;;  %v10032_v44 = vld [vmem:[#allocation11 + $0x114] sm:$0xf] }
 0x394   :  { %v9170_v27 = vld [vmem:[#allocation11 + $0x118] sm:$0xf0] }
 0x395   :  { %v5409_v32 = vadd.f32 %v11071_v47, %v5395_v28  ;;  %v10034_v47 = vld [vmem:[#allocation11 + $0x124] sm:$0xf]  ;;  %v9234_v48 = vld [vmem:[#allocation11 + $0x198] sm:$0xf0] }
 0x396   :  { %v11069_v36 = vpop.f32.mrf.mxu2  ;;  %v10046_v28 = vld [vmem:[#allocation11 + $0x184] sm:$0xf] }
 0x397   :  { %6106 = vmatpush.bf16.msrb.mxu0 %v9241_v58  ;;  %6093 = vmatpush.bf16.msrb.mxu2 %v9169_v1  ;;  %v5369_v62 = vadd.f32 %v11069_v36, %v5355_v4  ;;  %v9205_v58 = vor.u32 %v10040_v20, %v9202_v40  ;;  %v9173_v40 = vor.u32 %v10032_v44, %v9170_v27  ;;  %v10074_v44 = vld [vmem:[#allocation14 + $0x60] sm:$0xff] }
 0x399   :  { %v5450_v38 = vpop.f32.mrf.mxu3 }
 0x39a   :  { %v5465_v37 = vadd.f32 %v5464_v8, %v5450_v38  ;;  %v10056_v38 = vld [vmem:[#allocation11 + $0x1d4] sm:$0xf]  ;;  %v9266_v8 = vld [vmem:[#allocation11 + $0x1d8] sm:$0xf0] }
 0x39b   :  { %6094 = vmatpush.bf16.msrb.mxu2 %v9161_v39  ;;  %v5466_v35 = vpop.f32.mrf.mxu1  ;;  %v9269_v0 = vor.u32 %v10056_v38, %v9266_v8  ;;  %v9186_v39 = vld [vmem:[#allocation11 + $0x138] sm:$0xf0]  ;;  %v10030_v8 = vld [vmem:[#allocation11 + $0x104] sm:$0xf] }
 0x39e   :  { %6123 = vmatmul.bf16.vlgmr.msra.gmra.mxu3 %v5731_v43  ;;  %6137 = vmatmul.bf16.vlgmr.msra.gmra.mxu1 %v5732_v16  ;;  %v9233_v43 = vor.u32 %v10049_v31, %v9232_v34  ;;  %v10054_v34 = vld [vmem:[#allocation11 + $0x1c4] sm:$0xf] }
 0x39f   :  { %6143 = vmatpush.bf16.msra.mxu2 %v9221_v6  ;;  %v9261_v5 = vor.u32 %v10054_v34, %v9258_v29  ;;  %v9226_v34 = vld [vmem:[#allocation11 + $0x188] sm:$0xf0] }
 0x3a0   :  { %6107 = vmatpush.bf16.msrb.mxu0 %v9233_v43  ;;  %v5383_v43 = vadd.f32 %v11067_v45, %v5369_v62 }
 0x3a1   :  { %v5452_v49 = vpop.f32.mrf.mxu3 }
 0x3a2   :  { %v5467_v14 = vadd.f32 %v5466_v35, %v5452_v49  ;;  %v10036_v49 = vld [vmem:[#allocation11 + $0x134] sm:$0xf]  ;;  %v5397_v7 = vadd.f32 %v11077_v59, %v5383_v43 }
 0x3a3   :  { %6144 = vmatpush.bf16.msra.mxu2 %v9213_v9  ;;  %v5520_v36 = vpop.f32.mrf.mxu1  ;;  %v9189_v6 = vor.u32 %v10036_v49, %v9186_v39 }
 0x3a4   :  { %6108 = vmatpush.bf16.msrb.mxu0 %v9225_v11  ;;  %v5411_v9 = vadd.f32 %v11079_v19, %v5397_v7 }
 0x3a7   :  { %v11073_v33 = vpop.f32.mrf.mxu0  ;;  %6145 = vmatpush.bf16.msra.mxu2 %v9205_v58 }
 0x3a8   :  { %6157 = vmatpush.bf16.msra.mxu0 %v9285_v55  ;;  %v10050_v55 = vld [vmem:[#allocation11 + $0x1a4] sm:$0xf] }
 0x3a9   :  { %v5506_v25 = vpop.f32.mrf.mxu3  ;;  %v9245_v59 = vor.u32 %v10050_v55, %v9242_v22  ;;  %v10076_v55 = vld [vmem:[#allocation14 + $0x70] sm:$0xff]  ;;  %v10067_v22 = vld [vmem:[#allocation14 + $0x28] sm:$0xff] }
 0x3ab   :  { %6146 = vmatpush.bf16.msra.mxu2 %v9197_v2 }
 0x3ac   :  { %v11075_v54 = vpop.f32.mrf.mxu2  ;;  %6158 = vmatpush.bf16.msra.mxu0 %v9277_v30 }
 0x3ad   :  { %v5423_v63 = vadd.f32 %v11075_v54, %v5409_v32 }
 0x3af   :  { %v11081_v23 = vpop.f32.mrf.mxu0  ;;  %6147 = vmatpush.bf16.msra.mxu2 %v9189_v6  ;;  %v5437_v26 = vadd.f32 %v11073_v33, %v5423_v63 }
 0x3b0   :  { %6159 = vmatpush.bf16.msra.mxu0 %v9269_v0 }
 0x3b1   :  { %v5508_v54 = vpop.f32.mrf.mxu3 }
 0x3b4   :  { %v11083_v17 = vpop.f32.mrf.mxu2  ;;  %6160 = vmatpush.bf16.msra.mxu0 %v9261_v5 }
 0x3b5   :  { %v5425_v20 = vadd.f32 %v11083_v17, %v5411_v9 }
 0x3b7   :  { %v5439_v0 = vadd.f32 %v11081_v23, %v5425_v20  ;;  %v10064_v20 = vld [vmem:[#allocation14 + $0x10] sm:$0xff] }
 0x3c7   :  { %v5492_v16 = vpop.f32.mrf.mxu0 }
 0x3cc   :  { %v5478_v42 = vpop.f32.mrf.mxu2 }
 0x3cd   :  { %v5479_v46 = vadd.f32 %v5478_v42, %v5465_v37  ;;  %v5592_v42 = vpack.i.b16 %v5578_v15, %v5578_v15  ;;  %v9253_v37 = vor.u32 %v10052_v61, %v9250_v50 }
 0x3cf   :  { %v5493_v51 = vadd.f32 %v5492_v16, %v5479_v46  ;;  %v5494_v57 = vpop.f32.mrf.mxu0  ;;  %v5588_v16 = vpack.i.b16 %v5577_v3, %v5577_v3  ;;  %v5594_v45 = vperm.slane %v5592_v42, 0  ;;  %v9181_v46 = vor.u32 %v10034_v47, %v9178_v60  ;;  %6161 = vmatpush.bf16.msra.mxu0 %v9253_v37  ;;  %v10069_v37 = vld [vmem:[#allocation14 + $0x38] sm:$0xff]  ;;  %v10068_v60 = vld [vmem:[#allocation14 + $0x30] sm:$0xff] }
 0x3d0   :  { %v10077_v47 = vld [vmem:[#allocation14 + $0x78] sm:$0xff]  ;;  %6365 = vmatpush.bf16.msrb.mxu3 %v10069_v37 }
 0x3d1   :  { %v5507_v31 = vadd.f32 %v5506_v25, %v5493_v51  ;;  %v5590_v11 = vperm.slane %v5588_v16, 0  ;;  %v5606_v25 = vunpack.c.l.bf16 %v5594_v45  ;;  %v5522_v51 = vpop.f32.mrf.mxu1  ;;  %6148 = vmatpush.bf16.msra.mxu2 %v9181_v46  ;;  %6379 = vmatpush.bf16.msrb.mxu1 %v10077_v47 }
 0x3d3   :  { %v5521_v18 = vadd.f32 %v5520_v36, %v5507_v31  ;;  %v5605_v4 = vunpack.c.l.bf16 %v5590_v11  ;;  %6162 = vmatpush.bf16.msra.mxu0 %v9245_v59  ;;  %v10066_v59 = vld [vmem:[#allocation14 + $0x20] sm:$0xff] }
 0x3d4   :  { %v5480_v41 = vpop.f32.mrf.mxu2  ;;  %6366 = vmatpush.bf16.msrb.mxu3 %v10068_v60 }
 0x3d5   :  { %v5481_v1 = vadd.f32 %v5480_v41, %v5467_v14  ;;  %6149 = vmatpush.bf16.msra.mxu2 %v9173_v40  ;;  %v9162_v14 = vld [vmem:[#allocation11 + $0x108] sm:$0xf0]  ;;  %6380 = vmatpush.bf16.msrb.mxu1 %v10076_v55  ;;  %v10072_v40 = vld [vmem:[#allocation14 + $0x50] sm:$0xff] }
 0x3d6   :  { %v9165_v56 = vor.u32 %v10030_v8, %v9162_v14  ;;  %v10062_v8 = vld [vmem:[#allocation14] sm:$0xff] }
 0x3d7   :  { %v5495_v10 = vadd.f32 %v5494_v57, %v5481_v1  ;;  %v9237_v57 = vor.u32 %v10048_v52, %v9234_v48  ;;  %v9229_v1 = vor.u32 %v10046_v28, %v9226_v34  ;;  %v10070_v14 = vld [vmem:[#allocation14 + $0x40] sm:$0xff] }
 0x3d8   :  { %6367 = vmatpush.bf16.msrb.mxu3 %v10067_v22 }
 0x3d9   :  { %v5509_v35 = vadd.f32 %v5508_v54, %v5495_v10  ;;  %6163 = vmatpush.bf16.msra.mxu0 %v9237_v57  ;;  %6150 = vmatpush.bf16.msra.mxu2 %v9165_v56 }
 0x3db   :  { %v5523_v62 = vadd.f32 %v5522_v51, %v5509_v35 }
 0x3dc   :  { %6368 = vmatpush.bf16.msrb.mxu3 %v10066_v59 }
 0x3dd   :  { %6164 = vmatpush.bf16.msra.mxu0 %v9229_v1 }
 0x3e7   :  { %v5548_v12 = vpop.f32.mrf.mxu0 }
 0x3ec   :  { %v5534_v21 = vpop.f32.mrf.mxu2 }
 0x3ed   :  { %v5535_v53 = vadd.f32 %v5534_v21, %v5521_v18 }
 0x3ef   :  { %v5549_v13 = vadd.f32 %v5548_v12, %v5535_v53  ;;  %v5550_v19 = vpop.f32.mrf.mxu0 }
 0x3f1   :  { %v5554_v30 = vpack.c.bf16 %v5549_v13, %v5437_v26  ;;  %v10075_v26 = vld [vmem:[#allocation14 + $0x68] sm:$0xff]  ;;  %v6173_v13 = vld [vmem:[#allocation13] sm:$0x3] }
 0x3f2   :  { %6381 = vmatpush.bf16.msrb.mxu1 %v10075_v26  ;;  %v6175_v27 = vperm.slane %v6173_v13, 0  ;;  %v6176_v9 = vperm.slane %v6173_v13, 1 }
 0x3f3   :  { %v5597_v38 = vunpack.c.l.bf16 %v5554_v30  ;;  %v5598_v33 = vunpack.c.h.bf16 %v5554_v30  ;;  %v10065_v30 = vld [vmem:[#allocation14 + $0x18] sm:$0xff] }
 0x3f4   :  { %v5536_v41 = vpop.f32.mrf.mxu2  ;;  %6369 = vmatpush.bf16.msrb.mxu3 %v10065_v30 }
 0x3f5   :  { %v5609_v3 = vadd.f32 %v5605_v4, %v5597_v38  ;;  %v5610_v15 = vadd.f32 %v5606_v25, %v5598_v33  ;;  %v5537_v58 = vadd.f32 %v5536_v41, %v5523_v62  ;;  %v10063_v41 = vld [vmem:[#allocation14 + $0x8] sm:$0xff] }
 0x3f6   :  { %6382 = vmatpush.bf16.msrb.mxu1 %v10074_v44 }
 0x3f7   :  { %v5616_v24 = vpack.c.bf16 %v5610_v15, %v5609_v3  ;;  %v5551_v17 = vadd.f32 %v5550_v19, %v5537_v58  ;;  %v10071_v3 = vld [vmem:[#allocation14 + $0x48] sm:$0xff] }
 0x3f8   :  { %6370 = vmatpush.bf16.msrb.mxu3 %v10064_v20 }
 0x3f9   :  { %v5556_v31 = vpack.c.bf16 %v5551_v17, %v5439_v0  ;;  %v5621_v2 = vunpack.c.l.bf16 %v5616_v24  ;;  %v5622_v29 = vunpack.c.h.bf16 %v5616_v24 }
 0x3fb   :  { %v5601_v36 = vunpack.c.l.bf16 %v5556_v31  ;;  %v5602_v43 = vunpack.c.h.bf16 %v5556_v31  ;;  %v5637_v16 = vmul.f32 0.20019531, %v5621_v2  ;;  %v5638_v42 = vmul.f32 0.20019531, %v5622_v29 }
 0x3fc   :  { %vm5629_vm15 = vcmp.gt.f32.partialorder %v5621_v2, 0.0  ;;  %vm5630_vm0 = vcmp.gt.f32.partialorder %v5622_v29, 0.0  ;;  %6371 = vmatpush.bf16.msrb.mxu3 %v10063_v41 }
 0x3fd   :  { %v5613_v5 = vadd.f32 %v5605_v4, %v5601_v36  ;;  %v5614_v32 = vadd.f32 %v5606_v25, %v5602_v43  ;;  %v5644_v23 = vpack.c.bf16 %v5638_v42, %v5637_v16  ;;  %vm5648_vm3 = vmpackc.low %vm5630_vm0, %vm5629_vm15  ;;  %v10073_v4 = vld [vmem:[#allocation14 + $0x58] sm:$0xff]  ;;  %v6179_v25 = vpack.c.bf16 %v6176_v9, %v6175_v27 }
 0x3fe   :  { %6383 = vmatpush.bf16.msrb.mxu1 %v10073_v4 }
 0x3ff   :  { %v5618_v63 = vpack.c.bf16 %v5614_v32, %v5613_v5  ;;  %v5652_v7 = vsel %vm5648_vm3, %v5616_v24, %v5644_v23  ;;  %v6181_v38 = vunpack.c.l.b16 %v6179_v25  ;;  %v6182_v33 = vunpack.c.h.b16 %v6179_v25 }
 0x400   :  { %v5725_v21 = vunpack.c.l.b16 %v5652_v7  ;;  %v5726_v45 = vunpack.c.h.b16 %v5652_v7  ;;  %6372 = vmatpush.bf16.msrb.mxu3 %v10062_v8 }
 0x401   :  { %v5625_v10 = vunpack.c.l.bf16 %v5618_v63  ;;  %v5626_v18 = vunpack.c.h.bf16 %v5618_v63  ;;  %v6183_v15 = vpack.c.b16 %v6181_v38, %v6181_v38  ;;  %v6184_v58 = vpack.c.b16 %v6182_v33, %v6182_v33 }
 0x402   :  { %6384 = vmatpush.bf16.msrb.mxu1 %v10072_v40 }
 0x403   :  { %vm5633_vm1 = vcmp.gt.f32.partialorder %v5625_v10, 0.0  ;;  %vm5634_vm2 = vcmp.gt.f32.partialorder %v5626_v18, 0.0  ;;  %v5641_v49 = vmul.f32 0.20019531, %v5625_v10  ;;  %v5642_v39 = vmul.f32 0.20019531, %v5626_v18 }
 0x404   :  { %vm5650_vm4 = vmpackc.low %vm5634_vm2, %vm5633_vm1  ;;  %v6186_v24 = vpack.i.b16 %v6183_v15, %v6183_v15  ;;  %v6190_v17 = vpack.i.b16 %v6184_v58, %v6184_v58 }
 0x405   :  { %v5646_v61 = vpack.c.bf16 %v5642_v39, %v5641_v49 }
 0x406   :  { %6385 = vmatpush.bf16.msrb.mxu1 %v10071_v3  ;;  %v6188_v29 = vperm.slane %v6186_v24, 0  ;;  %v6192_v36 = vperm.slane %v6190_v17, 0 }
 0x407   :  { %v5654_v12 = vsel %vm5650_vm4, %v5618_v63, %v5646_v61 }
 0x408   :  { %v5729_v11 = vunpack.c.l.b16 %v5654_v12  ;;  %v5730_v6 = vunpack.c.h.b16 %v5654_v12  ;;  %v6197_v63 = vunpack.c.l.bf16 %v6188_v29  ;;  %v6198_v23 = vunpack.c.l.bf16 %v6192_v36 }
 0x40a   :  { %v5733_v50 = vpack.c.b16 %v5729_v11, %v5725_v21  ;;  %v5734_v53 = vpack.c.b16 %v5730_v6, %v5726_v45  ;;  %6386 = vmatpush.bf16.msrb.mxu1 %v10070_v14 }
 0x40b   :  { %v6082_v46 = vpop.f32.mrf.mxu1 }
 0x40c   :  { %6095 = vmatmul.bf16.vlgmr.msrb.gmra.mxu2 %v5733_v50  ;;  %6109 = vmatmul.bf16.vlgmr.msrb.gmra.mxu0 %v5734_v53 }
 0x411   :  { %v6068_v54 = vpop.f32.mrf.mxu3 }
 0x412   :  { %v6083_v0 = vadd.f32 %v6082_v46, %v6068_v54 }
 0x413   :  { %v6084_v51 = vpop.f32.mrf.mxu1 }
 0x419   :  { %v6070_v52 = vpop.f32.mrf.mxu3 }
 0x41a   :  { %v6085_v5 = vadd.f32 %v6084_v51, %v6070_v52 }
 0x41b   :  { %v6138_v28 = vpop.f32.mrf.mxu1 }
 0x41c   :  { %6151 = vmatmul.bf16.vlgmr.msra.gmra.mxu2 %v5733_v50  ;;  %6165 = vmatmul.bf16.vlgmr.msra.gmra.mxu0 %v5734_v53 }
 0x421   :  { %v6124_v19 = vpop.f32.mrf.mxu3 }
 0x422   :  { %v6139_v56 = vadd.f32 %v6138_v28, %v6124_v19 }
 0x423   :  { %v6140_v10 = vpop.f32.mrf.mxu1 }
 0x429   :  { %v6126_v42 = vpop.f32.mrf.mxu3 }
 0x42a   :  { %v6141_v18 = vadd.f32 %v6140_v10, %v6126_v42 }
 0x489   :  { %v6110_v35 = vpop.f32.mrf.mxu0 }
 0x48f   :  { %v6096_v48 = vpop.f32.mrf.mxu2 }
 0x490   :  { %v6097_v34 = vadd.f32 %v6096_v48, %v6083_v0 }
 0x491   :  { %v6112_v62 = vpop.f32.mrf.mxu0 }
 0x492   :  { %v6111_v43 = vadd.f32 %v6110_v35, %v6097_v34 }
 0x497   :  { %v6098_v57 = vpop.f32.mrf.mxu2 }
 0x498   :  { %v6099_v49 = vadd.f32 %v6098_v57, %v6085_v5 }
 0x499   :  { %v6166_v1 = vpop.f32.mrf.mxu0 }
 0x49a   :  { %v6113_v6 = vadd.f32 %v6112_v62, %v6099_v49  ;;  %v10103_v62 = vld [vmem:[#allocation16] ss:$0 sm:$0xff] }
 0x49f   :  { %v6152_v31 = vpop.f32.mrf.mxu2 }
 0x4a0   :  { %v6153_v2 = vadd.f32 %v6152_v31, %v6139_v56 }
 0x4a1   :  { %v6168_v45 = vpop.f32.mrf.mxu0 }
 0x4a2   :  { %v6167_v16 = vadd.f32 %v6166_v1, %v6153_v2 }
 0x4a4   :  { %v6171_v32 = vpack.c.bf16 %v6167_v16, %v6111_v43 }
 0x4a6   :  { %v6193_v39 = vunpack.c.l.bf16 %v6171_v32  ;;  %v6194_v61 = vunpack.c.h.bf16 %v6171_v32 }
 0x4a7   :  { %v6154_v7 = vpop.f32.mrf.mxu2 }
 0x4a8   :  { %v6199_v12 = vadd.f32 %v6197_v63, %v6193_v39  ;;  %v6200_v21 = vadd.f32 %v6198_v23, %v6194_v61  ;;  %v6155_v11 = vadd.f32 %v6154_v7, %v6141_v18 }
 0x4aa   :  { %v6203_v50 = vpack.c.bf16 %v6200_v21, %v6199_v12  ;;  %v6169_v53 = vadd.f32 %v6168_v45, %v6155_v11 }
 0x4ac   :  { %v6172_v37 = vpack.c.bf16 %v6169_v53, %v6113_v6  ;;  %v6205_v47 = vunpack.c.l.bf16 %v6203_v50  ;;  %v6206_v60 = vunpack.c.h.bf16 %v6203_v50 }
 0x4ae   :  { %v6195_v55 = vunpack.c.l.bf16 %v6172_v37  ;;  %v6196_v54 = vunpack.c.h.bf16 %v6172_v37  ;;  %v6213_v46 = vmul.f32 0.20019531, %v6205_v47  ;;  %v6214_v22 = vmul.f32 0.20019531, %v6206_v60 }
 0x4af   :  { %vm6209_vm5 = vcmp.gt.f32.partialorder %v6205_v47, 0.0  ;;  %vm6210_vm6 = vcmp.gt.f32.partialorder %v6206_v60, 0.0 }
 0x4b0   :  { %v6201_v26 = vadd.f32 %v6197_v63, %v6195_v55  ;;  %v6202_v13 = vadd.f32 %v6198_v23, %v6196_v54  ;;  %v6217_v59 = vpack.c.bf16 %v6214_v22, %v6213_v46  ;;  %vm6219_vm9 = vmpackc.low %vm6210_vm6, %vm6209_vm5 }
 0x4b2   :  { %v6204_v35 = vpack.c.bf16 %v6202_v13, %v6201_v26  ;;  %v6221_v30 = vsel %vm6219_vm9, %v6203_v50, %v6217_v59 }
 0x4b3   :  { %v6261_v25 = vunpack.c.l.b16 %v6221_v30  ;;  %v6262_v20 = vunpack.c.h.b16 %v6221_v30 }
 0x4b4   :  { %v6207_v44 = vunpack.c.l.bf16 %v6204_v35  ;;  %v6208_v27 = vunpack.c.h.bf16 %v6204_v35 }
 0x4b6   :  { %vm6211_vm7 = vcmp.gt.f32.partialorder %v6207_v44, 0.0  ;;  %vm6212_vm8 = vcmp.gt.f32.partialorder %v6208_v27, 0.0  ;;  %v6215_v9 = vmul.f32 0.20019531, %v6207_v44  ;;  %v6216_v52 = vmul.f32 0.20019531, %v6208_v27 }
 0x4b7   :  { %vm6220_vm10 = vmpackc.low %vm6212_vm8, %vm6211_vm7 }
 0x4b8   :  { %v6218_v48 = vpack.c.bf16 %v6216_v52, %v6215_v9 }
 0x4ba   :  { %v6222_v4 = vsel %vm6220_vm10, %v6204_v35, %v6218_v48 }
 0x4bb   :  { %v6263_v51 = vunpack.c.l.b16 %v6222_v4  ;;  %v6264_v40 = vunpack.c.h.b16 %v6222_v4 }
 0x4bd   :  { %v6265_v38 = vpack.c.b16 %v6263_v51, %v6261_v25  ;;  %v6266_v33 = vpack.c.b16 %v6264_v40, %v6262_v20 }
 0x4bf   :  { %6373 = vmatmul.bf16.vlgmr.msrb.gmra.mxu3 %v6265_v38  ;;  %6387 = vmatmul.bf16.vlgmr.msrb.gmra.mxu1 %v6266_v33 }
 0x53c   :  { %v6388_v57 = vpop.f32.mrf.mxu1 }
 0x542   :  { %v6374_v41 = vpop.f32.mrf.mxu3 }
 0x543   :  { %v6375_v3 = vadd.f32 %v10103_v62, %v6374_v41 }
 0x544   :  { %v6390_v28 = vpop.f32.mrf.mxu1 }
 0x545   :  { %v6389_v15 = vadd.f32 %v6388_v57, %v6375_v3 }
 0x547   :  { %v6393_v58 = vsub.f32 0.0, %v6389_v15 }
 0x549   :  { %v6395_v19 = vmul.f32 1.442695, %v6393_v58 }
 0x54a   :  { %v6376_v8 = vpop.f32.mrf.mxu3 }
 0x54b   :  { %v6377_v14 = vadd.f32 %v10103_v62, %v6376_v8  ;;  %10104 = vpow2.f32 %v6395_v19 }
 0x54d   :  { %v6391_v0 = vadd.f32 %v6390_v28, %v6377_v14 }
 0x54f   :  { %v6394_v24 = vsub.f32 0.0, %v6391_v0 }
 0x551   :  { %v6397_v17 = vmul.f32 1.442695, %v6394_v24  ;;  %v10105_v56 = vpop.eup %10104 }
 0x552   :  { %v6399_v34 = vadd.f32 1.0, %v10105_v56 }
 0x553   :  { %10106 = vpow2.f32 %v6397_v17 }
 0x554   :  { %10108 = vrcp.f32 %v6399_v34 }
 0x559   :  { %v10107_v1 = vpop.eup %10106 }
 0x55a   :  { %v6400_v31 = vadd.f32 1.0, %v10107_v1  ;;  %v10109_v2 = vpop.eup %10108 }
 0x55c   :  { %10110 = vrcp.f32 %v6400_v31 }
 0x562   :  { %v10111_v29 = vpop.eup %10110 }
 0x563   :  { %v10081_v36 = vpack.c.bf16 %v10111_v29, %v10109_v2 }
 0x565   :  { %10082 = vst [vmem:[#allocation17] sm:$0xff] %v10081_v36  }
 0x566   :  { %6419 = dma.vmem_to_hbm [thread:$0]  %s6412_s8, 128, %s6414_s16, [#allocation4], %s10375_s12, %s10375_s12, %s10376_s13  }
 0x567   :  { %10363 = dma.done.wait [#allocation4], 128  }
 0x568   :  { %10364 = vsyncadd [#allocation4], 4294967168 }
 0x569   :  { %6424 = vsyncpa [#allocation3], 1 }
 0x56a   :  { %6425 = vsyncpa [#allocation6], 1 }
 0x56b   :  { %6426 = vsyncpa [#allocation9], 1 }
 0x56c   :  { %6427 = vsyncpa [#allocation12], 1 }
 0x56d   :  { %6428 = vsyncpa [#allocation15], 1 }
 0x56e   :  { %6429 = vsyncpa [#allocation4], 1 }

</bundles_post_ra>
